<compile_context>
chip_gen: v7x
topology: tpu7x:2x2x1
jax: 0.10.0
libtpu: 0.0.40
codegen_flags: <defaults>
</compile_context>

<pallas_src>
import functools

import jax
import jax.numpy as jnp
from jax.experimental import pallas as pl
from jax.experimental.pallas import tpu as pltpu


def _csmr_kernel(x_ref, tgt_ref, inv_en_ref, emb_ref, rowsum_ref,
                 *, margin, batch, block_b):
    i = pl.program_id(0)

    x = x_ref[...]                                   # [TB, D] activation tile
    t = tgt_ref[...].astype(jnp.float32)             # [TB, C] binary targets

    # Cosine numerator on the MXU: bf16 operands, f32 accumulation.
    dots = jnp.dot(x.astype(jnp.bfloat16), emb_ref[...],
                   preferred_element_type=jnp.float32)            # [TB, C]

    # Row inverse norms from the f32 activations (rsqrt -> EUP slot).
    xf = x.astype(jnp.float32)
    inv_xn = jax.lax.rsqrt(jnp.sum(xf * xf, axis=1, keepdims=True))   # [TB, 1]
    cos = dots * inv_xn * inv_en_ref[...]                             # [TB, C]

    sum_t = jnp.sum(t, axis=1, keepdims=True)                         # [TB, 1]
    has_pos = sum_t > 0.0
    tmp_num = jnp.sum(t * cos, axis=1, keepdims=True)                 # [TB, 1]
    # Guarded divide: rows without positive labels are zeroed below (torch
    # reaches the same result via 0/0 -> NaN -> 0).
    tmp = tmp_num / jnp.where(has_pos, sum_t, 1.0)                    # [TB, 1]

    # one-hot t  =>  (1-t)*(margin - tmp + (1-t)*cos) == (1-t)*(margin - tmp + cos)
    hinge = (1.0 - t) * (margin - tmp + cos)                          # [TB, C]

    # Row validity: (a) rows with at least one positive label (NaN path in
    # torch), (b) in-bounds rows of a ragged last batch tile.
    row_ids = i * block_b + jax.lax.broadcasted_iota(jnp.int32, (block_b, 1), 0)
    valid = has_pos & (row_ids < batch)

    # Fused select: NaN > 0 is False, so NaN/garbage entries and invalid rows
    # all map to 0.0; positive finite entries pass through (hinge).
    loss = jnp.where(valid & (hinge > 0.0), hinge, 0.0)               # [TB, C]

    # Per-row hinge sums; the wrapper reduces across the batch and divides by B.
    rowsum_ref[...] = jnp.sum(loss, axis=1, keepdims=True)            # [TB, 1]


def _default_block_b():
    """128 rows on v5e (4x128x128 MXU); 256 rows on v6e/v7x (2x256x256 MXU)."""
    try:
        kind = jax.devices()[0].device_kind.lower()
    except Exception:
        kind = ""
    if ("v5 lite" in kind) or ("v5e" in kind) or ("v5lite" in kind):
        return 128
    return 256


def csmr_loss(output, target_onehot, embeddings, margin=1.0, block_b=None):
    """Pallas CSMR loss. output: [B, D], target_onehot: [B, C] (binary), embeddings: [D, C]."""
    B, D = output.shape
    D2, C = embeddings.shape
    assert D2 == D and target_onehot.shape == (B, C)

    if block_b is None:
        block_b = _default_block_b()
    tb = B if B <= block_b else block_b
    num_tiles = pl.cdiv(B, tb)

    # Hoisted, grid-invariant pieces (computed once in f32 for accuracy).
    emb_f32 = embeddings.astype(jnp.float32)
    inv_e_norm = jax.lax.rsqrt(jnp.sum(emb_f32 * emb_f32, axis=0, keepdims=True))  # [1, C]
    emb_bf16 = embeddings.astype(jnp.bfloat16)           # MXU-native, half the VMEM
    tgt_i8 = target_onehot.astype(jnp.int8)               # 4x smaller [B, C] DMA stream

    kernel = functools.partial(_csmr_kernel, margin=float(margin), batch=B, block_b=tb)

    x_itemsize = jnp.dtype(output.dtype).itemsize
    # VMEM budget from the actual buffer arithmetic:
    #   double-buffered streamed tiles + single-buffered resident blocks + f32 temps.
    needed = (2 * tb * D * x_itemsize      # activation row tiles
              + 2 * tb * C * 1             # int8 target tiles
              + 2 * tb * 1 * 4             # row-sum output tiles
              + 1 * D * C * 2              # resident bf16 embeddings (Buffered(1))
              + 1 * C * 4                  # resident inverse column norms
              + 6 * tb * C * 4)            # f32 [TB, C] temporaries headroom
    vmem_limit = min(int(needed * 1.5) + (4 << 20), 100 << 20)

    cost = pl.CostEstimate(
        flops=2 * B * D * C + 8 * B * C,
        transcendentals=B + C,
        bytes_accessed=B * D * x_itemsize + B * C * 1 + D * C * 2 + C * 4 + B * 4,
    )

    row_sums = pl.pallas_call(
        kernel,
        out_shape=jax.ShapeDtypeStruct((B, 1), jnp.float32),
        grid=(num_tiles,),
        in_specs=[
            pl.BlockSpec((tb, D), lambda i: (i, 0)),    # activations: pipelined per tile
            pl.BlockSpec((tb, C), lambda i: (i, 0)),    # int8 targets: pipelined per tile
            pl.BlockSpec((1, C), lambda i: (0, 0),      # inverse column norms: resident
                         pipeline_mode=pl.Buffered(1)),
            pl.BlockSpec((D, C), lambda i: (0, 0),      # bf16 embeddings: resident
                         pipeline_mode=pl.Buffered(1)),
        ],
        out_specs=pl.BlockSpec((tb, 1), lambda i: (i, 0)),
        compiler_params=pltpu.CompilerParams(
            # Tiles are independent (per-tile partial outputs) -> megacore-parallel.
            dimension_semantics=("parallel",),
            vmem_limit_bytes=vmem_limit,
        ),
        cost_estimate=cost,
    )(output, tgt_i8, inv_e_norm, emb_bf16)

    return jnp.sum(row_sums) / B


def csmr_loss_ref(output, target_onehot, embeddings, margin=1.0):
    """Plain-JAX reference mirroring the PyTorch forward exactly."""
    x = output.astype(jnp.float32)
    t = target_onehot.astype(jnp.float32)
    e = embeddings.astype(jnp.float32)
    cos = (x @ e) / (jnp.sqrt(jnp.sum(x ** 2, axis=1, keepdims=True))
                     @ jnp.sqrt(jnp.sum(e ** 2, axis=0, keepdims=True)))
    false_terms = (1.0 - t) * cos
    tmp = jnp.sum(t * cos, axis=1) / jnp.sum(t, axis=1)
    loss = (1.0 - t) * (margin - tmp[:, None] + false_terms)
    loss = jnp.where(jnp.isnan(loss), 0.0, loss)
    loss = jnp.maximum(loss, 0.0)
    return jnp.mean(jnp.sum(loss, axis=1))


if __name__ == "__main__":
    # B not a multiple of the batch tile to exercise the ragged-tile mask;
    # D, C lane-aligned (multiples of 128).
    B, D, C = 320, 128, 256

    key = jax.random.PRNGKey(0)
    k_out, k_emb, k_tgt = jax.random.split(key, 3)

    output = jax.random.normal(k_out, (B, D), dtype=jnp.float32)
    embeddings = jax.random.normal(k_emb, (D, C), dtype=jnp.float32)
    # Multi-label one-hot targets.
    target_onehot = (jax.random.uniform(k_tgt, (B, C)) < 0.03).astype(jnp.float32)
    # Exercise the degenerate paths the module handles via its NaN mask:
    target_onehot = target_onehot.at[5].set(0.0)   # row with no positive labels
    output = output.at[7].set(0.0)                 # zero-norm output row

    loss = csmr_loss(output, target_onehot, embeddings, margin=1.0)
    loss = jax.block_until_ready(loss)

    ref = csmr_loss_ref(output, target_onehot, embeddings, margin=1.0)
    # bf16 MXU operands perturb the cosines by O(1e-4); loss magnitude is O(B-ish).
    assert jnp.allclose(loss, ref, rtol=2e-3, atol=2e-3), (loss, ref)

    print("KERNEL_OK")
</pallas_src>

<mosaic_0001>
module attributes {stable_mosaic.version = 11 : i64} {
  func.func @_csmr_kernel(%arg0: i32, %arg1: memref<256x128xf32, #tpu.memory_space<vmem>>, %arg2: memref<256x256xi8, #tpu.memory_space<vmem>>, %arg3: memref<1x256xf32, #tpu.memory_space<vmem>>, %arg4: memref<128x256xbf16, #tpu.memory_space<vmem>>, %arg5: memref<256x1xf32, #tpu.memory_space<vmem>>) attributes {dimension_semantics = [#tpu.dimension_semantics<parallel>], iteration_bounds = array<i64: 2>, scalar_prefetch = 0 : i64, scratch_operands = 0 : i64, tpu.core_type = #tpu.core_type<tc>, window_params = [{transform_indices = @transform_0, window_bounds = array<i64: 256, 128>}, {transform_indices = @transform_1, window_bounds = array<i64: 256, 256>}, {pipeline_mode = #tpu.pipeline_mode<synchronous>, transform_indices = @transform_2, window_bounds = array<i64: 1, 256>}, {pipeline_mode = #tpu.pipeline_mode<synchronous>, transform_indices = @transform_3, window_bounds = array<i64: 128, 256>}, {transform_indices = @transform_4, window_bounds = array<i64: 256, 1>}]} {
    %c0 = arith.constant 0 : index
    %c0_0 = arith.constant 0 : index
    %0 = vector.load %arg1[%c0, %c0_0] : memref<256x128xf32, #tpu.memory_space<vmem>>, vector<256x128xf32>
    %c0_1 = arith.constant 0 : index
    %c0_2 = arith.constant 0 : index
    %1 = vector.load %arg2[%c0_1, %c0_2] : memref<256x256xi8, #tpu.memory_space<vmem>>, vector<256x256xi8>
    %2 = arith.sitofp %1 : vector<256x256xi8> to vector<256x256xf32>
    %3 = arith.truncf %0 : vector<256x128xf32> to vector<256x128xbf16>
    %c0_3 = arith.constant 0 : index
    %c0_4 = arith.constant 0 : index
    %4 = vector.load %arg4[%c0_3, %c0_4] : memref<128x256xbf16, #tpu.memory_space<vmem>>, vector<128x256xbf16>
    %cst = arith.constant dense<0.000000e+00> : vector<256x256xf32>
    %5 = tpu.matmul %3, %4, %cst {dimension_numbers = #tpu.dot_dimension_numbers<[1], [0], [0], [1], [0, 0, 1, 1], [], []>} : vector<256x128xbf16>, vector<128x256xbf16>, vector<256x256xf32> -> vector<256x256xf32>
    %6 = arith.mulf %0, %0 : vector<256x128xf32>
    %cst_5 = arith.constant dense<0.000000e+00> : vector<256xf32>
    %7 = vector.multi_reduction <add>, %6, %cst_5 [1] : vector<256x128xf32> to vector<256xf32>
    %8 = vector.shape_cast %7 : vector<256xf32> to vector<256x1xf32>
    %9 = math.rsqrt %8 : vector<256x1xf32>
    %10 = vector.broadcast %9 : vector<256x1xf32> to vector<256x256xf32>
    %11 = arith.mulf %5, %10 : vector<256x256xf32>
    %c0_6 = arith.constant 0 : index
    %c0_7 = arith.constant 0 : index
    %12 = vector.load %arg3[%c0_6, %c0_7] : memref<1x256xf32, #tpu.memory_space<vmem>>, vector<1x256xf32>
    %13 = vector.broadcast %12 : vector<1x256xf32> to vector<256x256xf32>
    %14 = arith.mulf %11, %13 : vector<256x256xf32>
    %cst_8 = arith.constant dense<0.000000e+00> : vector<256xf32>
    %15 = vector.multi_reduction <add>, %2, %cst_8 [1] : vector<256x256xf32> to vector<256xf32>
    %16 = vector.shape_cast %15 : vector<256xf32> to vector<256x1xf32>
    %cst_9 = arith.constant 0.000000e+00 : f32
    %17 = vector.broadcast %cst_9 : f32 to vector<256x1xf32>
    %18 = arith.cmpf ogt, %16, %17 : vector<256x1xf32>
    %19 = arith.mulf %2, %14 : vector<256x256xf32>
    %cst_10 = arith.constant dense<0.000000e+00> : vector<256xf32>
    %20 = vector.multi_reduction <add>, %19, %cst_10 [1] : vector<256x256xf32> to vector<256xf32>
    %21 = vector.shape_cast %20 : vector<256xf32> to vector<256x1xf32>
    %cst_11 = arith.constant 1.000000e+00 : f32
    %22 = vector.broadcast %cst_11 : f32 to vector<256x1xf32>
    %23 = arith.select %18, %16, %22 : vector<256x1xi1>, vector<256x1xf32>
    %24 = arith.divf %21, %23 : vector<256x1xf32>
    %cst_12 = arith.constant 1.000000e+00 : f32
    %25 = vector.broadcast %cst_12 : f32 to vector<256x256xf32>
    %26 = arith.subf %25, %2 : vector<256x256xf32>
    %cst_13 = arith.constant 1.000000e+00 : f32
    %27 = vector.broadcast %cst_13 : f32 to vector<256x1xf32>
    %28 = arith.subf %27, %24 : vector<256x1xf32>
    %29 = vector.broadcast %28 : vector<256x1xf32> to vector<256x256xf32>
    %30 = arith.addf %29, %14 : vector<256x256xf32>
    %31 = arith.mulf %26, %30 : vector<256x256xf32>
    %c256_i32 = arith.constant 256 : i32
    %32 = arith.muli %arg0, %c256_i32 : i32
    %33 = tpu.iota {dimensions = array<i32: 0>} : vector<256x1xi32>
    %34 = vector.broadcast %32 : i32 to vector<256x1xi32>
    %35 = arith.addi %34, %33 : vector<256x1xi32>
    %c320_i32 = arith.constant 320 : i32
    %36 = vector.broadcast %c320_i32 : i32 to vector<256x1xi32>
    %37 = arith.cmpi slt, %35, %36 : vector<256x1xi32>
    %38 = arith.andi %18, %37 : vector<256x1xi1>
    %cst_14 = arith.constant 0.000000e+00 : f32
    %39 = vector.broadcast %cst_14 : f32 to vector<256x256xf32>
    %40 = arith.cmpf ogt, %31, %39 : vector<256x256xf32>
    %41 = vector.broadcast %38 : vector<256x1xi1> to vector<256x256xi1>
    %42 = arith.andi %41, %40 : vector<256x256xi1>
    %cst_15 = arith.constant 0.000000e+00 : f32
    %43 = vector.broadcast %cst_15 : f32 to vector<256x256xf32>
    %44 = arith.select %42, %31, %43 : vector<256x256xi1>, vector<256x256xf32>
    %cst_16 = arith.constant dense<0.000000e+00> : vector<256xf32>
    %45 = vector.multi_reduction <add>, %44, %cst_16 [1] : vector<256x256xf32> to vector<256xf32>
    %46 = vector.shape_cast %45 : vector<256xf32> to vector<256x1xf32>
    %c0_17 = arith.constant 0 : index
    %c0_18 = arith.constant 0 : index
    %47 = vector.load %arg5[%c0_17, %c0_18] : memref<256x1xf32, #tpu.memory_space<vmem>>, vector<256x1xf32>
    tpu.vector_store %arg5[%c0_17, %c0_18], %46 {strides = array<i32>} : memref<256x1xf32, #tpu.memory_space<vmem>>, vector<256x1xf32>,
    return
  }
  func.func @transform_0(%arg0: i32) -> (i32, i32) {
    %c0_i32 = arith.constant 0 : i32
    %c0_i32_0 = arith.constant 0 : i32
    return %arg0, %c0_i32 : i32, i32
  }
  func.func @transform_1(%arg0: i32) -> (i32, i32) {
    %c0_i32 = arith.constant 0 : i32
    %c0_i32_0 = arith.constant 0 : i32
    return %arg0, %c0_i32 : i32, i32
  }
  func.func @transform_2(%arg0: i32) -> (i32, i32) {
    %c0_i32 = arith.constant 0 : i32
    %c0_i32_0 = arith.constant 0 : i32
    %c0_i32_1 = arith.constant 0 : i32
    return %c0_i32, %c0_i32_0 : i32, i32
  }
  func.func @transform_3(%arg0: i32) -> (i32, i32) {
    %c0_i32 = arith.constant 0 : i32
    %c0_i32_0 = arith.constant 0 : i32
    %c0_i32_1 = arith.constant 0 : i32
    return %c0_i32, %c0_i32_0 : i32, i32
  }
  func.func @transform_4(%arg0: i32) -> (i32, i32) {
    %c0_i32 = arith.constant 0 : i32
    %c0_i32_0 = arith.constant 0 : i32
    return %arg0, %c0_i32 : i32, i32
  }
}

</mosaic_0001>

<bundles_post_ra>
// kernel: tpu_custom_call.1
= control target key start
LH: loop header
LB: loop body
LE: loop exit
PB: predicated region body
PF: predicated region fallthrough
CT: control target
= control target key end

     0   :  { %9 = vsyncpa [#allocation3], 0  ;;  %s5739_s0 = inlined_call_operand.hbm [shape: f32[320,128], index: 0, kind: input, shape index: {}]   ;;  %s5740_s1 = inlined_call_operand.hbm [shape: s8[320,256], index: 1, kind: input, shape index: {}]   ;;  %s5741_s2 = inlined_call_operand.vmem [shape: f32[1,256], index: 2, kind: input, shape index: {}]   ;;  %s5742_s3 = inlined_call_operand.hbm [shape: bf16[128,256], index: 3, kind: input, shape index: {}]   ;;  %s5743_s4 = inlined_call_operand.vmem [shape: f32[320,1], index: 4, kind: output, shape index: {}]  }
   0x1   :  { %11 = vsyncpa [#allocation3 + $0x1], 0 }
   0x2   :  { %12 = vsyncpa [#allocation5], 0 }
   0x3   :  { %14 = vsyncpa [#allocation5 + $0x1], 0  ;;  %s3129_s15 = smov 0   ;;  %s3131_s16 = smov 0  }
   0x4   :  { %s3133_s17 = smov 0   ;;  %s3135_s18 = smov 0  }
   0x5 LB: > { %s3148_s19 = sadd.s32 4294967295, %s3060_s18   ;;  %s3151_s20 = sadd.s32 1, %s3060_s18   ;;  %s3060_s18 = sphi %s3135_s18, %s6722_s18   ;;  %s3056_s17 = sphi %s3133_s17, %s6721_s17   ;;  %s3052_s16 = sphi %s3131_s16, %s6720_s16   ;;  %s3048_s15 = sphi %s3129_s15, %s6719_s15  }
   0x6   : > { %s24_s21 = ssub.s32 %s3060_s18, %s3151_s20  ;;  %s27_s22 = sadd.s32 1, %s3056_s17 }
   0x7   : > { %p25_p0 = scmp.eq.s32.totalorder %s24_s21, 0  ;;  %p34_p1 = scmp.ne.s32.totalorder %s3056_s17, %s3052_s16 }
   0x8   : > { %p35_p2 = scmp.eq.s32.totalorder %s3060_s18, 0  ;;  %p40_p3 = scmp.ne.s32.totalorder %s3052_s16, %s3048_s15 }
   0x9   : > { %s3161_s23 = scalar_select %p25_p0, %s3056_s17, %s27_s22  }
   0xa   : > { %p3163_p4 = por %p35_p2, %p34_p1  ;;  %p5744_p5 = scmp.eq.s32.totalorder %s3148_s19, 0 }
   0xb   : > { %p132_p6 = scmp.eq.s32.totalorder %s3148_s19, 1  ;;  %p2553_p7 = scmp.ge.s32.totalorder %s3060_s18, 1 }
   0xc   : > { %s6019_s24 = scalar_select %p3163_p4, 1, 0 }
   0xd   : > { %p3172_p8 = por %p5744_p5, %p40_p3  ;;  %p145_p9 = scmp.lt.s32.totalorder %s3060_s18, 3 }
   0xe   : > { %p3177_p10 = por %p132_p6, %p34_p1  ;;  %s3094_s28 = smov [#allocation6]  }
   0xf   : > { %s6020_s25 = scalar_select %p3172_p8, 1, 0 }
  0x10   : > { %s6021_s26 = scalar_select %p3177_p10, 1, 0 }
  0x11   : > { %p3181_p11 = pnand %p2553_p7, %p145_p9  ;;  %s160_s29 = sshll.u32 %s3094_s28, 4  ;;  %s161_s29 = int_to_ptr.vmem [resolvable:$true] %s160_s29 }
  0x12   : > { %s2902_s7 = scalar_lea.hbm %s5742_s3, 2048 }
  0x13   : > { %s6022_s27 = scalar_select %p3181_p11, 1, 0 }
  0x14   : > { %p2640_p12 = pneg %p3181_p11  ;;  %p2903_p0 = scmp.ne.s32.totalorder %s5742_s3, %s2902_s7 }
  0x15   : > { %p2909_p6 = scmp.lt.u32.totalorder %s2902_s7, %s5742_s3 }
  0x16   : > { %p3189_p13 = pnand %p2640_p12, %p5744_p5 }
  0x18   : > { %p2904_p1 = pneg %p3189_p13 }
  0x1a   : > { %p2905_p2 = pnand %p2904_p1, %p2903_p0 }
  0x1c   : > { %p2906_p3 = pneg %p2905_p2 }
  0x1e   : > { %p2911_p7 = pnand %p2909_p6, %p2906_p3 }
  0x20   : > { %2914 = shalt.err (!%p2911_p7)
}
  0x21   : > { %s2915_s12 = scalar_lea.vmem %s161_s29, 2048  ;;  %p2923_p10 = scmp.lt.s32.totalorder %s161_s29, %s161_s29 }
  0x22   : > { %p2916_p9 = scmp.ne.s32.totalorder %s161_s29, %s2915_s12  ;;  %p2924_p8 = scmp.lt.s32.totalorder %s2915_s12, %s2915_s12 }
  0x24   : > { %p2918_p12 = pnand %p2916_p9, %p2904_p1  ;;  %p2925_p11 = por %p2924_p8, %p2923_p10 }
  0x26   : > { %p2919_p5 = pneg %p2918_p12 }
  0x28   : > { %p2926_p4 = pnand %p2925_p11, %p2919_p5 }
  0x2a   : > { %2929 = shalt.err (!%p2926_p4)
}
  0x2b   : > { %s3095_s13 = smov 128   ;;  %s3096_s14 = smov 8  }
  0x2c   : > { %2643 = dma.hbm_to_vmem [thread:$0]  (!%p3189_p13), %s5742_s3, 2048, %s161_s29, [#allocation5], %s3095_s13, %s3095_s13, %s3096_s14  }
  0x2d   : > { %p2555_p0 = scmp.ge.s32.totalorder %s3060_s18, 2 }
  0x2e   : > { %p6024_p2 = scmp.ne.s32.totalorder (!%p2555_p0), %s6019_s24, 0 }
  0x2f   : > { %170 = sbr.rel (%p2555_p0) target bundleno = 126 (0x7e), region = 24 }
  0x36   : > { %173 = sbr.rel (!%p6024_p2) target bundleno = 89 (0x59), region = 28  ;;  %s174_s22 = sand.u32 (%p6024_p2), 1, %s3056_s17  }
  0x37   : > { %s2557_s28 = sshll.u32 (%p6024_p2), %s3060_s18, 5  ;;  %s2556_s5 = sshll.u32 (%p6024_p2), %s174_s22, 8 }
  0x38   : > { %s180_s6 = ssub.s32 (%p6024_p2), 40, %s2557_s28  ;;  %s3217_s8 = scalar_lea.sflag (%p6024_p2), [#allocation3], %s174_s22 }
  0x39   : > { %p181_p4 = scmp.lt.s32.totalorder (%p6024_p2), %s180_s6, 32  ;;  %s178_s29 = scalar_lea.vmem (%p6024_p2), [#allocation2], %s2556_s5 }
  0x3d   : > { %s6724_s6 = smov (!%p181_p4, %s180_s6), 32 }
  0x3e   : > { %s3214_s7 = sshll.u32 %s6724_s6, 7 }
  0x3f   : > { %s185_s30 = ssub.s32 4096, %s3214_s7 }
  0x40   : > { %186 = vsyncadd %s3217_s8, %s185_s30  ;;  %p2559_p5 = scmp.ne.s32.totalorder %s3214_s7, 0  ;;  %s2611_s9 = sshll.u32 %s3060_s18, 12 }
  0x41   : > { %s3225_s12 = scalar_lea.hbm %s5739_s0, %s2611_s9  ;;  %s191_s13 = sshll.u32 %s178_s29, 4  ;;  %s3227_s13 = int_to_ptr.vmem [resolvable:$true] %s191_s13 }
  0x42   : > { %s2930_s14 = scalar_lea.hbm %s3225_s12, %s3214_s7  ;;  %s2934_s22 = scalar_lea.hbm %s5739_s0, 5120 }
  0x43   : > { %p2931_p8 = scmp.ne.s32.totalorder %s3225_s12, %s2930_s14  ;;  %p2935_p13 = scmp.lt.u32.totalorder %s3225_s12, %s5739_s0 }
  0x44   : > { %p2936_p1 = scmp.lt.u32.totalorder %s2934_s22, %s2930_s14  ;;  %p2938_p6 = scmp.lt.u32.totalorder %s2930_s14, %s3225_s12 }
  0x45   : > { %p2932_p10 = pnand %p2931_p8, %p2559_p5 }
  0x46   : > { %p2937_p3 = por %p2936_p1, %p2935_p13 }
  0x47   : > { %p2933_p11 = pneg %p2932_p10 }
  0x48   : > { %p2939_p7 = por %p2938_p6, %p2937_p3 }
  0x4a   : > { %p2940_p9 = pnand %p2939_p7, %p2933_p11 }
  0x4c   : > { %2943 = shalt.err (!%p2940_p9)
}
  0x4d   : > { %s2944_s6 = scalar_lea.vmem %s3227_s13, %s3214_s7  ;;  %s3097_s30 = smov [#allocation2]  }
  0x4e   : > { %p2945_p12 = scmp.ne.s32.totalorder %s3227_s13, %s2944_s6  ;;  %s2948_s29 = sshll.u32 %s3097_s30, 4  ;;  %s2949_s29 = int_to_ptr.vmem [resolvable:$false] %s2948_s29 }
  0x4f   : > { %s2950_s9 = scalar_lea.vmem %s2949_s29, 8192  ;;  %p2951_p4 = scmp.lt.s32.totalorder %s3227_s13, %s2949_s29 }
  0x50   : > { %p2946_p0 = pnand %p2945_p12, %p2559_p5  ;;  %p2952_p8 = scmp.lt.s32.totalorder %s2950_s9, %s2944_s6 }
  0x52   : > { %p2947_p2 = pneg %p2946_p0  ;;  %p2953_p10 = por %p2952_p8, %p2951_p4 }
  0x54   : > { %p2954_p13 = pnand %p2953_p10, %p2947_p2 }
  0x56   : > { %2957 = shalt.err (!%p2954_p13)
}
  0x57   : > { %s3098_s10 = smov 128   ;;  %s3099_s11 = smov 8  }
  0x58   : > { %197 = dma.hbm_to_vmem [thread:$0]  (%p2559_p5), %s3225_s12, %s3214_s7, %s3227_s13, %s3217_s8, %s3098_s10, %s3098_s10, %s3099_s11  }
  0x59 PF: > { %p6025_p11 = scmp.ne.s32.totalorder %s6019_s24, 0 }
  0x5a   : > { %s201_s14 = sand.u32 (%p6025_p11), 1, %s3060_s18   ;;  %s203_s15 = sand.u32 (%p6025_p11), 1, %s3056_s17  }
  0x5b   : > { %200 = sbr.rel (!%p6025_p11) target bundleno = 126 (0x7e), region = 32  ;;  %s2563_s21 = sshll.u32 (%p6025_p11), %s203_s15, 7 }
  0x5c   : > { %s2564_s22 = sshll.u32 (%p6025_p11), %s3060_s18, 3  ;;  %s3262_s30 = scalar_lea.sflag (%p6025_p11), [#allocation5], %s201_s14 }
  0x5d   : > { %s207_s28 = ssub.s32 (%p6025_p11), 10, %s2564_s22  ;;  %s205_s7 = scalar_lea.vmem (%p6025_p11), [#allocation4], %s2563_s21 }
  0x5e   : > { %p208_p1 = scmp.lt.s32.totalorder (%p6025_p11), %s207_s28, 8 }
  0x62   : > { %s6726_s28 = smov (!%p208_p1, %s207_s28), 8 }
  0x63   : > { %s3259_s5 = sshll.u32 %s6726_s28, 8 }
  0x64   : > { %s213_s6 = ssub.s32 2048, %s3259_s5 }
  0x65   : > { %214 = vsyncadd %s3262_s30, %s213_s6  ;;  %p2567_p5 = scmp.ne.s32.totalorder %s3259_s5, 0  ;;  %s2614_s24 = sshll.u32 %s3060_s18, 11 }
  0x66   : > { %s3270_s13 = scalar_lea.hbm %s5740_s1, %s2614_s24  ;;  %s220_s29 = sshll.u32 %s205_s7, 4  ;;  %s3272_s29 = int_to_ptr.vmem [resolvable:$true] %s220_s29 }
  0x67   : > { %s2958_s9 = scalar_lea.hbm %s3270_s13, %s3259_s5  ;;  %s2962_s18 = scalar_lea.hbm %s5740_s1, 2560 }
  0x68   : > { %p2959_p3 = scmp.ne.s32.totalorder %s3270_s13, %s2958_s9  ;;  %p2963_p9 = scmp.lt.u32.totalorder %s3270_s13, %s5740_s1 }
  0x69   : > { %p2964_p12 = scmp.lt.u32.totalorder %s2962_s18, %s2958_s9  ;;  %p2966_p2 = scmp.lt.u32.totalorder %s2958_s9, %s3270_s13 }
  0x6a   : > { %p2960_p6 = pnand %p2959_p3, %p2567_p5 }
  0x6b   : > { %p2965_p0 = por %p2964_p12, %p2963_p9 }
  0x6c   : > { %p2961_p7 = pneg %p2960_p6 }
  0x6d   : > { %p2967_p4 = por %p2966_p2, %p2965_p0 }
  0x6f   : > { %p2968_p8 = pnand %p2967_p4, %p2961_p7 }
  0x71   : > { %2971 = shalt.err (!%p2968_p8)
}
  0x72   : > { %s2972_s21 = scalar_lea.vmem %s3272_s29, %s3259_s5  ;;  %s3100_s22 = smov [#allocation4]  }
  0x73   : > { %p2973_p10 = scmp.ne.s32.totalorder %s3272_s29, %s2972_s21  ;;  %s2976_s28 = sshll.u32 %s3100_s22, 4  ;;  %s2977_s28 = int_to_ptr.vmem [resolvable:$false] %s2976_s28 }
  0x74   : > { %s2978_s6 = scalar_lea.vmem %s2977_s28, 4096  ;;  %p2979_p1 = scmp.lt.s32.totalorder %s3272_s29, %s2977_s28 }
  0x75   : > { %p2974_p13 = pnand %p2973_p10, %p2567_p5  ;;  %p2980_p3 = scmp.lt.s32.totalorder %s2978_s6, %s2972_s21 }
  0x77   : > { %p2975_p11 = pneg %p2974_p13  ;;  %p2981_p6 = por %p2980_p3, %p2979_p1 }
  0x79   : > { %p2982_p9 = pnand %p2981_p6, %p2975_p11 }
  0x7b   : > { %2985 = shalt.err (!%p2982_p9)
}
  0x7c   : > { %s3101_s7 = smov 256   ;;  %s3102_s24 = smov 16  }
  0x7d   : > { %226 = dma.hbm_to_vmem [thread:$0]  (%p2567_p5), %s3270_s13, %s3259_s5, %s3272_s29, %s3262_s30, %s3101_s7, %s3101_s7, %s3102_s24  }
  0x7e PF: > { %p6026_p7 = scmp.ne.s32.totalorder %s6022_s27, 0 }
  0x80   : > { %232 = sbr.rel (%p6026_p7) target bundleno = 867 (0x363), region = 36 }
  0x87   : > { %s3302_s8 = sand.u32 1, %s3052_s16   ;;  %p6027_p12 = scmp.ne.s32.totalorder %s6020_s25, 0 }
  0x88   : > { %s2573_s12 = sshll.u32 %s3302_s8, 8  ;;  %s235_s9 = scalar_lea.sflag [#allocation3], %s3302_s8 }
  0x89   : > { %s3308_s10 = scalar_lea.vmem [#allocation2], %s2573_s12 }
  0x8a   : > { %3035 = dma.done.wait (%p6027_p12), %s235_s9, 4096  }
  0x8b   : > { %3037 = vsyncadd (%p6027_p12), %s235_s9, 4294963200  ;;  %s243_s27 = sand.u32 1, %s3148_s19   ;;  %s2574_s5 = sshll.u32 %s3302_s8, 7 }
  0x8c   : > { %s244_s30 = scalar_lea.sflag [#allocation5], %s243_s27  ;;  %s3316_s13 = scalar_lea.vmem [#allocation4], %s2574_s5 }
  0x8d   : > { %3039 = dma.done.wait (%p6027_p12), %s244_s30, 2048  }
  0x8e   : > { %3041 = vsyncadd (%p6027_p12), %s244_s30, 4294965248  ;;  %p6028_p5 = scmp.eq.s32.totalorder %s3148_s19, 0 }
  0x90   : > { %3043 = dma.done.wait (%p6028_p5), [#allocation5], 2048   ;;  %p6029_p0 = pmov %p6028_p5 }
  0x91   : > { %v3103_v0 = vmov 0   ;;  %v2750_v1 = vld [vmem:[#allocation6 + $0x4] ss:$8 sps:$4 sm:$0xff]   ;;  %v2752_v2 = vld [vmem:[#allocation6] ss:$8 sps:$4 sm:$0xff]   ;;  %v3337_v13 = vld [vmem:[%s3308_s10 + $0x10] sm:$0xff] }
  0x92   : > { %3045 = vsyncadd (%p6029_p0), [#allocation5], 4294965248  ;;  %617 = vmatprep.mubr.bf16.mxu0 %v3103_v0  ;;  %697 = vmatprep.mubr.bf16.mxu1 %v3103_v0  ;;  %v2753_v3 = vld [vmem:[#allocation6 + $0x14] ss:$8 sps:$4 sm:$0xff]   ;;  %v2755_v4 = vld [vmem:[#allocation6 + $0x10] ss:$8 sps:$4 sm:$0xff]   ;;  %v780_v14 = vmul.f32 %v3337_v13, %v3337_v13 }
  0x93   : > { %585 = vmatprep.subr.bf16.mxu0 %v2750_v1  ;;  %2618 = vmatprep.subr.bf16.mxu1 %v2750_v1  ;;  %v2756_v5 = vld [vmem:[#allocation6 + $0x24] ss:$8 sps:$4 sm:$0xff]   ;;  %v2758_v6 = vld [vmem:[#allocation6 + $0x20] ss:$8 sps:$4 sm:$0xff]   ;;  %v2759_v7 = vld [vmem:[#allocation6 + $0x34] ss:$8 sps:$4 sm:$0xff]  }
  0x94   : > { %586 = vmatpush1.bf16.msra.mxu0 %v2752_v2  ;;  %2626 = vmatpush1.bf16.msra.mxu1 %v2752_v2  ;;  %v3329_v8 = vld [vmem:[%s3308_s10] sm:$0xff]  ;;  %v2761_v9 = vld [vmem:[#allocation6 + $0x30] ss:$8 sps:$4 sm:$0xff]   ;;  %v3334_v12 = vld [vmem:[%s3308_s10 + $0x8] sm:$0xff]  ;;  %s2593_s25 = sshll.u32 %s3148_s19, 8  ;;  %s5530_s18 = scalar_lea.vmem [#allocation7], %s2573_s12  }
  0x95   : > { %587 = vmatprep.subr.bf16.mxu0 %v2753_v3  ;;  %2619 = vmatprep.subr.bf16.mxu1 %v2753_v3  ;;  %v778_v10 = vmul.f32 %v3329_v8, %v3329_v8  ;;  %v2762_v11 = vld [vmem:[#allocation6 + $0x44] ss:$8 sps:$4 sm:$0xff]   ;;  %v779_v15 = vmul.f32 %v3334_v12, %v3334_v12  ;;  %v2764_v16 = vld [vmem:[#allocation6 + $0x40] ss:$8 sps:$4 sm:$0xff]   ;;  %v2765_v17 = vld [vmem:[#allocation6 + $0x54] ss:$8 sps:$4 sm:$0xff]   ;;  %v473_v41 = vpack.c.bf16 %v3334_v12, %v3329_v8 }
  0x96   : > { %v3344_v18 = vld [vmem:[%s3308_s10 + $0x18] sm:$0xff]  ;;  %v3347_v19 = vld [vmem:[%s3308_s10 + $0x20] sm:$0xff]  ;;  %814 = vadd.xlane.f32.xlu1 %v780_v14  ;;  %v3354_v24 = vld [vmem:[%s3308_s10 + $0x28] sm:$0xff]  ;;  %p6713_p2 = scmp.ne.s32.totalorder %s6021_s26, 0 }
  0x97   : > { %810 = vadd.xlane.f32.xlu0 %v778_v10  ;;  %v781_v20 = vmul.f32 %v3344_v18, %v3344_v18  ;;  %v782_v21 = vmul.f32 %v3347_v19, %v3347_v19  ;;  %v2767_v22 = vld [vmem:[#allocation6 + $0x50] ss:$8 sps:$4 sm:$0xff]   ;;  %v2768_v23 = vld [vmem:[#allocation6 + $0x64] ss:$8 sps:$4 sm:$0xff]   ;;  %v783_v26 = vmul.f32 %v3354_v24, %v3354_v24  ;;  %v2770_v28 = vld [vmem:[#allocation6 + $0x60] ss:$8 sps:$4 sm:$0xff]   ;;  %v474_v53 = vpack.c.bf16 %v3344_v18, %v3337_v13  ;;  %s5604_s22 = scalar_lea.vmem (%p6713_p2), %s5743_s4, %s2593_s25  }
  0x98   : > { %588 = vmatpush1.bf16.msra.mxu0 %v2755_v4  ;;  %2627 = vmatpush1.bf16.msra.mxu1 %v2755_v4  ;;  %v3357_v25 = vld [vmem:[%s3308_s10 + $0x30] sm:$0xff]  ;;  %v3364_v30 = vld [vmem:[%s3308_s10 + $0x38] sm:$0xff]  ;;  %v3367_v31 = vld [vmem:[%s3308_s10 + $0x40] sm:$0xff]  ;;  %v475_v62 = vpack.c.bf16 %v3354_v24, %v3347_v19  ;;  %s2595_s14 = sshll.u32 (%p6713_p2), %s3148_s19, 5 }
  0x99   : > { %589 = vmatprep.subr.bf16.mxu0 %v2756_v5  ;;  %2620 = vmatprep.subr.bf16.mxu1 %v2756_v5  ;;  %v784_v27 = vmul.f32 %v3357_v25, %v3357_v25  ;;  %v2771_v29 = vld [vmem:[#allocation6 + $0x74] ss:$8 sps:$4 sm:$0xff]   ;;  %v785_v32 = vmul.f32 %v3364_v30, %v3364_v30  ;;  %v786_v33 = vmul.f32 %v3367_v31, %v3367_v31  ;;  %v2773_v34 = vld [vmem:[#allocation6 + $0x70] ss:$8 sps:$4 sm:$0xff]   ;;  %v313_v35 = vld [vmem:[%s3308_s10 + $0x80] sm:$0xff]  ;;  %s2178_s28 = ssub.s32 (%p6713_p2), 40, %s2595_s14 }
  0x9a   : > { %816 = vadd.xlane.f32.xlu1 %v781_v20  ;;  %v314_v36 = vld [vmem:[%s3308_s10 + $0x88] sm:$0xff]  ;;  %v3379_v38 = vld [vmem:[%s3308_s10 + $0x50] sm:$0xff]  ;;  %v3388_v43 = vld [vmem:[%s3308_s10 + $0x58] sm:$0xff]  ;;  %v794_v57 = vmul.f32 %v313_v35, %v313_v35  ;;  %p2179_p4 = scmp.lt.s32.totalorder (%p6713_p2), %s2178_s28, 32 }
  0x9b   : > { %812 = vadd.xlane.f32.xlu0 %v779_v15  ;;  %v3376_v37 = vld [vmem:[%s3308_s10 + $0x48] sm:$0xff]  ;;  %v788_v40 = vmul.f32 %v3379_v38, %v3379_v38  ;;  %v481_v42 = vpack.c.bf16 %v314_v36, %v313_v35  ;;  %v3391_v44 = vld [vmem:[%s3308_s10 + $0x60] sm:$0xff]  ;;  %v789_v45 = vmul.f32 %v3388_v43, %v3388_v43  ;;  %v315_v47 = vld [vmem:[%s3308_s10 + $0x90] sm:$0xff]  ;;  %v795_v60 = vmul.f32 %v314_v36, %v314_v36 }
  0x9c   : > { %590 = vmatpush1.bf16.msra.mxu0 %v2758_v6  ;;  %2628 = vmatpush1.bf16.msra.mxu1 %v2758_v6  ;;  %v787_v39 = vmul.f32 %v3376_v37, %v3376_v37  ;;  %v790_v46 = vmul.f32 %v3391_v44, %v3391_v44  ;;  %v316_v48 = vld [vmem:[%s3308_s10 + $0x98] sm:$0xff]  ;;  %v3402_v49 = vld [vmem:[%s3308_s10 + $0x68] sm:$0xff]  ;;  %v3405_v50 = vld [vmem:[%s3308_s10 + $0x70] sm:$0xff]  ;;  %v796_v61 = vmul.f32 %v315_v47, %v315_v47 }
  0x9d   : > { %591 = vmatprep.subr.bf16.mxu0 %v2759_v7  ;;  %2621 = vmatprep.subr.bf16.mxu1 %v2759_v7  ;;  %v791_v51 = vmul.f32 %v3402_v49, %v3402_v49  ;;  %v792_v52 = vmul.f32 %v3405_v50, %v3405_v50  ;;  %v482_v54 = vpack.c.bf16 %v316_v48, %v315_v47  ;;  %v3414_v55 = vld [vmem:[%s3308_s10 + $0x78] sm:$0xff]  ;;  %v317_v58 = vld [vmem:[%s3308_s10 + $0xa0] sm:$0xff]  ;;  %v318_v59 = vld [vmem:[%s3308_s10 + $0xa8] sm:$0xff] }
  0x9e   : > { %820 = vadd.xlane.f32.xlu1 %v783_v26  ;;  %v793_v56 = vmul.f32 %v3414_v55, %v3414_v55  ;;  %v483_v63 = vpack.c.bf16 %v318_v59, %v317_v58  ;;  %v797_v1 = vmul.f32 %v316_v48, %v316_v48  ;;  %v798_v2 = vmul.f32 %v317_v58, %v317_v58  ;;  %v319_v3 = vld [vmem:[%s3308_s10 + $0xb0] sm:$0xff]  ;;  %v320_v4 = vld [vmem:[%s3308_s10 + $0xb8] sm:$0xff]  ;;  %v322_v12 = vld [vmem:[%s3308_s10 + $0xc8] sm:$0xff] }
  0x9f   : > { %818 = vadd.xlane.f32.xlu0 %v782_v21  ;;  %v799_v5 = vmul.f32 %v318_v59, %v318_v59  ;;  %v800_v6 = vmul.f32 %v319_v3, %v319_v3  ;;  %v476_v7 = vpack.c.bf16 %v3364_v30, %v3357_v25  ;;  %v484_v8 = vpack.c.bf16 %v320_v4, %v319_v3  ;;  %v323_v13 = vld [vmem:[%s3308_s10 + $0xd0] sm:$0xff]  ;;  %v324_v20 = vld [vmem:[%s3308_s10 + $0xd8] sm:$0xff]  ;;  %v3441_v21 = vld [vmem:[%s3308_s10 + $0xe0] sm:$0xff] }
  0xa0   : > { %592 = vmatpush1.bf16.msra.mxu0 %v2761_v9  ;;  %2629 = vmatpush1.bf16.msra.mxu1 %v2761_v9  ;;  %v321_v9 = vld [vmem:[%s3308_s10 + $0xc0] sm:$0xff]  ;;  %v801_v10 = vmul.f32 %v320_v4, %v320_v4  ;;  %v803_v14 = vmul.f32 %v322_v12, %v322_v12  ;;  %v804_v15 = vmul.f32 %v323_v13, %v323_v13  ;;  %v326_v26 = vld [vmem:[%s3308_s10 + $0xe8] sm:$0xff] }
  0xa1   : > { %593 = vmatprep.subr.bf16.mxu0 %v2762_v11  ;;  %2622 = vmatprep.subr.bf16.mxu1 %v2762_v11  ;;  %v802_v11 = vmul.f32 %v321_v9, %v321_v9  ;;  %v477_v18 = vpack.c.bf16 %v3376_v37, %v3367_v31  ;;  %v485_v19 = vpack.c.bf16 %v322_v12, %v321_v9  ;;  %v333_v4 = vld [vmem:[%s3316_s13 + $0x20] sm:$0xff] }
  0xa2   : > { %824 = vadd.xlane.f32.xlu1 %v785_v32  ;;  %v805_v24 = vmul.f32 %v324_v20, %v324_v20  ;;  %v806_v25 = vmul.f32 %v3441_v21, %v3441_v21  ;;  %v807_v32 = vmul.f32 %v326_v26, %v326_v26  ;;  %v478_v36 = vpack.c.bf16 %v3388_v43, %v3379_v38 }
  0xa3   : > { %822 = vadd.xlane.f32.xlu0 %v784_v27  ;;  %v3449_v27 = vld [vmem:[%s3308_s10 + $0xf0] sm:$0xff]  ;;  %v486_v37 = vpack.c.bf16 %v324_v20, %v323_v13  ;;  %v487_v3 = vpack.c.bf16 %v326_v26, %v3441_v21  ;;  %v361_v12 = vunpack.c.0.s8 %v333_v4  ;;  %v336_v26 = vld [vmem:[%s3316_s13 + $0x38] sm:$0xff] }
  0xa4   : > { %594 = vmatpush1.bf16.msra.mxu0 %v2764_v16  ;;  %2630 = vmatpush1.bf16.msra.mxu1 %v2764_v16  ;;  %v329_v16 = vld [vmem:[%s3316_s13] sm:$0xff] }
  0xa5   : > { %595 = vmatprep.subr.bf16.mxu0 %v2765_v17  ;;  %2623 = vmatprep.subr.bf16.mxu1 %v2765_v17  ;;  %v330_v17 = vld [vmem:[%s3316_s13 + $0x8] sm:$0xff]  ;;  %v347_v30 = vunpack.c.1.s8 %v329_v16 }
  0xa6   : > { %828 = vadd.xlane.f32.xlu1 %v787_v39  ;;  %v348_v31 = vunpack.c.1.s8 %v330_v17  ;;  %v350_v35 = vunpack.c.2.s8 %v330_v17  ;;  %v331_v39 = vld [vmem:[%s3316_s13 + $0x10] sm:$0xff] }
  0xa7   : > { %826 = vadd.xlane.f32.xlu0 %v786_v33  ;;  %v808_v33 = vmul.f32 %v3449_v27, %v3449_v27  ;;  %v3468_v48 = vcvt.s32.f32 %v347_v30 }
  0xa8   : > { %596 = vmatpush1.bf16.msra.mxu0 %v2767_v22  ;;  %2631 = vmatpush1.bf16.msra.mxu1 %v2767_v22  ;;  %v345_v22 = vunpack.c.0.s8 %v329_v16  ;;  %v3474_v43 = vcvt.s32.f32 %v350_v35 }
  0xa9   : > { %597 = vmatprep.subr.bf16.mxu0 %v2768_v23  ;;  %2624 = vmatprep.subr.bf16.mxu1 %v2768_v23  ;;  %v346_v23 = vunpack.c.0.s8 %v330_v17  ;;  %6032 = vst [vmem:[#allocation13_spill] sm:$0xff] %v3468_v48 }
  0xaa   : > { %832 = vadd.xlane.f32.xlu1 %v789_v45  ;;  %v352_v45 = vunpack.c.3.s8 %v330_v17 }
  0xab   : > { %830 = vadd.xlane.f32.xlu0 %v788_v40  ;;  %v332_v40 = vld [vmem:[%s3316_s13 + $0x18] sm:$0xff] }
  0xac   : > { %598 = vmatpush1.bf16.msra.mxu0 %v2770_v28  ;;  %2632 = vmatpush1.bf16.msra.mxu1 %v2770_v28  ;;  %v3451_v28 = vcvt.s32.f32 %v345_v22  ;;  %v356_v59 = vunpack.c.1.s8 %v332_v40  ;;  %v3517_v22 = vcvt.s32.f32 %v361_v12 }
  0xad   : > { %599 = vmatprep.subr.bf16.mxu0 %v2771_v29  ;;  %2625 = vmatprep.subr.bf16.mxu1 %v2771_v29  ;;  %v3453_v29 = vcvt.s32.f32 %v346_v23  ;;  %v480_v23 = vpack.c.bf16 %v3414_v55, %v3405_v50 }
  0xae   : > { %836 = vadd.xlane.f32.xlu1 %v791_v51  ;;  %6030 = vst [vmem:[#allocation11_spill] sm:$0xff] %v3451_v28  ;;  %v3470_v51 = vcvt.s32.f32 %v348_v31  ;;  %6042 = vst [vmem:[#allocation23_spill] sm:$0xff] %v3517_v22 }
  0xaf   : > { %834 = vadd.xlane.f32.xlu0 %v790_v46  ;;  %6031 = vst [vmem:[#allocation12_spill] sm:$0xff] %v3453_v29  ;;  %v1046_v47 = vadd.f32 %v3453_v29, %v3451_v28 }
  0xb0   : > { %600 = vmatpush1.bf16.msra.mxu0 %v2773_v34  ;;  %2633 = vmatpush1.bf16.msra.mxu1 %v2773_v34  ;;  %v349_v34 = vunpack.c.2.s8 %v329_v16  ;;  %6033 = vst [vmem:[#allocation14_spill] sm:$0xff] %v3470_v51  ;;  %v1049_v58 = vadd.f32 %v3470_v51, %v3468_v48 }
  0xb2   : > { %840 = vadd.xlane.f32.xlu1 %v793_v56  ;;  %v3472_v38 = vcvt.s32.f32 %v349_v34  ;;  %v3480_v56 = vcvt.s32.f32 %v352_v45  ;;  %v372_v45 = vunpack.c.1.s8 %v336_v26 }
  0xb3   : > { %618 = vmatmul.mubr.bf16.vlgmr.msra.gmra.mrb[0].mxu0 %v473_v41  ;;  %698 = vmatmul.mubr.bf16.vlgmr.msra.gmra.mrb[0].mxu1 %v481_v42  ;;  %v3462_v41 = vld [vmem:[%s3308_s10 + $0xf8] sm:$0xff]  ;;  %v351_v42 = vunpack.c.3.s8 %v329_v16 }
  0xb4   : > { %627 = vmatprep.mubr.bf16.mxu0 %v3103_v0  ;;  %707 = vmatprep.mubr.bf16.mxu1 %v3103_v0  ;;  %v809_v46 = vmul.f32 %v3462_v41, %v3462_v41 }
  0xb5   : > { %838 = vadd.xlane.f32.xlu0 %v792_v52  ;;  %v353_v52 = vunpack.c.0.s8 %v331_v39 }
  0xb6   : > { %844 = vadd.xlane.f32.xlu1 %v795_v60  ;;  %v357_v60 = vunpack.c.2.s8 %v331_v39 }
  0xb8   : > { %v3501_v9 = vcvt.s32.f32 %v357_v60  ;;  %v376_v60 = vunpack.c.3.s8 %v336_v26 }
  0xb9   : > { %842 = vadd.xlane.f32.xlu0 %v794_v57  ;;  %v355_v57 = vunpack.c.1.s8 %v331_v39 }
  0xba   : > { %848 = vadd.xlane.f32.xlu1 %v797_v1  ;;  %v358_v1 = vunpack.c.2.s8 %v332_v40  ;;  %6038 = vst [vmem:[#allocation19_spill] sm:$0xff] %v3501_v9 }
  0xbb   : > { %628 = vmatmul.mubr.bf16.gmra.mrb[4].mxu0 %v474_v53  ;;  %708 = vmatmul.mubr.bf16.gmra.mrb[4].mxu1 %v482_v54  ;;  %v354_v53 = vunpack.c.0.s8 %v332_v40  ;;  %v3478_v54 = vcvt.s32.f32 %v351_v42 }
  0xbc   : > { %637 = vmatprep.mubr.bf16.mxu0 %v3103_v0  ;;  %717 = vmatprep.mubr.bf16.mxu1 %v3103_v0 }
  0xbd   : > { %846 = vadd.xlane.f32.xlu0 %v796_v61  ;;  %v1052_v61 = vadd.f32 %v3474_v43, %v3472_v38 }
  0xbe   : > { %852 = vadd.xlane.f32.xlu1 %v799_v5  ;;  %v334_v5 = vld [vmem:[%s3316_s13 + $0x28] sm:$0xff] }
  0xbf   : > { %v362_v13 = vunpack.c.0.s8 %v334_v5  ;;  %v368_v35 = vunpack.c.3.s8 %v334_v5 }
  0xc1   : > { %850 = vadd.xlane.f32.xlu0 %v798_v2  ;;  %v479_v2 = vpack.c.bf16 %v3402_v49, %v3391_v44  ;;  %v3505_v49 = vcvt.s32.f32 %v358_v1 }
  0xc2   : > { %856 = vadd.xlane.f32.xlu1 %v801_v10  ;;  %v359_v10 = vunpack.c.3.s8 %v331_v39 }
  0xc3   : > { %638 = vmatmul.mubr.bf16.gmra.mrb[8].mxu0 %v475_v62  ;;  %718 = vmatmul.mubr.bf16.gmra.mrb[8].mxu1 %v483_v63  ;;  %v3486_v62 = vcvt.s32.f32 %v353_v52  ;;  %v3488_v63 = vcvt.s32.f32 %v354_v53  ;;  %6039 = vst [vmem:[#allocation20_spill] sm:$0xff] %v3505_v49  ;;  %v1064_v20 = vadd.f32 %v3505_v49, %v3501_v9  ;;  %v374_v53 = vunpack.c.2.s8 %v336_v26 }
  0xc4   : > { %647 = vmatprep.mubr.bf16.mxu0 %v3103_v0  ;;  %727 = vmatprep.mubr.bf16.mxu1 %v3103_v0  ;;  %v3511_v17 = vcvt.s32.f32 %v359_v10 }
  0xc5   : > { %854 = vadd.xlane.f32.xlu0 %v800_v6  ;;  %6034 = vst [vmem:[#allocation15_spill] sm:$0xff] %v3486_v62  ;;  %6035 = vst [vmem:[#allocation16_spill] sm:$0xff] %v3488_v63  ;;  %v1055_v6 = vadd.f32 %v3480_v56, %v3478_v54  ;;  %v1058_v44 = vadd.f32 %v3488_v63, %v3486_v62  ;;  %v3563_v10 = vcvt.s32.f32 %v374_v53 }
  0xc6   : > { %860 = vadd.xlane.f32.xlu1 %v803_v14  ;;  %v363_v14 = vunpack.c.1.s8 %v333_v4  ;;  %6040 = vst [vmem:[#allocation21_spill] sm:$0xff] %v3511_v17 }
  0xc7   : > { %6055 = vst [vmem:[#allocation36_spill] sm:$0xff] %v3563_v10 }
  0xc8   : > { %v3527_v30 = vcvt.s32.f32 %v363_v14 }
  0xc9   : > { %858 = vadd.xlane.f32.xlu0 %v802_v11  ;;  %v360_v11 = vunpack.c.3.s8 %v332_v40 }
  0xca   : > { %864 = vadd.xlane.f32.xlu1 %v805_v24  ;;  %v488_v24 = vpack.c.bf16 %v3462_v41, %v3449_v27  ;;  %6044 = vst [vmem:[#allocation25_spill] sm:$0xff] %v3527_v30  ;;  %v3545_v41 = vcvt.s32.f32 %v368_v35 }
  0xcb   : > { %648 = vmatmul.mubr.bf16.gmra.mrb[12].mxu0 %v476_v7  ;;  %728 = vmatmul.mubr.bf16.gmra.mrb[12].mxu1 %v484_v8  ;;  %v3497_v7 = vcvt.s32.f32 %v355_v57  ;;  %v3499_v8 = vcvt.s32.f32 %v356_v59  ;;  %v3515_v21 = vcvt.s32.f32 %v360_v11  ;;  %v337_v57 = vld [vmem:[%s3316_s13 + $0x40] sm:$0xff] }
  0xcc   : > { %657 = vmatprep.mubr.bf16.mxu0 %v3103_v0  ;;  %737 = vmatprep.mubr.bf16.mxu1 %v3103_v0  ;;  %6049 = vst [vmem:[#allocation30_spill] sm:$0xff] %v3545_v41  ;;  %v379_v12 = vunpack.c.1.s8 %v337_v57 }
  0xcd   : > { %862 = vadd.xlane.f32.xlu0 %v804_v15  ;;  %6036 = vst [vmem:[#allocation17_spill] sm:$0xff] %v3497_v7  ;;  %6037 = vst [vmem:[#allocation18_spill] sm:$0xff] %v3499_v8  ;;  %v364_v15 = vunpack.c.1.s8 %v334_v5  ;;  %v1061_v16 = vadd.f32 %v3499_v8, %v3497_v7  ;;  %v1067_v50 = vadd.f32 %v3515_v21, %v3511_v17  ;;  %v972_v17 = vlaneseq }
  0xce   : > { %868 = vadd.xlane.f32.xlu1 %v807_v32  ;;  %6041 = vst [vmem:[#allocation22_spill] sm:$0xff] %v3515_v21  ;;  %v367_v32 = vunpack.c.3.s8 %v333_v4 }
  0xcf   : > { %v3529_v31 = vcvt.s32.f32 %v364_v15 }
  0xd0   : > { %v3541_v39 = vcvt.s32.f32 %v367_v32 }
  0xd1   : > { %866 = vadd.xlane.f32.xlu0 %v806_v25  ;;  %v335_v25 = vld [vmem:[%s3316_s13 + $0x30] sm:$0xff]  ;;  %6045 = vst [vmem:[#allocation26_spill] sm:$0xff] %v3529_v31 }
  0xd2   : > { %872 = vadd.xlane.f32.xlu1 %v809_v46  ;;  %v369_v27 = vunpack.c.0.s8 %v335_v25  ;;  %6048 = vst [vmem:[#allocation29_spill] sm:$0xff] %v3541_v39  ;;  %v371_v42 = vunpack.c.1.s8 %v335_v25  ;;  %v373_v52 = vunpack.c.2.s8 %v335_v25  ;;  %v375_v59 = vunpack.c.3.s8 %v335_v25 }
  0xd3   : > { %658 = vmatmul.mubr.bf16.gmra.mrb[16].mxu0 %v477_v18  ;;  %738 = vmatmul.mubr.bf16.gmra.mrb[16].mxu1 %v485_v19  ;;  %v365_v18 = vunpack.c.2.s8 %v333_v4  ;;  %v366_v19 = vunpack.c.2.s8 %v334_v5  ;;  %v3559_v5 = vcvt.s32.f32 %v372_v45 }
  0xd4   : > { %667 = vmatprep.mubr.bf16.mxu0 %v3103_v0  ;;  %747 = vmatprep.mubr.bf16.mxu1 %v3103_v0  ;;  %v3547_v46 = vcvt.s32.f32 %v369_v27  ;;  %v3555_v1 = vcvt.s32.f32 %v371_v42  ;;  %v3565_v11 = vcvt.s32.f32 %v375_v59 }
  0xd5   : > { %870 = vadd.xlane.f32.xlu0 %v808_v33  ;;  %v3531_v33 = vcvt.s32.f32 %v365_v18  ;;  %v3533_v34 = vcvt.s32.f32 %v366_v19  ;;  %6053 = vst [vmem:[#allocation34_spill] sm:$0xff] %v3559_v5  ;;  %v381_v19 = vunpack.c.2.s8 %v337_v57 }
  0xd6   : > { %1050 = vadd.xlane.f32.xlu1 %v1049_v58  ;;  %6050 = vst [vmem:[#allocation31_spill] sm:$0xff] %v3547_v46  ;;  %v338_v58 = vld [vmem:[%s3316_s13 + $0x48] sm:$0xff]  ;;  %6052 = vst [vmem:[#allocation33_spill] sm:$0xff] %v3555_v1 }
  0xd7   : > { %6046 = vst [vmem:[#allocation27_spill] sm:$0xff] %v3531_v33  ;;  %6047 = vst [vmem:[#allocation28_spill] sm:$0xff] %v3533_v34  ;;  %v1076_v40 = vadd.f32 %v3533_v34, %v3531_v33  ;;  %v380_v15 = vunpack.c.1.s8 %v338_v58  ;;  %v3587_v27 = vcvt.s32.f32 %v381_v19 }
  0xd8   : > { %6056 = vst [vmem:[#allocation37_spill] sm:$0xff] %v3565_v11 }
  0xd9   : > { %1047 = vadd.xlane.f32.xlu0 %v1046_v47  ;;  %v3585_v35 = vcvt.s32.f32 %v380_v15 }
  0xda   : > { %1056 = vadd.xlane.f32.xlu1 %v1055_v6  ;;  %v3561_v6 = vcvt.s32.f32 %v373_v52 }
  0xdb   : > { %668 = vmatmul.mubr.bf16.gmra.mrb[20].mxu0 %v478_v36  ;;  %748 = vmatmul.mubr.bf16.gmra.mrb[20].mxu1 %v486_v37  ;;  %v370_v36 = vunpack.c.0.s8 %v336_v26  ;;  %v1073_v37 = vadd.f32 %v3529_v31, %v3527_v30  ;;  %v3581_v26 = vcvt.s32.f32 %v379_v12  ;;  %6061 = vst [vmem:[#allocation42_spill] sm:$0xff] %v3585_v35 }
  0xdc   : > { %677 = vmatprep.mubr.bf16.mxu0 %v3103_v0  ;;  %757 = vmatprep.mubr.bf16.mxu1 %v3103_v0  ;;  %6054 = vst [vmem:[#allocation35_spill] sm:$0xff] %v3561_v6  ;;  %v1088_v18 = vadd.f32 %v3563_v10, %v3561_v6 }
  0xdd   : > { %1053 = vadd.xlane.f32.xlu0 %v1052_v61  ;;  %v3549_v47 = vcvt.s32.f32 %v370_v36  ;;  %v1079_v61 = vadd.f32 %v3545_v41, %v3541_v39  ;;  %6060 = vst [vmem:[#allocation41_spill] sm:$0xff] %v3581_v26  ;;  %v1097_v52 = vadd.f32 %v3585_v35, %v3581_v26 }
  0xde   : > { %1062 = vadd.xlane.f32.xlu1 %v1061_v16  ;;  %v1085_v16 = vadd.f32 %v3559_v5, %v3555_v1 }
  0xdf   : > { %6051 = vst [vmem:[#allocation32_spill] sm:$0xff] %v3549_v47  ;;  %v1082_v4 = vadd.f32 %v3549_v47, %v3547_v46 }
  0xe1   : > { %1059 = vadd.xlane.f32.xlu0 %v1058_v44  ;;  %v3567_v44 = vcvt.s32.f32 %v376_v60 }
  0xe2   : > { %1068 = vadd.xlane.f32.xlu1 %v1067_v50  ;;  %v383_v50 = vunpack.c.3.s8 %v337_v57 }
  0xe3   : > { %678 = vmatmul.mubr.bf16.gmra.mrb[24].mxu0 %v479_v2  ;;  %758 = vmatmul.mubr.bf16.gmra.mrb[24].mxu1 %v487_v3  ;;  %v377_v2 = vunpack.c.0.s8 %v337_v57  ;;  %v378_v3 = vunpack.c.0.s8 %v338_v58  ;;  %6057 = vst [vmem:[#allocation38_spill] sm:$0xff] %v3567_v44  ;;  %v1091_v25 = vadd.f32 %v3567_v44, %v3565_v11  ;;  %v343_v44 = vld [vmem:[%s3316_s13 + $0x70] sm:$0xff]  ;;  %v344_v11 = vld [vmem:[%s3316_s13 + $0x78] sm:$0xff] }
  0xe4   : > { %687 = vmatprep.mubr.bf16.mxu0 %v3103_v0  ;;  %767 = vmatprep.mubr.bf16.mxu1 %v3103_v0  ;;  %v3519_v0 = vcvt.s32.f32 %v362_v13  ;;  %v3593_v53 = vcvt.s32.f32 %v383_v50  ;;  %v402_v1 = vunpack.c.0.s8 %v344_v11  ;;  %v403_v46 = vunpack.c.1.s8 %v343_v44 }
  0xe5   : > { %1065 = vadd.xlane.f32.xlu0 %v1064_v20  ;;  %v3569_v13 = vcvt.s32.f32 %v377_v2  ;;  %v3571_v14 = vcvt.s32.f32 %v378_v3  ;;  %v382_v20 = vunpack.c.2.s8 %v338_v58  ;;  %v341_v3 = vld [vmem:[%s3316_s13 + $0x60] sm:$0xff]  ;;  %v407_v41 = vunpack.c.3.s8 %v343_v44 }
  0xe6   : > { %6043 = vst [vmem:[#allocation24_spill] sm:$0xff] %v3519_v0  ;;  %v1070_v55 = vadd.f32 %v3519_v0, %v3517_v22  ;;  %1074 = vadd.xlane.f32.xlu1 %v1073_v37  ;;  %v393_v50 = vunpack.c.0.s8 %v341_v3  ;;  %v399_v10 = vunpack.c.3.s8 %v341_v3  ;;  %v408_v39 = vunpack.c.3.s8 %v344_v11 }
  0xe7   : > { %6058 = vst [vmem:[#allocation39_spill] sm:$0xff] %v3569_v13  ;;  %6059 = vst [vmem:[#allocation40_spill] sm:$0xff] %v3571_v14  ;;  %v1094_v32 = vadd.f32 %v3571_v14, %v3569_v13  ;;  %v3589_v36 = vcvt.s32.f32 %v382_v20 }
  0xe9   : > { %1071 = vadd.xlane.f32.xlu0 %v1070_v55  ;;  %v384_v55 = vunpack.c.3.s8 %v338_v58  ;;  %v1100_v58 = vadd.f32 %v3589_v36, %v3587_v27 }
  0xea   : > { %1080 = vadd.xlane.f32.xlu1 %v1079_v61 }
  0xeb   : > { %688 = vmatmul.mubr.bf16.gmra.mrb[28].mxu0 %v480_v23  ;;  %768 = vmatmul.mubr.bf16.gmra.mrb[28].mxu1 %v488_v24  ;;  %v339_v23 = vld [vmem:[%s3316_s13 + $0x50] sm:$0xff]  ;;  %v340_v24 = vld [vmem:[%s3316_s13 + $0x58] sm:$0xff]  ;;  %v3597_v60 = vcvt.s32.f32 %v384_v55 }
  0xec   : > { %v385_v37 = vunpack.c.0.s8 %v339_v23  ;;  %v387_v42 = vunpack.c.1.s8 %v339_v23  ;;  %v388_v45 = vunpack.c.1.s8 %v340_v24  ;;  %v389_v59 = vunpack.c.2.s8 %v339_v23 }
  0xed   : > { %1077 = vadd.xlane.f32.xlu0 %v1076_v40  ;;  %v386_v40 = vunpack.c.0.s8 %v340_v24  ;;  %v390_v57 = vunpack.c.2.s8 %v340_v24  ;;  %6062 = vst [vmem:[#allocation43_spill] sm:$0xff] %v3597_v60  ;;  %v392_v20 = vunpack.c.3.s8 %v340_v24 }
  0xee   : > { %1086 = vadd.xlane.f32.xlu1 %v1085_v16  ;;  %v3599_v61 = vcvt.s32.f32 %v385_v37  ;;  %v3605_v12 = vcvt.s32.f32 %v387_v42  ;;  %v3607_v15 = vcvt.s32.f32 %v388_v45  ;;  %v391_v16 = vunpack.c.3.s8 %v339_v23 }
  0xef   : > { %v3601_v2 = vcvt.s32.f32 %v386_v40  ;;  %v3611_v19 = vcvt.s32.f32 %v390_v57  ;;  %v3623_v40 = vcvt.s32.f32 %v392_v20  ;;  %v395_v42 = vunpack.c.1.s8 %v341_v3 }
  0xf0   : > { %6063 = vst [vmem:[#allocation44_spill] sm:$0xff] %v3599_v61  ;;  %6065 = vst [vmem:[#allocation46_spill] sm:$0xff] %v3605_v12  ;;  %v1109_v23 = vadd.f32 %v3607_v15, %v3605_v12  ;;  %v3619_v37 = vcvt.s32.f32 %v391_v16  ;;  %v397_v57 = vunpack.c.2.s8 %v341_v3  ;;  %v401_v20 = vunpack.c.0.s8 %v343_v44 }
  0xf1   : > { %1083 = vadd.xlane.f32.xlu0 %v1082_v4  ;;  %6064 = vst [vmem:[#allocation45_spill] sm:$0xff] %v3601_v2  ;;  %v342_v4 = vld [vmem:[%s3316_s13 + $0x68] sm:$0xff]  ;;  %6066 = vst [vmem:[#allocation47_spill] sm:$0xff] %v3607_v15  ;;  %v3633_v5 = vcvt.s32.f32 %v395_v42  ;;  %v3643_v3 = vcvt.s32.f32 %v399_v10  ;;  %v3649_v42 = vcvt.s32.f32 %v402_v1  ;;  %v3659_v1 = vcvt.s32.f32 %v403_v46 }
  0xf2   : > { %1092 = vadd.xlane.f32.xlu1 %v1091_v25  ;;  %6068 = vst [vmem:[#allocation49_spill] sm:$0xff] %v3611_v19  ;;  %v1103_v25 = vadd.f32 %v3597_v60, %v3593_v53  ;;  %v394_v55 = vunpack.c.0.s8 %v342_v4  ;;  %6069 = vst [vmem:[#allocation50_spill] sm:$0xff] %v3619_v37  ;;  %v396_v45 = vunpack.c.1.s8 %v342_v4  ;;  %v400_v16 = vunpack.c.3.s8 %v342_v4 }
  0xf3   : > { %6070 = vst [vmem:[#allocation51_spill] sm:$0xff] %v3623_v40  ;;  %v1115_v6 = vadd.f32 %v3623_v40, %v3619_v37  ;;  %6073 = vst [vmem:[#allocation54_spill] sm:$0xff] %v3633_v5  ;;  %v3647_v47 = vcvt.s32.f32 %v401_v20  ;;  %v3671_v46 = vcvt.s32.f32 %v407_v41 }
  0xf4   : > { %6077 = vst [vmem:[#allocation58_spill] sm:$0xff] %v3643_v3  ;;  %6080 = vst [vmem:[#allocation61_spill] sm:$0xff] %v3649_v42 }
  0xf5   : > { %1089 = vadd.xlane.f32.xlu0 %v1088_v18  ;;  %v3609_v18 = vcvt.s32.f32 %v389_v59  ;;  %v3627_v59 = vcvt.s32.f32 %v394_v55  ;;  %6079 = vst [vmem:[#allocation60_spill] sm:$0xff] %v3647_v47  ;;  %6081 = vst [vmem:[#allocation62_spill] sm:$0xff] %v3659_v1 }
  0xf6   : > { %1098 = vadd.xlane.f32.xlu1 %v1097_v52  ;;  %v3625_v52 = vcvt.s32.f32 %v393_v50  ;;  %v3639_v50 = vcvt.s32.f32 %v397_v57  ;;  %v405_v57 = vunpack.c.2.s8 %v343_v44  ;;  %6085 = vst [vmem:[#allocation66_spill] sm:$0xff] %v3671_v46 }
  0xf7   : > { %6067 = vst [vmem:[#allocation48_spill] sm:$0xff] %v3609_v18  ;;  %v1112_v24 = vadd.f32 %v3611_v19, %v3609_v18  ;;  %6072 = vst [vmem:[#allocation53_spill] sm:$0xff] %v3627_v59 }
  0xf8   : > { %6071 = vst [vmem:[#allocation52_spill] sm:$0xff] %v3625_v52  ;;  %6075 = vst [vmem:[#allocation56_spill] sm:$0xff] %v3639_v50 }
  0xf9   : > { %1095 = vadd.xlane.f32.xlu0 %v1094_v32  ;;  %v1106_v32 = vadd.f32 %v3601_v2, %v3599_v61 }
  0xfa   : > { %1104 = vadd.xlane.f32.xlu1 %v1103_v25  ;;  %v1118_v25 = vadd.f32 %v3627_v59, %v3625_v52 }
  0xfd   : > { %1101 = vadd.xlane.f32.xlu0 %v1100_v58  ;;  %v398_v58 = vunpack.c.2.s8 %v342_v4  ;;  %v3645_v4 = vcvt.s32.f32 %v400_v16  ;;  %v1130_v16 = vadd.f32 %v3649_v42, %v3647_v47 }
  0xfe   : > { %1110 = vadd.xlane.f32.xlu1 %v1109_v23  ;;  %v404_v23 = vunpack.c.1.s8 %v344_v11 }
  0xff   : > { %v3641_v55 = vcvt.s32.f32 %v398_v58  ;;  %6078 = vst [vmem:[#allocation59_spill] sm:$0xff] %v3645_v4  ;;  %v406_v58 = vunpack.c.2.s8 %v344_v11  ;;  %v1127_v10 = vadd.f32 %v3645_v4, %v3643_v3 }
 0x100   : > { %v3661_v20 = vcvt.s32.f32 %v404_v23  ;;  %v3673_v23 = vcvt.s32.f32 %v408_v39 }
 0x101   : > { %1107 = vadd.xlane.f32.xlu0 %v1106_v32  ;;  %v3637_v32 = vcvt.s32.f32 %v396_v45  ;;  %6076 = vst [vmem:[#allocation57_spill] sm:$0xff] %v3641_v55  ;;  %v1124_v45 = vadd.f32 %v3641_v55, %v3639_v50 }
 0x102   : > { %1116 = vadd.xlane.f32.xlu1 %v1115_v6  ;;  %6082 = vst [vmem:[#allocation63_spill] sm:$0xff] %v3661_v20  ;;  %v3663_v6 = vcvt.s32.f32 %v405_v57  ;;  %v1133_v4 = vadd.f32 %v3661_v20, %v3659_v1  ;;  %6086 = vst [vmem:[#allocation67_spill] sm:$0xff] %v3673_v23 }
 0x103   : > { %6074 = vst [vmem:[#allocation55_spill] sm:$0xff] %v3637_v32 }
 0x104   : > { %6083 = vst [vmem:[#allocation64_spill] sm:$0xff] %v3663_v6 }
 0x105   : > { %1113 = vadd.xlane.f32.xlu0 %v1112_v24  ;;  %v1121_v24 = vadd.f32 %v3637_v32, %v3633_v5 }
 0x107   : > { %1122 = vadd.xlane.f32.xlu1 %v1121_v24  ;;  %v1139_v24 = vadd.f32 %v3673_v23, %v3671_v46 }
 0x109   : > { %1119 = vadd.xlane.f32.xlu0 %v1118_v25  ;;  %v3665_v25 = vcvt.s32.f32 %v406_v58 }
 0x10b   : > { %6084 = vst [vmem:[#allocation65_spill] sm:$0xff] %v3665_v25  ;;  %1128 = vadd.xlane.f32.xlu1 %v1127_v10  ;;  %v1136_v42 = vadd.f32 %v3665_v25, %v3663_v6 }
 0x10d   : > { %1125 = vadd.xlane.f32.xlu0 %v1124_v45 }
 0x10f   : > { %1134 = vadd.xlane.f32.xlu1 %v1133_v4 }
 0x111   : > { %1131 = vadd.xlane.f32.xlu0 %v1130_v16 }
 0x113   : > { %1140 = vadd.xlane.f32.xlu1 %v1139_v24 }
 0x115   : > { %1137 = vadd.xlane.f32.xlu0 %v1136_v42 }
 0x123   : > { %v815_v11 = vpop.xlane.xlu1 %814 }
 0x124   : > { %v811_v44 = vpop.xlane.xlu0 %810 }
 0x125   : > { %2774 = vrsqrt.f32 %v811_v44  ;;  %v3735_v44 = vstv %s2593_s25 }
 0x126   : > { %2776 = vrsqrt.f32 %v815_v11  ;;  %6104 = vst [vmem:[#allocation85_spill] sm:$0xff] %v3735_v44 }
 0x127   : > { %v817_v57 = vpop.xlane.xlu1 %816 }
 0x128   : > { %v813_v45 = vpop.xlane.xlu0 %812 }
 0x129   : > { %2778 = vrsqrt.f32 %v813_v45 }
 0x12a   : > { %2780 = vrsqrt.f32 %v817_v57 }
 0x12b   : > { %v821_v10 = vpop.xlane.xlu1 %820 }
 0x12c   : > { %v819_v58 = vpop.xlane.xlu0 %818 }
 0x12f   : > { %v825_v20 = vpop.xlane.xlu1 %824  ;;  %v2775_v45 = vpop.eup %2774 }
 0x130   : > { %v823_v16 = vpop.xlane.xlu0 %822 }
 0x133   : > { %v829_v25 = vpop.xlane.xlu1 %828 }
 0x134   : > { %v827_v1 = vpop.xlane.xlu0 %826 }
 0x137   : > { %v3677_v6 = vpop.xlane.xlu1 %832 }
 0x138   : > { %v831_v41 = vpop.xlane.xlu0 %830 }
 0x13b   : > { %v3681_v4 = vpop.xlane.xlu1 %836 }
 0x13c   : > { %v3679_v39 = vpop.xlane.xlu0 %834  ;;  %6087 = vst [vmem:[#allocation68_spill] sm:$0xff] %v3681_v4 }
 0x13f   : > { %v3685_v24 = vpop.xlane.xlu1 %840 }
 0x140   : > { %6089 = vst [vmem:[#allocation70_spill] sm:$0xff] %v3685_v24 }
 0x142   : > { %v3683_v42 = vpop.xlane.xlu0 %838 }
 0x143   : > { %6088 = vst [vmem:[#allocation69_spill] sm:$0xff] %v3683_v42  ;;  %v845_v46 = vpop.xlane.xlu1 %844 }
 0x146   : > { %v843_v23 = vpop.xlane.xlu0 %842 }
 0x147   : > { %v849_v3 = vpop.xlane.xlu1 %848  ;;  %2782 = vrsqrt.f32 %v843_v23 }
 0x148   : > { %2784 = vrsqrt.f32 %v819_v58 }
 0x149   : > { %2786 = vrsqrt.f32 %v845_v46 }
 0x14a   : > { %v847_v47 = vpop.xlane.xlu0 %846  ;;  %2788 = vrsqrt.f32 %v821_v10 }
 0x14b   : > { %v3689_v34 = vpop.xlane.xlu1 %852  ;;  %2790 = vrsqrt.f32 %v823_v16 }
 0x14c   : > { %2792 = vrsqrt.f32 %v825_v20  ;;  %v970_v20 = vld [vmem:[%s5741_s2] sm:$0x3] }
 0x14d   : > { %2794 = vrsqrt.f32 %v827_v1 }
 0x14e   : > { %v3687_v55 = vpop.xlane.xlu0 %850  ;;  %2796 = vrsqrt.f32 %v829_v25 }
 0x14f   : > { %v3693_v33 = vpop.xlane.xlu1 %856  ;;  %2798 = vrsqrt.f32 %v847_v47 }
 0x150   : > { %2800 = vrsqrt.f32 %v831_v41 }
 0x151   : > { %2802 = vrsqrt.f32 %v849_v3  ;;  %v6109_v3 = vmov 0 }
 0x152   : > { %v3691_v50 = vpop.xlane.xlu0 %854  ;;  %2804 = vrsqrt.f32 %v3687_v55 }
 0x153   : > { %v3697_v31 = vpop.xlane.xlu1 %860  ;;  %2806 = vrsqrt.f32 %v3689_v34 }
 0x156   : > { %v3695_v32 = vpop.xlane.xlu0 %858 }
 0x157   : > { %v3701_v30 = vpop.xlane.xlu1 %864 }
 0x15a   : > { %v3699_v5 = vpop.xlane.xlu0 %862 }
 0x15b   : > { %v3705_v42 = vpop.xlane.xlu1 %868 }
 0x15c   : > { %6091 = vst [vmem:[#allocation72_spill] sm:$0xff] %v3705_v42 }
 0x15e   : > { %v3703_v24 = vpop.xlane.xlu0 %866 }
 0x15f   : > { %6090 = vst [vmem:[#allocation71_spill] sm:$0xff] %v3703_v24  ;;  %v3709_v0 = vpop.xlane.xlu1 %872 }
 0x160   : > { %6093 = vst [vmem:[#allocation74_spill] sm:$0xff] %v3709_v0  ;;  %v3725_v0 = vshrl.u32 %v972_v17, 7 }
 0x162   : > { %v3707_v59 = vpop.xlane.xlu0 %870  ;;  %6101 = vst [vmem:[#allocation82_spill] sm:$0xff] %v3725_v0  ;;  %v1669_v57 = vadd.s32 104, %v3725_v0  ;;  %v1670_v58 = vadd.s32 112, %v3725_v0  ;;  %v974_v46 = vsub.s32 0, %v3725_v0  ;;  %v978_v16 = vsub.s32 1, %v3725_v0 }
 0x163   : > { %6092 = vst [vmem:[#allocation73_spill] sm:$0xff] %v3707_v59  ;;  %v3713_v22 = vpop.xlane.xlu1 %1050 }
 0x164   : > { %6095 = vst [vmem:[#allocation76_spill] sm:$0xff] %v3713_v22  ;;  %v3761_v47 = vadd.s32 %v3735_v44, %v1670_v58 }
 0x166   : > { %v3711_v52 = vpop.xlane.xlu0 %1047  ;;  %vm1735_vm4 = vcmp.lt.s32.totalorder %v3761_v47, 320 }
 0x167   : > { %6094 = vst [vmem:[#allocation75_spill] sm:$0xff] %v3711_v52  ;;  %v3717_v21 = vpop.xlane.xlu1 %1056 }
 0x168   : > { %6097 = vst [vmem:[#allocation78_spill] sm:$0xff] %v3717_v21 }
 0x16a   : > { %v3715_v40 = vpop.xlane.xlu0 %1053 }
 0x16b   : > { %6096 = vst [vmem:[#allocation77_spill] sm:$0xff] %v3715_v40  ;;  %v3721_v42 = vpop.xlane.xlu1 %1062 }
 0x16c   : > { %6099 = vst [vmem:[#allocation80_spill] sm:$0xff] %v3721_v42  ;;  %v3765_v42 = vrot.slane %v970_v20, %v974_v46 }
 0x16e   : > { %v3719_v37 = vpop.xlane.xlu0 %1059 }
 0x16f   : > { %6098 = vst [vmem:[#allocation79_spill] sm:$0xff] %v3719_v37  ;;  %v3728_v40 = vpop.xlane.xlu1 %1068  ;;  %v1668_v37 = vadd.s32 96, %v3725_v0 }
 0x170   : > { %6102 = vst [vmem:[#allocation83_spill] sm:$0xff] %v3728_v40  ;;  %v1702_v40 = vadd.s32 %v3735_v44, %v1669_v57 }
 0x171   : > { %v1701_v23 = vadd.s32 %v3735_v44, %v1668_v37 }
 0x172   : > { %v3723_v59 = vpop.xlane.xlu0 %1065  ;;  %vm1734_vm3 = vcmp.lt.s32.totalorder %v1702_v40, 320 }
 0x173   : > { %6100 = vst [vmem:[#allocation81_spill] sm:$0xff] %v3723_v59  ;;  %v3737_v11 = vpop.xlane.xlu1 %1074  ;;  %vm1733_vm0 = vcmp.lt.s32.totalorder %v1701_v23, 320 }
 0x174   : > { %6105 = vst [vmem:[#allocation86_spill] sm:$0xff] %v3737_v11 }
 0x176   : > { %v3730_v21 = vpop.xlane.xlu0 %1071 }
 0x177   : > { %6103 = vst [vmem:[#allocation84_spill] sm:$0xff] %v3730_v21  ;;  %v3744_v21 = vpop.eup %2776  ;;  %v3756_v25 = vpop.xlane.xlu1 %1080  ;;  %2808 = vrsqrt.f32 %v3691_v50 }
 0x178   : > { %v2779_v10 = vpop.eup %2778  ;;  %6108 = vst [vmem:[#allocation89_spill] sm:$0xff] %v3756_v25  ;;  %2810 = vrsqrt.f32 %v3693_v33  ;;  %v6124_v33 = vmov 0 }
 0x179   : > { %v3751_v37 = vpop.eup %2780  ;;  %2812 = vrsqrt.f32 %v3677_v6 }
 0x17a   : > { %v3739_v17 = vpop.xlane.xlu0 %1077  ;;  %v2783_v11 = vpop.eup %2782  ;;  %2814 = vrsqrt.f32 %v3695_v32 }
 0x17b   : > { %6106 = vst [vmem:[#allocation87_spill] sm:$0xff] %v3739_v17  ;;  %v1671_v17 = vadd.s32 120, %v3725_v0  ;;  %v3763_v59 = vpop.eup %2784  ;;  %v3768_v0 = vrot.slane %v970_v20, %v978_v16  ;;  %v3803_v49 = vpop.xlane.xlu1 %1086  ;;  %2816 = vrsqrt.f32 %v3697_v31 }
 0x17c   : > { %v2787_v41 = vpop.eup %2786  ;;  %vm1155_vm5 = vcmp.gt.f32.partialorder %v3803_v49, 0.0  ;;  %2818 = vrsqrt.f32 %v3679_v39 }
 0x17d   : > { %v3778_v57 = vpop.eup %2788  ;;  %v3782_v20 = vadd.s32 %v3735_v44, %v1671_v17  ;;  %vm3845_vm7 = vmand %vm1155_vm5, %vm1734_vm3  ;;  %2820 = vrsqrt.f32 %v3699_v5 }
 0x17e   : > { %v3753_v1 = vpop.xlane.xlu0 %1083  ;;  %v3784_v16 = vpop.eup %2790  ;;  %2822 = vrsqrt.f32 %v3701_v30 }
 0x17f   : > { %6107 = vst [vmem:[#allocation88_spill] sm:$0xff] %v3753_v1  ;;  %vm1154_vm1 = vcmp.gt.f32.partialorder %v3753_v1, 0.0  ;;  %vm1736_vm9 = vcmp.lt.s32.totalorder %v3782_v20, 320 }
 0x180   : > { %vm3774_vm2 = vmand %vm1154_vm1, %vm1733_vm0 }
 0x181   : > { %v6110_v3 = vsel %vm3774_vm2, 4294967295, %v6109_v3 }
 0x182   : > { %6111 = vst [vmem:[#allocation90_spill] sm:$0xff] %v6110_v3  ;;  %v3787_v3 = vpop.eup %2792 }
 0x183   : > { %v3795_v19 = vpop.eup %2794 }
 0x186   : > { %v619_v22 = vpop.f32.mrb[0].mxu0  ;;  %v699_v52 = vpop.f32.mrb[0].mxu1 }
 0x187   : > { %v906_v58 = vmul.f32 %v2775_v45, %v619_v22  ;;  %v938_v46 = vmul.f32 %v2783_v11, %v699_v52  ;;  %v621_v25 = vpop.f32.mrb[1].mxu0  ;;  %v701_v55 = vpop.f32.mrb[1].mxu1 }
 0x188   : > { %v907_v34 = vmul.f32 %v2775_v45, %v621_v25  ;;  %v939_v23 = vmul.f32 %v2783_v11, %v701_v55  ;;  %v623_v1 = vpop.f32.mrb[2].mxu0  ;;  %v703_v24 = vpop.f32.mrb[2].mxu1 }
 0x189   : > { %v3790_v22 = vmul.f32 %v3765_v42, %v906_v58  ;;  %v3793_v52 = vmul.f32 %v3765_v42, %v938_v46  ;;  %v908_v50 = vmul.f32 %v2779_v10, %v623_v1  ;;  %v940_v17 = vmul.f32 %v2787_v41, %v703_v24  ;;  %v625_v44 = vpop.f32.mrb[3].mxu0  ;;  %v705_v4 = vpop.f32.mrb[3].mxu1 }
 0x18a   : > { %v3798_v11 = vmul.f32 %v3768_v0, %v907_v34  ;;  %v3801_v45 = vmul.f32 %v3768_v0, %v939_v23  ;;  %v909_v25 = vmul.f32 %v2779_v10, %v625_v44  ;;  %v941_v55 = vmul.f32 %v2787_v41, %v705_v4  ;;  %v3805_v58 = vpop.xlane.xlu0 %1089  ;;  %v3807_v46 = vpop.eup %2796 }
 0x18b   : > { %6112 = vst [vmem:[#allocation91_spill] sm:$0xff] %v3790_v22  ;;  %6113 = vst [vmem:[#allocation92_spill] sm:$0xff] %v3793_v52  ;;  %v3810_v24 = vmul.f32 %v3765_v42, %v908_v50  ;;  %v3813_v1 = vmul.f32 %v3765_v42, %v940_v17  ;;  %v1174_v34 = vmul.f32 %v3790_v22, %v3451_v28  ;;  %v2799_v44 = vpop.eup %2798  ;;  %vm1156_vm6 = vcmp.gt.f32.partialorder %v3805_v58, 0.0 }
 0x18c   : > { %6114 = vst [vmem:[#allocation93_spill] sm:$0xff] %v3798_v11  ;;  %6115 = vst [vmem:[#allocation94_spill] sm:$0xff] %v3801_v45  ;;  %v1206_v23 = vmul.f32 %v3793_v52, %v3569_v13  ;;  %v3820_v4 = vmul.f32 %v3768_v0, %v909_v25  ;;  %v3823_v10 = vmul.f32 %v3768_v0, %v941_v55  ;;  %v3829_v17 = vpop.eup %2800 }
 0x18d   : > { %6116 = vst [vmem:[#allocation95_spill] sm:$0xff] %v3805_v58  ;;  %6117 = vst [vmem:[#allocation96_spill] sm:$0xff] %v3810_v24  ;;  %v1175_v41 = vmul.f32 %v3798_v11, %v3453_v29  ;;  %v1207_v50 = vmul.f32 %v3801_v45, %v3571_v14  ;;  %v1176_v22 = vmul.f32 %v3810_v24, %v3468_v48  ;;  %v2803_v25 = vpop.eup %2802 }
 0x18e   : > { %6118 = vst [vmem:[#allocation97_spill] sm:$0xff] %v3813_v1  ;;  %6119 = vst [vmem:[#allocation98_spill] sm:$0xff] %v3820_v4  ;;  %v1208_v52 = vmul.f32 %v3813_v1, %v3581_v26  ;;  %v629_v55 = vpop.f32.mrb[4].mxu0  ;;  %v709_v28 = vpop.f32.mrb[4].mxu1  ;;  %v1177_v11 = vmul.f32 %v3820_v4, %v3470_v51  ;;  %v1209_v45 = vmul.f32 %v3823_v10, %v3585_v35  ;;  %v6121_v1 = vmov 0 }
 0x18f   : > { %6120 = vst [vmem:[#allocation99_spill] sm:$0xff] %v3823_v10  ;;  %v1238_v13 = vadd.f32 %v1175_v41, %v1174_v34  ;;  %v6122_v1 = vsel %vm3845_vm7, 4294967295, %v6121_v1  ;;  %v2805_v24 = vpop.eup %2804  ;;  %v910_v48 = vmul.f32 %v3744_v21, %v629_v55  ;;  %v942_v29 = vmul.f32 %v2799_v44, %v709_v28  ;;  %v631_v34 = vpop.f32.mrb[5].mxu0  ;;  %vm3854_vm8 = vmand %vm1156_vm6, %vm1735_vm4 }
 0x190   : > { %6123 = vst [vmem:[#allocation100_spill] sm:$0xff] %v6122_v1  ;;  %v711_v41 = vpop.f32.mrb[5].mxu1  ;;  %v1286_v26 = vadd.f32 %v1207_v50, %v1206_v23  ;;  %v6125_v33 = vsel %vm3854_vm8, 4294967295, %v6124_v33  ;;  %v3859_v40 = vpop.eup %2806  ;;  %v911_v1 = vmul.f32 %v3744_v21, %v631_v34  ;;  %v1241_v4 = vadd.f32 %v1177_v11, %v1176_v22 }
 0x191   : > { %6126 = vst [vmem:[#allocation101_spill] sm:$0xff] %v6125_v33  ;;  %v943_v10 = vmul.f32 %v2799_v44, %v711_v41  ;;  %1239 = vadd.xlane.f32.xlu0 %v1238_v13  ;;  %v633_v28 = vpop.f32.mrb[6].mxu0  ;;  %v713_v55 = vpop.f32.mrb[6].mxu1  ;;  %v1289_v23 = vadd.f32 %v1209_v45, %v1208_v52  ;;  %v3865_v47 = vmul.f32 %v3765_v42, %v910_v48 }
 0x192   : > { %v3862_v50 = vpop.eup %2808  ;;  %v3868_v51 = vmul.f32 %v3765_v42, %v942_v29  ;;  %v912_v33 = vmul.f32 %v3751_v37, %v633_v28  ;;  %v635_v35 = vpop.f32.mrb[7].mxu0  ;;  %v944_v14 = vmul.f32 %v2803_v25, %v713_v55  ;;  %v3872_v21 = vmul.f32 %v3768_v0, %v911_v1  ;;  %1242 = vadd.xlane.f32.xlu1 %v1241_v4 }
 0x193   : > { %6127 = vst [vmem:[#allocation102_spill] sm:$0xff] %v3865_v47  ;;  %v715_v58 = vpop.f32.mrb[7].mxu1  ;;  %v3875_v13 = vmul.f32 %v3768_v0, %v943_v10  ;;  %v913_v22 = vmul.f32 %v3751_v37, %v635_v35  ;;  %v3878_v48 = vpop.xlane.xlu1 %1092  ;;  %v1178_v45 = vmul.f32 %v3865_v47, %v3472_v38 }
 0x194   : > { %6128 = vst [vmem:[#allocation103_spill] sm:$0xff] %v3868_v51  ;;  %6129 = vst [vmem:[#allocation104_spill] sm:$0xff] %v3872_v21  ;;  %v945_v52 = vmul.f32 %v2803_v25, %v715_v58  ;;  %v3881_v29 = vmul.f32 %v3765_v42, %v912_v33  ;;  %v3884_v11 = vmul.f32 %v3765_v42, %v944_v14  ;;  %vm5928_vm10 = vcmp.gt.f32.partialorder %v3878_v48, 0.0  ;;  %v3906_v10 = vpop.xlane.xlu0 %1095 }
 0x195   : > { %6130 = vst [vmem:[#allocation105_spill] sm:$0xff] %v3875_v13  ;;  %v1210_v1 = vmul.f32 %v3868_v51, %v3587_v27  ;;  %v3891_v44 = vmul.f32 %v3768_v0, %v913_v22  ;;  %1287 = vadd.xlane.f32.xlu0 %v1286_v26  ;;  %v1179_v37 = vmul.f32 %v3872_v21, %v3474_v43  ;;  %vm3917_vm11 = vmand %vm5928_vm10, %vm1736_vm9  ;;  %v6135_v33 = vmov 0 }
 0x196   : > { %6131 = vst [vmem:[#allocation106_spill] sm:$0xff] %v3881_v29  ;;  %6132 = vst [vmem:[#allocation107_spill] sm:$0xff] %v3884_v11  ;;  %v3894_v35 = vmul.f32 %v3768_v0, %v945_v52  ;;  %v1211_v14 = vmul.f32 %v3875_v13, %v3589_v36  ;;  %v1180_v58 = vmul.f32 %v3881_v29, %v3478_v54  ;;  %1290 = vadd.xlane.f32.xlu1 %v1289_v23  ;;  %v639_v26 = vpop.f32.mrb[8].mxu0  ;;  %v719_v25 = vpop.f32.mrb[8].mxu1 }
 0x197   : > { %6133 = vst [vmem:[#allocation108_spill] sm:$0xff] %v3891_v44  ;;  %v1212_v4 = vmul.f32 %v3884_v11, %v3593_v53  ;;  %v1244_v34 = vadd.f32 %v1179_v37, %v1178_v45  ;;  %v1181_v41 = vmul.f32 %v3891_v44, %v3480_v56  ;;  %v6136_v33 = vsel %vm3917_vm11, 4294967295, %v6135_v33  ;;  %v641_v23 = vpop.f32.mrb[9].mxu0  ;;  %v721_v22 = vpop.f32.mrb[9].mxu1 }
 0x198   : > { %6134 = vst [vmem:[#allocation109_spill] sm:$0xff] %v3894_v35  ;;  %v1213_v6 = vmul.f32 %v3894_v35, %v3597_v60  ;;  %6137 = vst [vmem:[#allocation110_spill] sm:$0xff] %v6136_v33  ;;  %v914_v28 = vmul.f32 %v3763_v59, %v639_v26  ;;  %v946_v55 = vmul.f32 %v2805_v24, %v719_v25  ;;  %v3923_v45 = vpop.eup %2810  ;;  %v643_v20 = vpop.f32.mrb[10].mxu0 }
 0x199   : > { %v1292_v52 = vadd.f32 %v1211_v14, %v1210_v1  ;;  %v915_v32 = vmul.f32 %v3763_v59, %v641_v23  ;;  %v947_v37 = vmul.f32 %v2805_v24, %v721_v22  ;;  %1245 = vadd.xlane.f32.xlu0 %v1244_v34  ;;  %v723_v35 = vpop.f32.mrb[10].mxu1  ;;  %v1247_v11 = vadd.f32 %v1181_v41, %v1180_v58  ;;  %v645_v14 = vpop.f32.mrb[11].mxu0 }
 0x19a   : > { %v1295_v13 = vadd.f32 %v1213_v6, %v1212_v4  ;;  %v3927_v33 = vmul.f32 %v3765_v42, %v914_v28  ;;  %v3930_v26 = vmul.f32 %v3765_v42, %v946_v55  ;;  %v916_v1 = vmul.f32 %v3778_v57, %v643_v20  ;;  %v725_v25 = vpop.f32.mrb[11].mxu1  ;;  %v3967_v22 = vpop.xlane.xlu1 %1098 }
 0x19b   : > { %v948_v31 = vmul.f32 %v3859_v40, %v723_v35  ;;  %v3935_v59 = vmul.f32 %v3768_v0, %v915_v32  ;;  %v3938_v24 = vmul.f32 %v3768_v0, %v947_v37  ;;  %v917_v58 = vmul.f32 %v3778_v57, %v645_v14  ;;  %1248 = vadd.xlane.f32.xlu1 %v1247_v11  ;;  %v3969_v32 = vpop.xlane.xlu0 %1101  ;;  %v3976_v14 = vpop.eup %2812 }
 0x19c   : > { %6138 = vst [vmem:[#allocation111_spill] sm:$0xff] %v3927_v33  ;;  %6139 = vst [vmem:[#allocation112_spill] sm:$0xff] %v3930_v26  ;;  %v949_v4 = vmul.f32 %v3859_v40, %v725_v25  ;;  %v3943_v34 = vmul.f32 %v3765_v42, %v916_v1  ;;  %v1182_v35 = vmul.f32 %v3927_v33, %v3486_v62 }
 0x19d   : > { %6140 = vst [vmem:[#allocation113_spill] sm:$0xff] %v3935_v59  ;;  %6141 = vst [vmem:[#allocation114_spill] sm:$0xff] %v3938_v24  ;;  %v3946_v41 = vmul.f32 %v3765_v42, %v948_v31  ;;  %v1214_v6 = vmul.f32 %v3930_v26, %v3599_v61  ;;  %v3953_v28 = vmul.f32 %v3768_v0, %v917_v58  ;;  %1293 = vadd.xlane.f32.xlu0 %v1292_v52 }
 0x19e   : > { %6142 = vst [vmem:[#allocation115_spill] sm:$0xff] %v3943_v34  ;;  %v3956_v57 = vmul.f32 %v3768_v0, %v949_v4  ;;  %v1183_v40 = vmul.f32 %v3935_v59, %v3488_v63  ;;  %v1215_v11 = vmul.f32 %v3938_v24, %v3601_v2  ;;  %v1184_v55 = vmul.f32 %v3943_v34, %v3497_v7  ;;  %v649_v52 = vpop.f32.mrb[12].mxu0  ;;  %v729_v37 = vpop.f32.mrb[12].mxu1  ;;  %v6342_v7 = vld [vmem:[#allocation33_spill] sm:$0xff] }
 0x19f   : > { %6143 = vst [vmem:[#allocation116_spill] sm:$0xff] %v3946_v41  ;;  %6144 = vst [vmem:[#allocation117_spill] sm:$0xff] %v3953_v28  ;;  %v1216_v23 = vmul.f32 %v3946_v41, %v3605_v12  ;;  %1296 = vadd.xlane.f32.xlu1 %v1295_v13  ;;  %v1185_v1 = vmul.f32 %v3953_v28, %v3499_v8  ;;  %v918_v31 = vmul.f32 %v3784_v16, %v649_v52  ;;  %v651_v58 = vpop.f32.mrb[13].mxu0  ;;  %v731_v4 = vpop.f32.mrb[13].mxu1  ;;  %v6349_v8 = vld [vmem:[#allocation63_spill] sm:$0xff] }
 0x1a0   : > { %6145 = vst [vmem:[#allocation118_spill] sm:$0xff] %v3956_v57  ;;  %6146 = vst [vmem:[#allocation119_spill] sm:$0xff] %v3969_v32  ;;  %v1250_v20 = vadd.f32 %v1183_v40, %v1182_v35  ;;  %v1217_v39 = vmul.f32 %v3956_v57, %v3607_v15  ;;  %v950_v25 = vmul.f32 %v3862_v50, %v729_v37  ;;  %v2815_v35 = vpop.eup %2814  ;;  %v653_v57 = vpop.f32.mrb[14].mxu0  ;;  %v6346_v15 = vld [vmem:[#allocation91_spill] sm:$0xff] }
 0x1a1   : > { %v1298_v13 = vadd.f32 %v1215_v11, %v1214_v6  ;;  %v919_v40 = vmul.f32 %v3784_v16, %v651_v58  ;;  %v951_v41 = vmul.f32 %v3862_v50, %v731_v4  ;;  %v733_v24 = vpop.f32.mrb[14].mxu1  ;;  %v1253_v5 = vadd.f32 %v1185_v1, %v1184_v55  ;;  %v2817_v28 = vpop.eup %2816  ;;  %v6157_v4 = vld [vmem:[#allocation68_spill] sm:$0xff] }
 0x1a2   : > { %1251 = vadd.xlane.f32.xlu0 %v1250_v20  ;;  %v1301_v26 = vadd.f32 %v1217_v39, %v1216_v23  ;;  %v3984_v52 = vmul.f32 %v3765_v42, %v918_v31  ;;  %v3987_v37 = vmul.f32 %v3765_v42, %v950_v25  ;;  %v920_v6 = vmul.f32 %v3787_v3, %v653_v57  ;;  %v655_v30 = vpop.f32.mrb[15].mxu0  ;;  %v735_v16 = vpop.f32.mrb[15].mxu1  ;;  %v6156_v25 = vld [vmem:[#allocation49_spill] sm:$0xff] }
 0x1a3   : > { %v952_v11 = vmul.f32 %v3923_v45, %v733_v24  ;;  %v3992_v50 = vmul.f32 %v3768_v0, %v919_v40  ;;  %v3995_v20 = vmul.f32 %v3768_v0, %v951_v41  ;;  %v921_v55 = vmul.f32 %v3787_v3, %v655_v30  ;;  %1254 = vadd.xlane.f32.xlu1 %v1253_v5  ;;  %v6158_v40 = vld [vmem:[#allocation21_spill] sm:$0xff] }
 0x1a4   : > { %6147 = vst [vmem:[#allocation120_spill] sm:$0xff] %v3984_v52  ;;  %6148 = vst [vmem:[#allocation121_spill] sm:$0xff] %v3987_v37  ;;  %v953_v23 = vmul.f32 %v3923_v45, %v735_v16  ;;  %v4000_v1 = vmul.f32 %v3765_v42, %v920_v6  ;;  %v1186_v24 = vmul.f32 %v3984_v52, %v3501_v9  ;;  %v6155_v45 = vld [vmem:[#allocation20_spill] sm:$0xff]  ;;  %2824 = vrsqrt.f32 %v6157_v4  ;;  %v6159_v6 = vld [vmem:[#allocation50_spill] sm:$0xff]  ;;  %v4026_v16 = vpop.xlane.xlu0 %1107 }
 0x1a5   : > { %6149 = vst [vmem:[#allocation122_spill] sm:$0xff] %v3992_v50  ;;  %6150 = vst [vmem:[#allocation123_spill] sm:$0xff] %v3995_v20  ;;  %v4003_v57 = vmul.f32 %v3765_v42, %v952_v11  ;;  %v1218_v39 = vmul.f32 %v3987_v37, %v3609_v18  ;;  %v4010_v41 = vmul.f32 %v3768_v0, %v921_v55  ;;  %v4024_v11 = vpop.xlane.xlu1 %1104  ;;  %v6162_v37 = vld [vmem:[#allocation22_spill] sm:$0xff]  ;;  %v6164_v52 = vld [vmem:[#allocation71_spill] sm:$0xff] }
 0x1a6   : > { %6151 = vst [vmem:[#allocation124_spill] sm:$0xff] %v4000_v1  ;;  %v4013_v3 = vmul.f32 %v3768_v0, %v953_v23  ;;  %1299 = vadd.xlane.f32.xlu0 %v1298_v13  ;;  %v1187_v31 = vmul.f32 %v3992_v50, %v6155_v45  ;;  %v1219_v58 = vmul.f32 %v3995_v20, %v6156_v25  ;;  %6160 = vst [vmem:[#allocation68_spill] sm:$0xff] %v4024_v11  ;;  %v659_v13 = vpop.f32.mrb[16].mxu0  ;;  %v739_v55 = vpop.f32.mrb[16].mxu1  ;;  %v6163_v20 = vld [vmem:[#allocation51_spill] sm:$0xff]  ;;  %v6347_v9 = vld [vmem:[#allocation93_spill] sm:$0xff] }
 0x1a7   : > { %6152 = vst [vmem:[#allocation125_spill] sm:$0xff] %v4003_v57  ;;  %6153 = vst [vmem:[#allocation126_spill] sm:$0xff] %v4010_v41  ;;  %v1188_v5 = vmul.f32 %v4000_v1, %v6158_v40  ;;  %v1220_v30 = vmul.f32 %v4003_v57, %v6159_v6  ;;  %1302 = vadd.xlane.f32.xlu1 %v1301_v26  ;;  %v1189_v50 = vmul.f32 %v4010_v41, %v6162_v37  ;;  %v4033_v1 = vpop.eup %2818  ;;  %v661_v59 = vpop.f32.mrb[17].mxu0  ;;  %v6165_v26 = vld [vmem:[#allocation72_spill] sm:$0xff] }
 0x1a8   : > { %6154 = vst [vmem:[#allocation127_spill] sm:$0xff] %v4013_v3  ;;  %6161 = vst [vmem:[#allocation128_spill] sm:$0xff] %v4026_v16  ;;  %v1256_v23 = vadd.f32 %v1187_v31, %v1186_v24  ;;  %v1221_v4 = vmul.f32 %v4013_v3, %v6163_v20  ;;  %2826 = vrsqrt.f32 %v6164_v52  ;;  %v922_v57 = vmul.f32 %v3795_v19, %v659_v13  ;;  %v741_v33 = vpop.f32.mrb[17].mxu1  ;;  %v2821_v44 = vpop.eup %2820 }
 0x1a9   : > { %v954_v34 = vmul.f32 %v2815_v35, %v739_v55  ;;  %v1304_v51 = vadd.f32 %v1219_v58, %v1218_v39  ;;  %2828 = vrsqrt.f32 %v6165_v26  ;;  %v923_v24 = vmul.f32 %v3795_v19, %v661_v59  ;;  %v663_v41 = vpop.f32.mrb[18].mxu0  ;;  %v743_v29 = vpop.f32.mrb[18].mxu1 }
 0x1aa   : > { %v955_v31 = vmul.f32 %v2815_v35, %v741_v33  ;;  %1257 = vadd.xlane.f32.xlu0 %v1256_v23  ;;  %v1259_v3 = vadd.f32 %v1189_v50, %v1188_v5  ;;  %v1307_v21 = vadd.f32 %v1221_v4, %v1220_v30  ;;  %v2823_v52 = vpop.eup %2822  ;;  %v4039_v47 = vmul.f32 %v3765_v42, %v922_v57  ;;  %v665_v58 = vpop.f32.mrb[19].mxu0  ;;  %v6172_v57 = vld [vmem:[#allocation23_spill] sm:$0xff] }
 0x1ab   : > { %v4042_v13 = vmul.f32 %v3765_v42, %v954_v34  ;;  %v924_v39 = vmul.f32 %v3807_v46, %v663_v41  ;;  %v956_v55 = vmul.f32 %v2817_v28, %v743_v29  ;;  %v745_v26 = vpop.f32.mrb[19].mxu1  ;;  %v4046_v19 = vmul.f32 %v3768_v0, %v923_v24  ;;  %v6173_v41 = vld [vmem:[#allocation52_spill] sm:$0xff]  ;;  %v6178_v24 = vld [vmem:[#allocation69_spill] sm:$0xff] }
 0x1ac   : > { %6166 = vst [vmem:[#allocation71_spill] sm:$0xff] %v4039_v47  ;;  %v4049_v33 = vmul.f32 %v3768_v0, %v955_v31  ;;  %v925_v59 = vmul.f32 %v3807_v46, %v665_v58  ;;  %v957_v35 = vmul.f32 %v2817_v28, %v745_v26  ;;  %1260 = vadd.xlane.f32.xlu1 %v1259_v3  ;;  %v6176_v46 = vld [vmem:[#allocation24_spill] sm:$0xff]  ;;  %v6177_v3 = vld [vmem:[#allocation53_spill] sm:$0xff]  ;;  %2830 = vrsqrt.f32 %v6178_v24  ;;  %v6180_v58 = vld [vmem:[#allocation54_spill] sm:$0xff]  ;;  %v4077_v26 = vpop.xlane.xlu1 %1110 }
 0x1ad   : > { %6167 = vst [vmem:[#allocation72_spill] sm:$0xff] %v4042_v13  ;;  %6168 = vst [vmem:[#allocation129_spill] sm:$0xff] %v4046_v19  ;;  %v4053_v50 = vmul.f32 %v3765_v42, %v924_v39  ;;  %v4056_v34 = vmul.f32 %v3765_v42, %v956_v55  ;;  %v1190_v29 = vmul.f32 %v4039_v47, %v6172_v57  ;;  %v6179_v31 = vld [vmem:[#allocation25_spill] sm:$0xff] }
 0x1ae   : > { %6169 = vst [vmem:[#allocation130_spill] sm:$0xff] %v4049_v33  ;;  %v1222_v5 = vmul.f32 %v4042_v13, %v6173_v41  ;;  %v4063_v30 = vmul.f32 %v3768_v0, %v925_v59  ;;  %v4066_v23 = vmul.f32 %v3768_v0, %v957_v35  ;;  %1305 = vadd.xlane.f32.xlu0 %v1304_v51  ;;  %6181 = vst [vmem:[#allocation69_spill] sm:$0xff] %v4077_v26  ;;  %v4079_v59 = vpop.xlane.xlu0 %1113  ;;  %v669_v51 = vpop.f32.mrb[20].mxu0 }
 0x1af   : > { %6170 = vst [vmem:[#allocation131_spill] sm:$0xff] %v4053_v50  ;;  %6171 = vst [vmem:[#allocation132_spill] sm:$0xff] %v4056_v34  ;;  %v1191_v28 = vmul.f32 %v4046_v19, %v6176_v46  ;;  %v1223_v4 = vmul.f32 %v4049_v33, %v6177_v3  ;;  %v1192_v39 = vmul.f32 %v4053_v50, %v6179_v31  ;;  %v749_v35 = vpop.f32.mrb[20].mxu1  ;;  %v6183_v19 = vld [vmem:[#allocation26_spill] sm:$0xff]  ;;  %v6184_v33 = vld [vmem:[#allocation55_spill] sm:$0xff]  ;;  %v4086_v50 = vpop.eup %2824 }
 0x1b0   : > { %6174 = vst [vmem:[#allocation133_spill] sm:$0xff] %v4063_v30  ;;  %6175 = vst [vmem:[#allocation134_spill] sm:$0xff] %v4066_v23  ;;  %v1224_v55 = vmul.f32 %v4056_v34, %v6180_v58  ;;  %1308 = vadd.xlane.f32.xlu1 %v1307_v21  ;;  %v1193_v47 = vmul.f32 %v4063_v30, %v6183_v19  ;;  %v1225_v24 = vmul.f32 %v4066_v23, %v6184_v33  ;;  %v6185_v3 = vld [vmem:[#allocation73_spill] sm:$0xff]  ;;  %v671_v41 = vpop.f32.mrb[21].mxu0  ;;  %v751_v31 = vpop.f32.mrb[21].mxu1  ;;  %v6186_v21 = vld [vmem:[#allocation74_spill] sm:$0xff] }
 0x1b1   : > { %6182 = vst [vmem:[#allocation135_spill] sm:$0xff] %v4079_v59  ;;  %v1262_v13 = vadd.f32 %v1191_v28, %v1190_v29  ;;  %2832 = vrsqrt.f32 %v6185_v3  ;;  %v926_v34 = vmul.f32 %v3829_v17, %v669_v51  ;;  %v958_v58 = vmul.f32 %v2821_v44, %v749_v35  ;;  %v673_v30 = vpop.f32.mrb[22].mxu0  ;;  %v753_v19 = vpop.f32.mrb[22].mxu1 }
 0x1b2   : > { %v1310_v46 = vadd.f32 %v1223_v4, %v1222_v5  ;;  %2834 = vrsqrt.f32 %v6186_v21  ;;  %v2827_v57 = vpop.eup %2826  ;;  %v927_v29 = vmul.f32 %v3829_v17, %v671_v41  ;;  %v959_v28 = vmul.f32 %v2821_v44, %v751_v31  ;;  %v675_v4 = vpop.f32.mrb[23].mxu0  ;;  %v6194_v31 = vld [vmem:[#allocation56_spill] sm:$0xff] }
 0x1b3   : > { %1263 = vadd.xlane.f32.xlu0 %v1262_v13  ;;  %v1265_v23 = vadd.f32 %v1193_v47, %v1192_v39  ;;  %v1313_v33 = vadd.f32 %v1225_v24, %v1224_v55  ;;  %v2829_v3 = vpop.eup %2828  ;;  %v4092_v20 = vmul.f32 %v3765_v42, %v926_v34  ;;  %v4095_v51 = vmul.f32 %v3765_v42, %v958_v58  ;;  %v755_v21 = vpop.f32.mrb[23].mxu1 }
 0x1b4   : > { %v928_v5 = vmul.f32 %v3976_v14, %v673_v30  ;;  %v960_v35 = vmul.f32 %v2823_v52, %v753_v19  ;;  %v4099_v17 = vmul.f32 %v3768_v0, %v927_v29  ;;  %v4102_v44 = vmul.f32 %v3768_v0, %v959_v28  ;;  %v6193_v30 = vld [vmem:[#allocation27_spill] sm:$0xff]  ;;  %v6199_v29 = vld [vmem:[#allocation29_spill] sm:$0xff] }
 0x1b5   : > { %6187 = vst [vmem:[#allocation73_spill] sm:$0xff] %v4092_v20  ;;  %6188 = vst [vmem:[#allocation74_spill] sm:$0xff] %v4095_v51  ;;  %v929_v47 = vmul.f32 %v3976_v14, %v675_v4  ;;  %v961_v13 = vmul.f32 %v2823_v52, %v755_v21  ;;  %1266 = vadd.xlane.f32.xlu1 %v1265_v23  ;;  %v1194_v19 = vmul.f32 %v4092_v20, %v6193_v30  ;;  %v6197_v14 = vld [vmem:[#allocation28_spill] sm:$0xff]  ;;  %v6198_v23 = vld [vmem:[#allocation57_spill] sm:$0xff]  ;;  %v4131_v21 = vpop.xlane.xlu0 %1119 }
 0x1b6   : > { %6189 = vst [vmem:[#allocation136_spill] sm:$0xff] %v4099_v17  ;;  %6190 = vst [vmem:[#allocation137_spill] sm:$0xff] %v4102_v44  ;;  %v4106_v34 = vmul.f32 %v3765_v42, %v928_v5  ;;  %v4109_v41 = vmul.f32 %v3765_v42, %v960_v35  ;;  %v1226_v39 = vmul.f32 %v4095_v51, %v6194_v31  ;;  %v6200_v5 = vld [vmem:[#allocation58_spill] sm:$0xff]  ;;  %v4129_v35 = vpop.xlane.xlu1 %1116 }
 0x1b7   : > { %v4116_v58 = vmul.f32 %v3768_v0, %v929_v47  ;;  %v4119_v55 = vmul.f32 %v3768_v0, %v961_v13  ;;  %1311 = vadd.xlane.f32.xlu0 %v1310_v46  ;;  %v1195_v52 = vmul.f32 %v4099_v17, %v6197_v14  ;;  %v1227_v24 = vmul.f32 %v4102_v44, %v6198_v23  ;;  %v6203_v47 = vld [vmem:[#allocation70_spill] sm:$0xff]  ;;  %v679_v46 = vpop.f32.mrb[24].mxu0  ;;  %v759_v13 = vpop.f32.mrb[24].mxu1  ;;  %v6205_v44 = vld [vmem:[#allocation59_spill] sm:$0xff] }
 0x1b8   : > { %6191 = vst [vmem:[#allocation138_spill] sm:$0xff] %v4106_v34  ;;  %6192 = vst [vmem:[#allocation139_spill] sm:$0xff] %v4109_v41  ;;  %v1196_v28 = vmul.f32 %v4106_v34, %v6199_v29  ;;  %v1228_v4 = vmul.f32 %v4109_v41, %v6200_v5  ;;  %2836 = vrsqrt.f32 %v6203_v47  ;;  %v6204_v17 = vld [vmem:[#allocation30_spill] sm:$0xff]  ;;  %v2831_v34 = vpop.eup %2830  ;;  %v930_v31 = vmul.f32 %v4033_v1, %v679_v46  ;;  %v681_v5 = vpop.f32.mrb[25].mxu0 }
 0x1b9   : > { %6195 = vst [vmem:[#allocation140_spill] sm:$0xff] %v4116_v58  ;;  %6196 = vst [vmem:[#allocation141_spill] sm:$0xff] %v4119_v55  ;;  %1314 = vadd.xlane.f32.xlu1 %v1313_v33  ;;  %v1268_v51 = vadd.f32 %v1195_v52, %v1194_v19  ;;  %v1197_v20 = vmul.f32 %v4116_v58, %v6204_v17  ;;  %v1229_v23 = vmul.f32 %v4119_v55, %v6205_v44  ;;  %v761_v29 = vpop.f32.mrb[25].mxu1  ;;  %v6206_v30 = vld [vmem:[#allocation82_spill] sm:$0xff]  ;;  %v683_v19 = vpop.f32.mrb[26].mxu0 }
 0x1ba   : > { %6201 = vst [vmem:[#allocation142_spill] sm:$0xff] %v4129_v35  ;;  %6202 = vst [vmem:[#allocation143_spill] sm:$0xff] %v4131_v21  ;;  %v962_v41 = vmul.f32 %v2827_v57, %v759_v13  ;;  %v1316_v14 = vadd.f32 %v1227_v24, %v1226_v39  ;;  %v1682_v6 = vadd.s32 208, %v6206_v30  ;;  %v931_v33 = vmul.f32 %v4033_v1, %v681_v5  ;;  %v763_v52 = vpop.f32.mrb[26].mxu1  ;;  %v685_v24 = vpop.f32.mrb[27].mxu0 }
 0x1bb   : > { %v2833_v47 = vpop.eup %2832  ;;  %v963_v25 = vmul.f32 %v2827_v57, %v761_v29  ;;  %1269 = vadd.xlane.f32.xlu0 %v1268_v51  ;;  %v1271_v58 = vadd.f32 %v1197_v20, %v1196_v28  ;;  %v1319_v17 = vadd.f32 %v1229_v23, %v1228_v4  ;;  %v4142_v55 = vmul.f32 %v3765_v42, %v930_v31  ;;  %v765_v44 = vpop.f32.mrb[27].mxu1  ;;  %v6213_v23 = vld [vmem:[#allocation31_spill] sm:$0xff]  ;;  %v6214_v28 = vld [vmem:[#allocation60_spill] sm:$0xff] }
 0x1bc   : > { %v2835_v18 = vpop.eup %2834  ;;  %v4145_v46 = vmul.f32 %v3765_v42, %v962_v41  ;;  %v932_v39 = vmul.f32 %v4086_v50, %v683_v19  ;;  %v964_v13 = vmul.f32 %v2829_v3, %v763_v52  ;;  %v4149_v1 = vmul.f32 %v3768_v0, %v931_v33  ;;  %v4175_v33 = vpop.xlane.xlu1 %1122  ;;  %v6220_v19 = vld [vmem:[#allocation33_spill] sm:$0xff] }
 0x1bd   : > { %6207 = vst [vmem:[#allocation70_spill] sm:$0xff] %v4142_v55  ;;  %v4152_v57 = vmul.f32 %v3768_v0, %v963_v25  ;;  %v933_v20 = vmul.f32 %v4086_v50, %v685_v24  ;;  %v965_v51 = vmul.f32 %v2829_v3, %v765_v44  ;;  %1272 = vadd.xlane.f32.xlu1 %v1271_v58  ;;  %v6217_v50 = vld [vmem:[#allocation32_spill] sm:$0xff]  ;;  %v6218_v44 = vld [vmem:[#allocation61_spill] sm:$0xff]  ;;  %6219 = vst [vmem:[#allocation150_spill] sm:$0xff] %v4175_v33 }
 0x1be   : > { %6208 = vst [vmem:[#allocation82_spill] sm:$0xff] %v4145_v46  ;;  %6209 = vst [vmem:[#allocation144_spill] sm:$0xff] %v4149_v1  ;;  %v4156_v31 = vmul.f32 %v3765_v42, %v932_v39  ;;  %v4159_v41 = vmul.f32 %v3765_v42, %v964_v13  ;;  %v1198_v29 = vmul.f32 %v4142_v55, %v6213_v23  ;;  %v6221_v39 = vld [vmem:[#allocation62_spill] sm:$0xff]  ;;  %v6222_v13 = vld [vmem:[#allocation85_spill] sm:$0xff] }
 0x1bf   : > { %6210 = vst [vmem:[#allocation145_spill] sm:$0xff] %v4152_v57  ;;  %v1230_v5 = vmul.f32 %v4145_v46, %v6214_v28  ;;  %v4166_v4 = vmul.f32 %v3768_v0, %v933_v20  ;;  %v4169_v25 = vmul.f32 %v3768_v0, %v965_v51  ;;  %1317 = vadd.xlane.f32.xlu0 %v1316_v14  ;;  %v4182_v46 = vpop.xlane.xlu0 %1125  ;;  %v689_v14 = vpop.f32.mrb[28].mxu0 }
 0x1c0   : > { %6211 = vst [vmem:[#allocation146_spill] sm:$0xff] %v4156_v31  ;;  %6212 = vst [vmem:[#allocation147_spill] sm:$0xff] %v4159_v41  ;;  %v1199_v3 = vmul.f32 %v4149_v1, %v6217_v50  ;;  %v1231_v58 = vmul.f32 %v4152_v57, %v6218_v44  ;;  %v1200_v52 = vmul.f32 %v4156_v31, %v6220_v19  ;;  %v769_v51 = vpop.f32.mrb[28].mxu1  ;;  %v6223_v1 = vld [vmem:[#allocation34_spill] sm:$0xff]  ;;  %v6224_v57 = vld [vmem:[#allocation63_spill] sm:$0xff]  ;;  %v1684_v50 = vadd.s32 224, %v6206_v30 }
 0x1c1   : > { %6215 = vst [vmem:[#allocation148_spill] sm:$0xff] %v4166_v4  ;;  %6216 = vst [vmem:[#allocation149_spill] sm:$0xff] %v4169_v25  ;;  %v1232_v24 = vmul.f32 %v4159_v41, %v6221_v39  ;;  %v1715_v20 = vadd.s32 %v6222_v13, %v1682_v6  ;;  %1320 = vadd.xlane.f32.xlu1 %v1319_v17  ;;  %v1201_v28 = vmul.f32 %v4166_v4, %v6223_v1  ;;  %v691_v19 = vpop.f32.mrb[29].mxu0  ;;  %v771_v41 = vpop.f32.mrb[29].mxu1 }
 0x1c2   : > { %v1274_v55 = vadd.f32 %v1199_v3, %v1198_v29  ;;  %v1233_v44 = vmul.f32 %v4169_v25, %v6224_v57  ;;  %v934_v31 = vmul.f32 %v2831_v34, %v689_v14  ;;  %v966_v23 = vmul.f32 %v2833_v47, %v769_v51  ;;  %v2837_v37 = vpop.eup %2836  ;;  %v693_v29 = vpop.f32.mrb[30].mxu0 }
 0x1c3   : > { %v1322_v39 = vadd.f32 %v1231_v58, %v1230_v5  ;;  %v1685_v6 = vadd.s32 232, %v6206_v30  ;;  %v935_v17 = vmul.f32 %v2831_v34, %v691_v19  ;;  %v967_v40 = vmul.f32 %v2833_v47, %v771_v41  ;;  %v773_v3 = vpop.f32.mrb[30].mxu1  ;;  %v695_v51 = vpop.f32.mrb[31].mxu0  ;;  %v6233_v19 = vld [vmem:[#allocation64_spill] sm:$0xff] }
 0x1c4   : > { %1275 = vadd.xlane.f32.xlu0 %v1274_v55  ;;  %v1277_v45 = vadd.f32 %v1201_v28, %v1200_v52  ;;  %v1325_v4 = vadd.f32 %v1233_v44, %v1232_v24  ;;  %v4191_v1 = vmul.f32 %v3765_v42, %v934_v31  ;;  %v4194_v25 = vmul.f32 %v3765_v42, %v966_v23  ;;  %v775_v5 = vpop.f32.mrb[31].mxu1  ;;  %v4202_v41 = vpop.xlane.xlu1 %1128  ;;  %v6232_v28 = vld [vmem:[#allocation35_spill] sm:$0xff]  ;;  %v6237_v24 = vld [vmem:[#allocation65_spill] sm:$0xff] }
 0x1c5   : > { %v936_v14 = vmul.f32 %v2837_v37, %v693_v29  ;;  %v968_v57 = vmul.f32 %v2835_v18, %v773_v3  ;;  %v4197_v58 = vmul.f32 %v3768_v0, %v935_v17  ;;  %v4200_v34 = vmul.f32 %v3768_v0, %v967_v40  ;;  %6229 = vst [vmem:[#allocation154_spill] sm:$0xff] %v4202_v41 }
 0x1c6   : > { %6225 = vst [vmem:[#allocation85_spill] sm:$0xff] %v4191_v1  ;;  %6226 = vst [vmem:[#allocation151_spill] sm:$0xff] %v4194_v25  ;;  %v937_v55 = vmul.f32 %v2837_v37, %v695_v51  ;;  %v969_v47 = vmul.f32 %v2835_v18, %v775_v5  ;;  %1278 = vadd.xlane.f32.xlu1 %v1277_v45  ;;  %v1202_v44 = vmul.f32 %v4191_v1, %v6232_v28  ;;  %v6236_v37 = vld [vmem:[#allocation36_spill] sm:$0xff] }
 0x1c7   : > { %6227 = vst [vmem:[#allocation152_spill] sm:$0xff] %v4197_v58  ;;  %6228 = vst [vmem:[#allocation153_spill] sm:$0xff] %v4200_v34  ;;  %v4205_v31 = vmul.f32 %v3765_v42, %v936_v14  ;;  %v4208_v23 = vmul.f32 %v3765_v42, %v968_v57  ;;  %v1234_v52 = vmul.f32 %v4194_v25, %v6233_v19  ;;  %v6238_v57 = vld [vmem:[#allocation37_spill] sm:$0xff]  ;;  %v6239_v14 = vld [vmem:[#allocation38_spill] sm:$0xff]  ;;  %vm1747_vm12 = vcmp.lt.s32.totalorder %v1715_v20, 320 }
 0x1c8   : > { %v4215_v40 = vmul.f32 %v3768_v0, %v937_v55  ;;  %v4218_v18 = vmul.f32 %v3768_v0, %v969_v47  ;;  %1323 = vadd.xlane.f32.xlu0 %v1322_v39  ;;  %v1203_v45 = vmul.f32 %v4197_v58, %v6236_v37  ;;  %v1235_v42 = vmul.f32 %v4200_v34, %v6237_v24  ;;  %v4230_v39 = vpop.xlane.xlu0 %1131  ;;  %v6240_v47 = vld [vmem:[#allocation66_spill] sm:$0xff]  ;;  %v6241_v25 = vld [vmem:[#allocation67_spill] sm:$0xff]  ;;  %v6256_v58 = vld [vmem:[#allocation80_spill] sm:$0xff] }
 0x1c9   : > { %6230 = vst [vmem:[#allocation155_spill] sm:$0xff] %v4205_v31  ;;  %6231 = vst [vmem:[#allocation156_spill] sm:$0xff] %v4208_v23  ;;  %v1204_v17 = vmul.f32 %v4205_v31, %v6238_v57  ;;  %v1717_v29 = vadd.s32 %v6222_v13, %v1684_v50  ;;  %v1718_v0 = vadd.s32 %v6222_v13, %v1685_v6  ;;  %v4236_v50 = vpop.xlane.xlu1 %1134  ;;  %vm5929_vm13 = vcmp.gt.f32.partialorder %v4182_v46, 0.0 }
 0x1ca   : > { %6234 = vst [vmem:[#allocation35_spill] sm:$0xff] %v4215_v40  ;;  %6235 = vst [vmem:[#allocation64_spill] sm:$0xff] %v4218_v18  ;;  %1326 = vadd.xlane.f32.xlu1 %v1325_v4  ;;  %v1280_v3 = vadd.f32 %v1203_v45, %v1202_v44  ;;  %v1205_v51 = vmul.f32 %v4215_v40, %v6239_v14  ;;  %v1328_v55 = vadd.f32 %v1235_v42, %v1234_v52  ;;  %v6242_v4 = vmov 0  ;;  %v6251_v52 = vld [vmem:[#allocation75_spill] sm:$0xff]  ;;  %v6252_v42 = vld [vmem:[#allocation76_spill] sm:$0xff] }
 0x1cb   : > { %v1236_v34 = vmul.f32 %v4208_v23, %v6240_v47  ;;  %v1237_v31 = vmul.f32 %v4218_v18, %v6241_v25  ;;  %vm1749_vm14 = vcmp.lt.s32.totalorder %v1717_v29, 320  ;;  %vm4241_vm15 = vmand %vm5929_vm13, %vm1747_vm12  ;;  %vm1170_vm0 = vcmp.gt.f32.partialorder %v4230_v39, 0.0  ;;  %v6258_v25 = vld [vmem:[#allocation81_spill] sm:$0xff] }
 0x1cc   : > { %1281 = vadd.xlane.f32.xlu0 %v1280_v3  ;;  %v1283_v5 = vadd.f32 %v1205_v51, %v1204_v17  ;;  %v6243_v4 = vsel %vm4241_vm15, 4294967295, %v6242_v4  ;;  %vm1750_vm3 = vcmp.lt.s32.totalorder %v1718_v0, 320  ;;  %vm5932_vm4 = vcmp.gt.f32.partialorder %v4236_v50, 0.0  ;;  %vm4249_vm9 = vmand %vm1170_vm0, %vm1749_vm14  ;;  %v6254_v51 = vld [vmem:[#allocation78_spill] sm:$0xff]  ;;  %v6264_v47 = vld [vmem:[#allocation89_spill] sm:$0xff] }
 0x1cd   : > { %6244 = vst [vmem:[#allocation36_spill] sm:$0xff] %v6243_v4  ;;  %v1331_v20 = vadd.f32 %v1237_v31, %v1236_v34  ;;  %v6245_v6 = vmov 0  ;;  %vm4255_vm10 = vmand %vm5932_vm4, %vm1750_vm3  ;;  %v6248_v44 = vmov 0  ;;  %vm5939_vm12 = vcmp.gt.f32.partialorder %v6251_v52, 0.0  ;;  %v6253_v31 = vld [vmem:[#allocation77_spill] sm:$0xff] }
 0x1ce   : > { %1284 = vadd.xlane.f32.xlu1 %v1283_v5  ;;  %v6246_v6 = vsel %vm4249_vm9, 4294967295, %v6245_v6  ;;  %v6249_v44 = vsel %vm4255_vm10, 4294967295, %v6248_v44  ;;  %v1657_v45 = vadd.s32 8, %v6206_v30  ;;  %vm5943_vm13 = vcmp.gt.f32.partialorder %v6252_v42, 0.0 }
 0x1cf   : > { %6247 = vst [vmem:[#allocation65_spill] sm:$0xff] %v6246_v6  ;;  %6250 = vst [vmem:[#allocation37_spill] sm:$0xff] %v6249_v44  ;;  %v1658_v34 = vadd.s32 16, %v6206_v30  ;;  %vm5945_vm14 = vcmp.gt.f32.partialorder %v6253_v31, 0.0  ;;  %v1659_v17 = vadd.s32 24, %v6206_v30  ;;  %v1660_v29 = vadd.s32 32, %v6206_v30 }
 0x1d0   : > { %1329 = vadd.xlane.f32.xlu0 %v1328_v55  ;;  %v1334_v3 = vsel %vm5939_vm12, %v6251_v52, 1.0  ;;  %vm5947_vm3 = vcmp.gt.f32.partialorder %v6254_v51, 0.0  ;;  %v1661_v0 = vadd.s32 40, %v6206_v30  ;;  %v1662_v5 = vadd.s32 48, %v6206_v30  ;;  %v6255_v44 = vld [vmem:[#allocation79_spill] sm:$0xff] }
 0x1d1   : > { %v4274_v55 = vadd.s32 %v6222_v13, %v6206_v30  ;;  %vm5949_vm4 = vcmp.gt.f32.partialorder %v6255_v44, 0.0  ;;  %v1663_v6 = vadd.s32 56, %v6206_v30  ;;  %v4282_v18 = vadd.s32 %v6222_v13, %v1657_v45 }
 0x1d2   : > { %1332 = vadd.xlane.f32.xlu1 %v1331_v20  ;;  %v1335_v20 = vsel %vm5943_vm13, %v6252_v42, 1.0  ;;  %v4285_v23 = vadd.s32 %v6222_v13, %v1658_v34  ;;  %v1336_v40 = vsel %vm5945_vm14, %v6253_v31, 1.0  ;;  %vm5952_vm12 = vcmp.gt.f32.partialorder %v6256_v58, 0.0  ;;  %v6260_v31 = vld [vmem:[#allocation83_spill] sm:$0xff] }
 0x1d3   : > { %2838 = vrcp.f32 %v1334_v3  ;;  %v4292_v4 = vadd.s32 %v6222_v13, %v1659_v17  ;;  %v1337_v1 = vsel %vm5947_vm3, %v6254_v51, 1.0  ;;  %vm5954_vm13 = vcmp.gt.f32.partialorder %v6258_v25, 0.0  ;;  %v6261_v51 = vld [vmem:[#allocation84_spill] sm:$0xff] }
 0x1d4   : > { %2840 = vrcp.f32 %v1335_v20  ;;  %v4299_v45 = vadd.s32 %v6222_v13, %v1660_v29  ;;  %v1338_v34 = vsel %vm5949_vm4, %v6255_v44, 1.0  ;;  %vm5971_vm14 = vcmp.gt.f32.partialorder %v6260_v31, 0.0  ;;  %v6263_v44 = vld [vmem:[#allocation87_spill] sm:$0xff] }
 0x1d5   : > { %6257 = vst [vmem:[#allocation38_spill] sm:$0xff] %v4292_v4  ;;  %2842 = vrcp.f32 %v1336_v40  ;;  %v1339_v17 = vsel %vm5952_vm12, %v6256_v58, 1.0  ;;  %v1664_v3 = vadd.s32 64, %v6206_v30  ;;  %vm5969_vm3 = vcmp.gt.f32.partialorder %v6261_v51, 0.0 }
 0x1d6   : > { %6259 = vst [vmem:[#allocation75_spill] sm:$0xff] %v4299_v45  ;;  %2844 = vrcp.f32 %v1337_v1  ;;  %v1340_v29 = vsel %vm5954_vm13, %v6258_v25, 1.0  ;;  %v1665_v20 = vadd.s32 72, %v6206_v30  ;;  %v6262_v45 = vld [vmem:[#allocation86_spill] sm:$0xff]  ;;  %v1341_v40 = vsel %vm5971_vm14, %v6260_v31, 1.0 }
 0x1d7   : > { %vm5967_vm4 = vcmp.gt.f32.partialorder %v6262_v45, 0.0  ;;  %2846 = vrcp.f32 %v1338_v34  ;;  %v1666_v58 = vadd.s32 80, %v6206_v30  ;;  %vm5960_vm12 = vcmp.gt.f32.partialorder %v6263_v44, 0.0 }
 0x1d8   : > { %2848 = vrcp.f32 %v1339_v17  ;;  %v1342_v1 = vsel %vm5969_vm3, %v6261_v51, 1.0  ;;  %v1667_v25 = vadd.s32 88, %v6206_v30  ;;  %vm5962_vm13 = vcmp.gt.f32.partialorder %v6264_v47, 0.0 }
 0x1d9   : > { %v4326_v4 = vadd.s32 %v6222_v13, %v1661_v0  ;;  %v4329_v34 = vadd.s32 %v6222_v13, %v1662_v5  ;;  %2850 = vrcp.f32 %v1340_v29  ;;  %v1343_v31 = vsel %vm5967_vm4, %v6262_v45, 1.0 }
 0x1da   : > { %v4335_v17 = vadd.s32 %v6222_v13, %v1663_v6  ;;  %2852 = vrcp.f32 %v1341_v40  ;;  %v4338_v51 = vadd.s32 %v6222_v13, %v1664_v3  ;;  %v1344_v0 = vsel %vm5960_vm12, %v6263_v44, 1.0  ;;  %v6272_v3 = vld [vmem:[#allocation88_spill] sm:$0xff] }
 0x1db   : > { %6265 = vst [vmem:[#allocation76_spill] sm:$0xff] %v4326_v4  ;;  %6266 = vst [vmem:[#allocation157_spill] sm:$0xff] %v4329_v34  ;;  %2854 = vrcp.f32 %v1342_v1  ;;  %v4344_v5 = vadd.s32 %v6222_v13, %v1665_v20  ;;  %v4347_v29 = vadd.s32 %v6222_v13, %v1666_v58  ;;  %v1345_v6 = vsel %vm5962_vm13, %v6264_v47, 1.0 }
 0x1dc   : > { %6267 = vst [vmem:[#allocation158_spill] sm:$0xff] %v4335_v17  ;;  %6268 = vst [vmem:[#allocation159_spill] sm:$0xff] %v4338_v51  ;;  %2856 = vrcp.f32 %v1343_v31  ;;  %v4353_v40 = vadd.s32 %v6222_v13, %v1667_v25  ;;  %v1346_v45 = vsel %vm1154_vm1, %v6272_v3, 1.0  ;;  %v1672_v1 = vadd.s32 128, %v6206_v30  ;;  %v6273_v25 = vld [vmem:[#allocation95_spill] sm:$0xff] }
 0x1dd   : > { %6269 = vst [vmem:[#allocation160_spill] sm:$0xff] %v4344_v5  ;;  %6270 = vst [vmem:[#allocation161_spill] sm:$0xff] %v4347_v29  ;;  %v4359_v44 = vpop.eup %2838  ;;  %2858 = vrcp.f32 %v1344_v0  ;;  %v1347_v58 = vsel %vm1155_vm5, %v3803_v49, 1.0  ;;  %vm6015_vm12 = vcmp.gt.f32.partialorder %v3906_v10, 0.0  ;;  %v1673_v31 = vadd.s32 136, %v6206_v30 }
 0x1de   : > { %6271 = vst [vmem:[#allocation162_spill] sm:$0xff] %v4353_v40  ;;  %v4366_v20 = vpop.eup %2840  ;;  %2860 = vrcp.f32 %v1345_v6  ;;  %v1348_v3 = vsel %vm1156_vm6, %v6273_v25, 1.0  ;;  %vm6014_vm1 = vcmp.gt.f32.partialorder %v3967_v22, 0.0  ;;  %v1674_v47 = vadd.s32 144, %v6206_v30 }
 0x1df   : > { %v4373_v0 = vpop.eup %2842  ;;  %2862 = vrcp.f32 %v1346_v45  ;;  %vm6274_vm5 = vcmp.gt.f32.partialorder %v3878_v48, 0.0  ;;  %vm6013_vm13 = vcmp.gt.f32.partialorder %v3969_v32, 0.0  ;;  %v1675_v40 = vadd.s32 152, %v6206_v30 }
 0x1e0   : > { %v1349_v49 = vsel %vm6274_vm5, %v3878_v48, 1.0  ;;  %v4380_v6 = vpop.eup %2844  ;;  %2864 = vrcp.f32 %v1347_v58  ;;  %v4383_v25 = vadd.s32 %v6222_v13, %v1672_v1  ;;  %v1350_v29 = vsel %vm6015_vm12, %v3906_v10, 1.0 }
 0x1e1   : > { %vm5973_vm6 = vcmp.gt.f32.partialorder %v4024_v11, 0.0  ;;  %v4389_v45 = vpop.eup %2846  ;;  %2866 = vrcp.f32 %v1348_v3  ;;  %v4392_v48 = vadd.s32 %v6222_v13, %v1673_v31  ;;  %v1351_v5 = vsel %vm6014_vm1, %v3967_v22, 1.0 }
 0x1e2   : > { %vm5975_vm5 = vcmp.gt.f32.partialorder %v4026_v16, 0.0  ;;  %v4398_v1 = vpop.eup %2848  ;;  %2868 = vrcp.f32 %v1349_v49  ;;  %v4401_v58 = vadd.s32 %v6222_v13, %v1674_v47  ;;  %v1352_v51 = vsel %vm6013_vm13, %v3969_v32, 1.0  ;;  %v6307_v32 = vld [vmem:[#allocation13_spill] sm:$0xff] }
 0x1e3   : > { %vm6012_vm4 = vcmp.gt.f32.partialorder %v4077_v26, 0.0  ;;  %v4407_v31 = vpop.eup %2850  ;;  %2870 = vrcp.f32 %v1350_v29  ;;  %v1353_v3 = vsel %vm5973_vm6, %v4024_v11, 1.0  ;;  %v1676_v17 = vadd.s32 160, %v6206_v30 }
 0x1e4   : > { %6275 = vst [vmem:[#allocation88_spill] sm:$0xff] %v4407_v31  ;;  %vm5977_vm3 = vcmp.gt.f32.partialorder %v4079_v59, 0.0  ;;  %v4414_v49 = vpop.eup %2852  ;;  %2872 = vrcp.f32 %v1351_v5  ;;  %v1354_v47 = vsel %vm5975_vm5, %v4026_v16, 1.0  ;;  %v1677_v34 = vadd.s32 168, %v6206_v30 }
 0x1e5   : > { %6276 = vst [vmem:[#allocation95_spill] sm:$0xff] %v4414_v49  ;;  %vm6011_vm14 = vcmp.gt.f32.partialorder %v4129_v35, 0.0  ;;  %v4421_v29 = vpop.eup %2854  ;;  %2874 = vrcp.f32 %v1352_v51  ;;  %v4424_v31 = vadd.s32 %v6222_v13, %v1675_v40  ;;  %v1355_v11 = vsel %vm6012_vm4, %v4077_v26, 1.0 }
 0x1e6   : > { %6277 = vst [vmem:[#allocation163_spill] sm:$0xff] %v4421_v29  ;;  %vm5980_vm6 = vcmp.gt.f32.partialorder %v4131_v21, 0.0  ;;  %v4430_v5 = vpop.eup %2856  ;;  %2876 = vrcp.f32 %v1353_v3  ;;  %v1678_v16 = vadd.s32 176, %v6206_v30  ;;  %v1356_v49 = vsel %vm5977_vm3, %v4079_v59, 1.0 }
 0x1e7   : > { %6278 = vst [vmem:[#allocation164_spill] sm:$0xff] %v4430_v5  ;;  %vm5984_vm5 = vcmp.gt.f32.partialorder %v4175_v33, 0.0  ;;  %v4437_v51 = vpop.eup %2858  ;;  %v4440_v40 = vadd.s32 %v6222_v13, %v1676_v17  ;;  %2878 = vrcp.f32 %v1354_v47  ;;  %v1679_v26 = vadd.s32 184, %v6206_v30  ;;  %v4455_v17 = vpop.xlane.xlu0 %1137 }
 0x1e8   : > { %6279 = vst [vmem:[#allocation165_spill] sm:$0xff] %v4437_v51  ;;  %v1357_v3 = vsel %vm6011_vm14, %v4129_v35, 1.0  ;;  %v4446_v5 = vpop.eup %2860  ;;  %v4449_v29 = vadd.s32 %v6222_v13, %v1677_v34  ;;  %2880 = vrcp.f32 %v1355_v11  ;;  %v1358_v51 = vsel %vm5980_vm6, %v4131_v21, 1.0  ;;  %6283 = vst [vmem:[#allocation169_spill] sm:$0xff] %v4455_v17  ;;  %v4464_v11 = vpop.xlane.xlu1 %1140 }
 0x1e9   : > { %6280 = vst [vmem:[#allocation166_spill] sm:$0xff] %v4440_v40  ;;  %6281 = vst [vmem:[#allocation167_spill] sm:$0xff] %v4446_v5  ;;  %vm5987_vm3 = vcmp.gt.f32.partialorder %v4202_v41, 0.0  ;;  %v4457_v47 = vpop.eup %2862  ;;  %2882 = vrcp.f32 %v1356_v49  ;;  %v1680_v59 = vadd.s32 192, %v6206_v30  ;;  %v1681_v35 = vadd.s32 200, %v6206_v30 }
 0x1ea   : > { %6282 = vst [vmem:[#allocation168_spill] sm:$0xff] %v4449_v29  ;;  %6284 = vst [vmem:[#allocation170_spill] sm:$0xff] %v4457_v47  ;;  %v1359_v34 = vsel %vm5984_vm5, %v4175_v33, 1.0  ;;  %v4466_v5 = vpop.eup %2864  ;;  %2884 = vrcp.f32 %v1357_v3  ;;  %vm6287_vm6 = vcmp.gt.f32.partialorder %v4182_v46, 0.0  ;;  %v1683_v47 = vadd.s32 216, %v6206_v30 }
 0x1eb   : > { %6285 = vst [vmem:[#allocation171_spill] sm:$0xff] %v4464_v11  ;;  %6286 = vst [vmem:[#allocation172_spill] sm:$0xff] %v4466_v5  ;;  %v1360_v21 = vsel %vm6287_vm6, %v4182_v46, 1.0  ;;  %v1686_v49 = vadd.s32 240, %v6206_v30  ;;  %v4473_v29 = vpop.eup %2866  ;;  %2886 = vrcp.f32 %v1358_v51  ;;  %v1361_v33 = vsel %vm5987_vm3, %v4202_v41, 1.0 }
 0x1ec   : > { %6288 = vst [vmem:[#allocation173_spill] sm:$0xff] %v4473_v29  ;;  %vm6010_vm5 = vcmp.gt.f32.partialorder %v4455_v17, 0.0  ;;  %v1687_v5 = vadd.s32 248, %v6206_v30  ;;  %v4480_v3 = vpop.eup %2868  ;;  %v4483_v40 = vadd.s32 %v6222_v13, %v1678_v16  ;;  %2888 = vrcp.f32 %v1359_v34 }
 0x1ed   : > { %6289 = vst [vmem:[#allocation174_spill] sm:$0xff] %v4480_v3  ;;  %v1362_v46 = vsel %vm1170_vm0, %v4230_v39, 1.0  ;;  %vm6009_vm6 = vcmp.gt.f32.partialorder %v4464_v11, 0.0  ;;  %v4489_v51 = vpop.eup %2870  ;;  %v4492_v41 = vadd.s32 %v6222_v13, %v1679_v26  ;;  %v4495_v29 = vadd.s32 %v6222_v13, %v1680_v59  ;;  %v6350_v3 = vld [vmem:[#allocation96_spill] sm:$0xff] }
 0x1ee   : > { %6290 = vst [vmem:[#allocation175_spill] sm:$0xff] %v4483_v40  ;;  %2890 = vrcp.f32 %v1360_v21  ;;  %vm6293_vm3 = vcmp.gt.f32.partialorder %v4236_v50, 0.0  ;;  %v4500_v30 = vpop.eup %2872  ;;  %v4503_v34 = vadd.s32 %v6222_v13, %v1681_v35  ;;  %v4506_v39 = vadd.s32 %v6222_v13, %v1683_v47  ;;  %v6306_v40 = vld [vmem:[#allocation12_spill] sm:$0xff] }
 0x1ef   : > { %6291 = vst [vmem:[#allocation176_spill] sm:$0xff] %v4492_v41  ;;  %6292 = vst [vmem:[#allocation177_spill] sm:$0xff] %v4495_v29  ;;  %v1363_v16 = vsel %vm6293_vm3, %v4236_v50, 1.0  ;;  %2892 = vrcp.f32 %v1361_v33  ;;  %v1364_v26 = vsel %vm6010_vm5, %v4455_v17, 1.0  ;;  %v4511_v59 = vpop.eup %2874  ;;  %v4514_v21 = vadd.s32 %v6222_v13, %v1686_v49  ;;  %v6298_v33 = vld [vmem:[#allocation39_spill] sm:$0xff]  ;;  %v6301_v49 = vld [vmem:[#allocation42_spill] sm:$0xff] }
 0x1f0   : > { %6294 = vst [vmem:[#allocation178_spill] sm:$0xff] %v4503_v34  ;;  %6295 = vst [vmem:[#allocation179_spill] sm:$0xff] %v4506_v39  ;;  %2894 = vrcp.f32 %v1362_v46  ;;  %v4517_v50 = vadd.s32 %v6222_v13, %v1687_v5  ;;  %v1365_v35 = vsel %vm6009_vm6, %v4464_v11, 1.0  ;;  %v4522_v47 = vpop.eup %2876  ;;  %v6299_v39 = vld [vmem:[#allocation40_spill] sm:$0xff]  ;;  %v6300_v34 = vld [vmem:[#allocation41_spill] sm:$0xff]  ;;  %vm1721_vm0 = vcmp.lt.s32.totalorder %v4274_v55, 320 }
 0x1f1   : > { %6296 = vst [vmem:[#allocation180_spill] sm:$0xff] %v4514_v21  ;;  %2896 = vrcp.f32 %v1363_v16  ;;  %v4527_v46 = vpop.eup %2878  ;;  %v6304_v13 = vld [vmem:[#allocation11_spill] sm:$0xff]  ;;  %vm1722_vm3 = vcmp.lt.s32.totalorder %v4282_v18, 320  ;;  %v6348_v29 = vld [vmem:[#allocation62_spill] sm:$0xff]  ;;  %vm1737_vm6 = vcmp.lt.s32.totalorder %v4383_v25, 320  ;;  %v1460_v63 = vsub.f32 1.0, %v6238_v57 }
 0x1f2   : > { %6297 = vst [vmem:[#allocation181_spill] sm:$0xff] %v4517_v50  ;;  %2898 = vrcp.f32 %v1364_v26  ;;  %v4532_v50 = vpop.eup %2880  ;;  %vm6354_vm5 = vcmp.gt.f32.partialorder %v6251_v52, 0.0  ;;  %vm6358_vm13 = vcmp.gt.f32.partialorder %v6252_v42, 0.0  ;;  %v6386_v55 = vsub.f32 1.0, %v3472_v38  ;;  %v6388_v25 = vld [vmem:[#allocation103_spill] sm:$0xff] }
 0x1f3   : > { %6302 = vst [vmem:[#allocation39_spill] sm:$0xff] %v4532_v50  ;;  %2900 = vrcp.f32 %v1365_v35  ;;  %v4537_v11 = vpop.eup %2882  ;;  %v6339_v35 = vld [vmem:[#allocation59_spill] sm:$0xff]  ;;  %vm4627_vm14 = vmand %vm6354_vm5, %vm1721_vm0 }
 0x1f4   : > { %6303 = vst [vmem:[#allocation40_spill] sm:$0xff] %v4537_v11  ;;  %v4543_v5 = vpop.eup %2884  ;;  %v6309_v11 = vld [vmem:[#allocation14_spill] sm:$0xff]  ;;  %vm4639_vm1 = vmand %vm6358_vm13, %vm1722_vm3  ;;  %vm1738_vm3 = vcmp.lt.s32.totalorder %v4392_v48, 320  ;;  %v6413_v48 = vsub.f32 1.0, %v3589_v36  ;;  %v6444_v38 = vld [vmem:[#allocation95_spill] sm:$0xff] }
 0x1f5   : > { %6305 = vst [vmem:[#allocation41_spill] sm:$0xff] %v4543_v5  ;;  %v4549_v4 = vpop.eup %2886 }
 0x1f6   : > { %6308 = vst [vmem:[#allocation42_spill] sm:$0xff] %v4549_v4  ;;  %v4555_v50 = vpop.eup %2888 }
 0x1f7   : > { %6310 = vst [vmem:[#allocation11_spill] sm:$0xff] %v4555_v50  ;;  %v6351_v50 = vld [vmem:[#allocation98_spill] sm:$0xff] }
 0x1f8   : > { %v4561_v5 = vpop.eup %2890 }
 0x1f9   : > { %6311 = vst [vmem:[#allocation12_spill] sm:$0xff] %v4561_v5  ;;  %v4567_v61 = vpop.eup %2892 }
 0x1fa   : > { %6316 = vst [vmem:[#allocation13_spill] sm:$0xff] %v4567_v61  ;;  %v4574_v12 = vpop.eup %2894 }
 0x1fb   : > { %6321 = vst [vmem:[#allocation14_spill] sm:$0xff] %v4574_v12  ;;  %v4581_v4 = vpop.eup %2896 }
 0x1fc   : > { %6326 = vst [vmem:[#allocation182_spill] sm:$0xff] %v4581_v4  ;;  %v4587_v2 = vpop.eup %2898 }
 0x1fd   : > { %6331 = vst [vmem:[#allocation183_spill] sm:$0xff] %v4587_v2  ;;  %v4593_v4 = vpop.eup %2900 }
 0x1fe   : > { %6335 = vst [vmem:[#allocation184_spill] sm:$0xff] %v4593_v4  ;;  %v6343_v4 = vld [vmem:[#allocation34_spill] sm:$0xff] }
 0x21e   : > { %v1240_v16 = vpop.xlane.xlu0 %1239 }
 0x21f   : > { %v1367_v21 = vmul.f32 %v4359_v44, %v1240_v16  ;;  %v1243_v26 = vpop.xlane.xlu1 %1242  ;;  %v1488_v16 = vsub.f32 1.0, %v6348_v29 }
 0x220   : > { %v1369_v44 = vmul.f32 %v4366_v20, %v1243_v26 }
 0x221   : > { %v1494_v2 = vsub.f32 1.0, %v1367_v21 }
 0x222   : > { %v1288_v61 = vpop.xlane.xlu0 %1287  ;;  %v1495_v21 = vsub.f32 1.0, %v1369_v44  ;;  %v6353_v44 = vsub.f32 1.0, %v6306_v40 }
 0x223   : > { %v1526_v5 = vadd.f32 %v1494_v2, %v6346_v15  ;;  %v1527_v12 = vadd.f32 %v1494_v2, %v6347_v9  ;;  %v1399_v20 = vmul.f32 %v4489_v51, %v1288_v61  ;;  %v1291_v26 = vpop.xlane.xlu1 %1290  ;;  %v6352_v61 = vsub.f32 1.0, %v6304_v13 }
 0x224   : > { %v1528_v17 = vadd.f32 %v1495_v21, %v6350_v3  ;;  %v1529_v15 = vadd.f32 %v1495_v21, %v6351_v50  ;;  %v1401_v9 = vmul.f32 %v4500_v30, %v1291_v26  ;;  %v6357_v30 = vld [vmem:[#allocation92_spill] sm:$0xff]  ;;  %v6362_v26 = vld [vmem:[#allocation38_spill] sm:$0xff] }
 0x225   : > { %v1510_v60 = vsub.f32 1.0, %v1399_v20  ;;  %v1590_v51 = vmul.f32 %v1526_v5, %v6352_v61  ;;  %v1591_v41 = vmul.f32 %v1527_v12, %v6353_v44  ;;  %v6361_v5 = vsub.f32 1.0, %v6307_v32  ;;  %v6365_v61 = vld [vmem:[#allocation99_spill] sm:$0xff]  ;;  %v6373_v3 = vld [vmem:[#allocation102_spill] sm:$0xff] }
 0x226   : > { %v1246_v2 = vpop.xlane.xlu0 %1245  ;;  %v1511_v13 = vsub.f32 1.0, %v1401_v9 }
 0x227   : > { %v1558_v50 = vadd.f32 %v1510_v60, %v6357_v30  ;;  %v1371_v40 = vmul.f32 %v4373_v0, %v1246_v2  ;;  %vm1785_vm5 = vcmp.gt.f32.partialorder %v1590_v51, 0.0  ;;  %vm1786_vm0 = vcmp.gt.f32.partialorder %v1591_v41, 0.0  ;;  %v6363_v0 = vld [vmem:[#allocation94_spill] sm:$0xff]  ;;  %v6364_v2 = vld [vmem:[#allocation97_spill] sm:$0xff] }
 0x228   : > { %v1249_v52 = vpop.xlane.xlu1 %1248  ;;  %v1592_v21 = vmul.f32 %v1528_v17, %v6361_v5  ;;  %v1559_v9 = vadd.f32 %v1510_v60, %v6363_v0  ;;  %v1560_v18 = vadd.f32 %v1511_v13, %v6364_v2  ;;  %v1561_v42 = vadd.f32 %v1511_v13, %v6365_v61  ;;  %vm4652_vm13 = vmand %vm4627_vm14, %vm1785_vm5  ;;  %v6374_v61 = vld [vmem:[#allocation104_spill] sm:$0xff] }
 0x229   : > { %v6368_v30 = vsub.f32 1.0, %v6309_v11  ;;  %v1496_v17 = vsub.f32 1.0, %v1371_v40  ;;  %v1373_v5 = vmul.f32 %v4380_v6, %v1249_v52  ;;  %vm1914_vm4 = vmand %vm4627_vm14, %vm1786_vm0  ;;  %v1977_v60 = vsel %vm4652_vm13, %v1590_v51, 0.0  ;;  %v6372_v6 = vld [vmem:[#allocation66_spill] sm:$0xff] }
 0x22a   : > { %v1294_v20 = vpop.xlane.xlu0 %1293  ;;  %vm1787_vm12 = vcmp.gt.f32.partialorder %v1592_v21, 0.0  ;;  %v6369_v13 = vsub.f32 1.0, %v6298_v33  ;;  %v1978_v11 = vsel %vm1914_vm4, %v1591_v41, 0.0  ;;  %v6377_v40 = vsub.f32 1.0, %v6300_v34  ;;  %v6381_v34 = vld [vmem:[#allocation106_spill] sm:$0xff] }
 0x22b   : > { %v1593_v32 = vmul.f32 %v1529_v15, %v6368_v30  ;;  %v1403_v2 = vmul.f32 %v4511_v59, %v1294_v20  ;;  %vm4669_vm5 = vmand %vm4639_vm1, %vm1787_vm12  ;;  %v1530_v52 = vadd.f32 %v1496_v17, %v6373_v3  ;;  %v1531_v44 = vadd.f32 %v1496_v17, %v6374_v61  ;;  %v6375_v59 = vld [vmem:[#allocation67_spill] sm:$0xff] }
 0x22c   : > { %v1622_v0 = vmul.f32 %v1558_v50, %v6369_v13  ;;  %v1497_v51 = vsub.f32 1.0, %v1373_v5  ;;  %v1297_v30 = vpop.xlane.xlu1 %1296  ;;  %v2041_v12 = vadd.f32 %v1978_v11, %v1977_v60  ;;  %v1493_v50 = vsub.f32 1.0, %v6375_v59 }
 0x22d   : > { %v1512_v33 = vsub.f32 1.0, %v1403_v2  ;;  %v1405_v41 = vmul.f32 %v4522_v47, %v1297_v30  ;;  %vm1788_vm4 = vcmp.gt.f32.partialorder %v1593_v32, 0.0  ;;  %v6376_v20 = vsub.f32 1.0, %v6299_v39 }
 0x22e   : > { %v4683_v62 = vmul.f32 %v1560_v18, %v6377_v40  ;;  %v6378_v17 = vsub.f32 1.0, %v6301_v49  ;;  %2042 = vadd.xlane.f32.xlu0 %v2041_v12  ;;  %vm4691_vm12 = vmand %vm4639_vm1, %vm1788_vm4  ;;  %v1979_v39 = vsel %vm4669_vm5, %v1592_v21, 0.0  ;;  %v6382_v18 = vld [vmem:[#allocation108_spill] sm:$0xff]  ;;  %vm6383_vm13 = vcmp.gt.f32.partialorder %v3906_v10, 0.0  ;;  %v6389_v10 = vld [vmem:[#allocation105_spill] sm:$0xff] }
 0x22f   : > { %v1623_v13 = vmul.f32 %v1559_v9, %v6376_v20  ;;  %v1252_v60 = vpop.xlane.xlu0 %1251  ;;  %v1532_v9 = vadd.f32 %v1497_v51, %v6381_v34  ;;  %v1533_v2 = vadd.f32 %v1497_v51, %v6382_v18  ;;  %v1513_v49 = vsub.f32 1.0, %v1405_v41  ;;  %vm4705_vm1 = vmand %vm6383_vm13, %vm1737_vm6  ;;  %v6390_v51 = vld [vmem:[#allocation107_spill] sm:$0xff]  ;;  %v6391_v41 = vld [vmem:[#allocation109_spill] sm:$0xff] }
 0x230   : > { %v4687_v5 = vmul.f32 %v1561_v42, %v6378_v17  ;;  %v1375_v42 = vmul.f32 %v4389_v45, %v1252_v60  ;;  %v4711_v21 = vmul.f32 %v1530_v52, %v6386_v55  ;;  %v6387_v11 = vsub.f32 1.0, %v3474_v43  ;;  %v1255_v45 = vpop.xlane.xlu1 %1254  ;;  %v6395_v43 = vld [vmem:[#allocation77_spill] sm:$0xff] }
 0x231   : > { %v1980_v40 = vsel %vm4691_vm12, %v1593_v32, 0.0  ;;  %vm1817_vm5 = vcmp.gt.f32.partialorder %v1622_v0, 0.0  ;;  %v1562_v3 = vadd.f32 %v1512_v33, %v6388_v25  ;;  %v1563_v61 = vadd.f32 %v1512_v33, %v6389_v10  ;;  %v6415_v10 = vld [vmem:[#allocation43_spill] sm:$0xff] }
 0x232   : > { %v4715_v15 = vmul.f32 %v1531_v44, %v6387_v11  ;;  %v1564_v30 = vadd.f32 %v1513_v49, %v6390_v51  ;;  %v1565_v20 = vadd.f32 %v1513_v49, %v6391_v41  ;;  %vm4725_vm6 = vmand %vm4705_vm1, %vm1817_vm5  ;;  %vm6394_vm4 = vcmp.lt.s32.totalorder %v4285_v23, 320  ;;  %v6411_v11 = vld [vmem:[#allocation75_spill] sm:$0xff] }
 0x233   : > { %vm6396_vm12 = vcmp.gt.f32.partialorder %v6395_v43, 0.0  ;;  %v1498_v52 = vsub.f32 1.0, %v1375_v42  ;;  %v2044_v44 = vadd.f32 %v1980_v40, %v1979_v39  ;;  %v1377_v33 = vmul.f32 %v4398_v1, %v1255_v45  ;;  %v1300_v17 = vpop.xlane.xlu0 %1299  ;;  %v6402_v1 = vld [vmem:[#allocation78_spill] sm:$0xff] }
 0x234   : > { %vm4733_vm13 = vmand %vm6396_vm12, %vm6394_vm4  ;;  %vm1818_vm0 = vcmp.gt.f32.partialorder %v1623_v13, 0.0  ;;  %v6399_v60 = vsub.f32 1.0, %v3478_v54  ;;  %v6400_v34 = vsub.f32 1.0, %v3480_v56  ;;  %v2009_v23 = vsel %vm4725_vm6, %v1622_v0, 0.0  ;;  %v1303_v55 = vpop.xlane.xlu1 %1302  ;;  %v6485_v54 = vld [vmem:[#allocation121_spill] sm:$0xff] }
 0x235   : > { %vm1946_vm5 = vmand %vm4705_vm1, %vm1818_vm0  ;;  %v1407_v39 = vmul.f32 %v4527_v46, %v1300_v17  ;;  %vm6401_vm4 = vcmp.lt.s32.totalorder %v6362_v26, 320  ;;  %vm6403_vm12 = vcmp.gt.f32.partialorder %v6402_v1, 0.0  ;;  %2045 = vadd.xlane.f32.xlu1 %v2044_v44  ;;  %v1499_v42 = vsub.f32 1.0, %v1377_v33  ;;  %v6424_v33 = vld [vmem:[#allocation76_spill] sm:$0xff]  ;;  %v6426_v17 = vld [vmem:[#allocation119_spill] sm:$0xff] }
 0x236   : > { %v4740_v47 = vmul.f32 %v1532_v9, %v6399_v60  ;;  %v4744_v18 = vmul.f32 %v1533_v2, %v6400_v34  ;;  %vm4755_vm14 = vmand %vm6403_vm12, %vm6401_vm4  ;;  %v6406_v9 = vld [vmem:[#allocation111_spill] sm:$0xff]  ;;  %v6407_v2 = vld [vmem:[#allocation113_spill] sm:$0xff]  ;;  %v2010_v12 = vsel %vm1946_vm5, %v1623_v13, 0.0  ;;  %vm6408_vm0 = vcmp.gt.f32.partialorder %v3967_v22, 0.0 }
 0x237   : > { %v1534_v56 = vadd.f32 %v1498_v52, %v6406_v9  ;;  %v1535_v49 = vadd.f32 %v1498_v52, %v6407_v2  ;;  %vm4765_vm1 = vmand %vm6408_vm0, %vm1738_vm3  ;;  %v2089_v26 = vadd.f32 %v2010_v12, %v2009_v23  ;;  %v1514_v0 = vsub.f32 1.0, %v1407_v39  ;;  %v6430_v34 = vld [vmem:[#allocation115_spill] sm:$0xff]  ;;  %v6431_v39 = vld [vmem:[#allocation117_spill] sm:$0xff] }
 0x238   : > { %vm1819_vm6 = vcmp.gt.f32.partialorder %v4683_v62, 0.0  ;;  %vm1820_vm4 = vcmp.gt.f32.partialorder %v4687_v5, 0.0  ;;  %v6412_v40 = vsub.f32 1.0, %v3587_v27  ;;  %v4778_v45 = vmul.f32 %v1563_v61, %v6413_v48  ;;  %v1258_v27 = vpop.xlane.xlu0 %1257  ;;  %v6421_v61 = vld [vmem:[#allocation16_spill] sm:$0xff] }
 0x239   : > { %v6414_v22 = vsub.f32 1.0, %v3593_v53  ;;  %v6416_v51 = vsub.f32 1.0, %v6415_v10  ;;  %vm4790_vm3 = vmand %vm4765_vm1, %vm1819_vm6  ;;  %v6422_v52 = vsub.f32 1.0, %v6421_v61  ;;  %2090 = vadd.xlane.f32.xlu0 %v2089_v26  ;;  %vm6425_vm6 = vcmp.lt.s32.totalorder %v4401_v58, 320  ;;  %v6443_v10 = vld [vmem:[#allocation118_spill] sm:$0xff]  ;;  %v6467_v60 = vld [vmem:[#allocation120_spill] sm:$0xff] }
 0x23a   : > { %v4774_v13 = vmul.f32 %v1562_v3, %v6412_v40  ;;  %v6419_v3 = vld [vmem:[#allocation15_spill] sm:$0xff]  ;;  %vm1948_vm5 = vmand %vm4765_vm1, %vm1820_vm4  ;;  %vm6427_vm12 = vcmp.gt.f32.partialorder %v6426_v17, 0.0  ;;  %v1536_v23 = vadd.f32 %v1499_v42, %v6430_v34  ;;  %v1537_v1 = vadd.f32 %v1499_v42, %v6431_v39  ;;  %v6437_v42 = vld [vmem:[#allocation68_spill] sm:$0xff] }
 0x23b   : > { %v4782_v25 = vmul.f32 %v1564_v30, %v6414_v22  ;;  %v4786_v41 = vmul.f32 %v1565_v20, %v6416_v51  ;;  %v6420_v43 = vsub.f32 1.0, %v6419_v3  ;;  %v4800_v53 = vmul.f32 %v1535_v49, %v6422_v52  ;;  %v6423_v20 = vld [vmem:[#allocation39_spill] sm:$0xff]  ;;  %vm4813_vm11 = vmand %vm6427_vm12, %vm6425_vm6  ;;  %v6433_v49 = vld [vmem:[#allocation114_spill] sm:$0xff] }
 0x23c   : > { %v2011_v30 = vsel %vm4790_vm3, %v4683_v62, 0.0  ;;  %v1409_v44 = vmul.f32 %v6423_v20, %v1303_v55  ;;  %v2012_v9 = vsel %vm1948_vm5, %v4687_v5, 0.0  ;;  %vm1789_vm1 = vcmp.gt.f32.partialorder %v4711_v21, 0.0  ;;  %v1261_v62 = vpop.xlane.xlu1 %1260  ;;  %v1306_v48 = vpop.xlane.xlu0 %1305  ;;  %v6442_v22 = vld [vmem:[#allocation116_spill] sm:$0xff]  ;;  %v6451_v17 = vld [vmem:[#allocation18_spill] sm:$0xff] }
 0x23d   : > { %v4796_v36 = vmul.f32 %v1534_v56, %v6420_v43  ;;  %v6432_v56 = vld [vmem:[#allocation112_spill] sm:$0xff]  ;;  %v1567_v12 = vadd.f32 %v1514_v0, %v6433_v49  ;;  %v2092_v58 = vadd.f32 %v2012_v9, %v2011_v30  ;;  %vm4825_vm4 = vmand %vm4733_vm13, %vm1789_vm1  ;;  %vm6436_vm12 = vcmp.lt.s32.totalorder %v4424_v31, 320  ;;  %v6445_v43 = vld [vmem:[#allocation157_spill] sm:$0xff] }
 0x23e   : > { %v1566_v2 = vadd.f32 %v1514_v0, %v6432_v56  ;;  %v1515_v55 = vsub.f32 1.0, %v1409_v44  ;;  %vm6438_vm3 = vcmp.gt.f32.partialorder %v6437_v42, 0.0  ;;  %vm1790_vm6 = vcmp.gt.f32.partialorder %v4715_v15, 0.0  ;;  %v6441_v0 = vld [vmem:[#allocation88_spill] sm:$0xff]  ;;  %v6449_v30 = vld [vmem:[#allocation17_spill] sm:$0xff] }
 0x23f   : > { %vm4833_vm5 = vmand %vm6438_vm3, %vm6436_vm12  ;;  %v1981_v26 = vsel %vm4825_vm4, %v4711_v21, 0.0  ;;  %v1379_v40 = vmul.f32 %v6441_v0, %v1258_v27  ;;  %vm1791_vm1 = vcmp.gt.f32.partialorder %v4740_v47, 0.0  ;;  %2093 = vadd.xlane.f32.xlu1 %v2092_v58  ;;  %vm1792_vm3 = vcmp.gt.f32.partialorder %v4744_v18, 0.0  ;;  %v6446_v21 = vld [vmem:[#allocation166_spill] sm:$0xff]  ;;  %v6454_v56 = vld [vmem:[#allocation44_spill] sm:$0xff] }
 0x240   : > { %v1568_v31 = vadd.f32 %v1515_v55, %v6442_v22  ;;  %v1569_v51 = vadd.f32 %v1515_v55, %v6443_v10  ;;  %vm1918_vm12 = vmand %vm4733_vm13, %vm1790_vm6  ;;  %v1381_v3 = vmul.f32 %v6444_v38, %v1261_v62  ;;  %vm1727_vm0 = vcmp.lt.s32.totalorder %v6445_v43, 320  ;;  %v1309_v32 = vpop.xlane.xlu1 %1308  ;;  %v6453_v62 = vld [vmem:[#allocation168_spill] sm:$0xff]  ;;  %v6465_v38 = vld [vmem:[#allocation47_spill] sm:$0xff] }
 0x241   : > { %vm1741_vm4 = vcmp.lt.s32.totalorder %v6446_v21, 320  ;;  %v1982_v27 = vsel %vm1918_vm12, %v4715_v15, 0.0  ;;  %v1500_v61 = vsub.f32 1.0, %v1379_v40  ;;  %vm4854_vm8 = vmand %vm4755_vm14, %vm1791_vm1  ;;  %vm1821_vm10 = vcmp.gt.f32.partialorder %v4774_v13, 0.0  ;;  %v6463_v40 = vld [vmem:[#allocation46_spill] sm:$0xff]  ;;  %v6513_v21 = vld [vmem:[#allocation49_spill] sm:$0xff] }
 0x242   : > { %vm1822_vm13 = vcmp.gt.f32.partialorder %v4778_v45, 0.0  ;;  %v6450_v20 = vsub.f32 1.0, %v6449_v30  ;;  %v6452_v34 = vsub.f32 1.0, %v6451_v17  ;;  %v2047_v15 = vadd.f32 %v1982_v27, %v1981_v26  ;;  %vm1920_vm6 = vmand %vm4755_vm14, %vm1792_vm3  ;;  %v6468_v30 = vld [vmem:[#allocation122_spill] sm:$0xff] }
 0x243   : > { %v1983_v9 = vsel %vm4854_vm8, %v4740_v47, 0.0  ;;  %vm1742_vm1 = vcmp.lt.s32.totalorder %v6453_v62, 320  ;;  %v6455_v49 = vsub.f32 1.0, %v6454_v56  ;;  %v1501_v42 = vsub.f32 1.0, %v1381_v3  ;;  %vm4885_vm14 = vmand %vm4813_vm11, %vm1821_vm10  ;;  %v1264_v47 = vpop.xlane.xlu0 %1263  ;;  %v6523_v62 = vld [vmem:[#allocation129_spill] sm:$0xff] }
 0x244   : > { %v4862_v44 = vmul.f32 %v1536_v23, %v6450_v20  ;;  %v4866_v39 = vmul.f32 %v1537_v1, %v6452_v34  ;;  %v6456_v23 = vld [vmem:[#allocation45_spill] sm:$0xff]  ;;  %v1984_v1 = vsel %vm1920_vm6, %v4744_v18, 0.0  ;;  %2048 = vadd.xlane.f32.xlu0 %v2047_v15  ;;  %vm4893_vm8 = vmand %vm4813_vm11, %vm1822_vm13  ;;  %v2013_v18 = vsel %vm4885_vm14, %v4774_v13, 0.0  ;;  %v1267_v34 = vpop.xlane.xlu1 %1266 }
 0x245   : > { %v4876_v58 = vmul.f32 %v1566_v2, %v6455_v49  ;;  %v6457_v55 = vsub.f32 1.0, %v6456_v23  ;;  %v2050_v26 = vadd.f32 %v1984_v1, %v1983_v9  ;;  %vm1823_vm10 = vcmp.gt.f32.partialorder %v4782_v25, 0.0  ;;  %v6477_v9 = vld [vmem:[#allocation126_spill] sm:$0xff]  ;;  %v6478_v23 = vld [vmem:[#allocation41_spill] sm:$0xff]  ;;  %v6486_v2 = vld [vmem:[#allocation123_spill] sm:$0xff] }
 0x246   : > { %v6464_v22 = vsub.f32 1.0, %v6463_v40  ;;  %v6466_v3 = vsub.f32 1.0, %v6465_v38  ;;  %v1538_v52 = vadd.f32 %v1500_v61, %v6467_v60  ;;  %v1539_v20 = vadd.f32 %v1500_v61, %v6468_v30  ;;  %vm4914_vm11 = vmand %vm4833_vm5, %vm1823_vm10  ;;  %v6490_v40 = vld [vmem:[#allocation163_spill] sm:$0xff]  ;;  %v6493_v60 = vld [vmem:[#allocation20_spill] sm:$0xff] }
 0x247   : > { %v4880_v46 = vmul.f32 %v1567_v12, %v6457_v55  ;;  %v6462_v12 = vld [vmem:[#allocation40_spill] sm:$0xff]  ;;  %vm6471_vm12 = vcmp.lt.s32.totalorder %v6411_v11, 320  ;;  %2051 = vadd.xlane.f32.xlu1 %v2050_v26  ;;  %vm1824_vm6 = vcmp.gt.f32.partialorder %v4786_v41, 0.0  ;;  %v2015_v17 = vsel %vm4914_vm11, %v4782_v25, 0.0  ;;  %v6484_v25 = vld [vmem:[#allocation158_spill] sm:$0xff]  ;;  %v1312_v5 = vpop.xlane.xlu0 %1311  ;;  %v6491_v38 = vld [vmem:[#allocation19_spill] sm:$0xff] }
 0x248   : > { %v1411_v0 = vmul.f32 %v6462_v12, %v1306_v48  ;;  %v4904_v10 = vmul.f32 %v1568_v31, %v6464_v22  ;;  %v4908_v27 = vmul.f32 %v1569_v51, %v6466_v3  ;;  %v6472_v48 = vld [vmem:[#allocation79_spill] sm:$0xff]  ;;  %v2014_v51 = vsel %vm4893_vm8, %v4778_v45, 0.0  ;;  %v6476_v11 = vld [vmem:[#allocation124_spill] sm:$0xff]  ;;  %vm1952_vm14 = vmand %vm4833_vm5, %vm1824_vm6 }
 0x249   : > { %vm6473_vm3 = vcmp.gt.f32.partialorder %v6472_v48, 0.0  ;;  %v1540_v15 = vadd.f32 %v1501_v42, %v6476_v11  ;;  %v1541_v56 = vadd.f32 %v1501_v42, %v6477_v9  ;;  %v2095_v49 = vadd.f32 %v2014_v51, %v2013_v18  ;;  %v6480_v45 = vld [vmem:[#allocation80_spill] sm:$0xff]  ;;  %v6495_v51 = vld [vmem:[#allocation21_spill] sm:$0xff] }
 0x24a   : > { %vm4922_vm13 = vmand %vm6473_vm3, %vm6471_vm12  ;;  %v1516_v61 = vsub.f32 1.0, %v1411_v0  ;;  %v1413_v55 = vmul.f32 %v6478_v23, %v1309_v32  ;;  %vm6479_vm8 = vcmp.lt.s32.totalorder %v6424_v33, 320  ;;  %vm6481_vm10 = vcmp.gt.f32.partialorder %v6480_v45, 0.0  ;;  %v6487_v32 = vld [vmem:[#allocation175_spill] sm:$0xff] }
 0x24b   : > { %vm4942_vm12 = vmand %vm6481_vm10, %vm6479_vm8  ;;  %vm1728_vm11 = vcmp.lt.s32.totalorder %v6484_v25, 320  ;;  %v2016_v18 = vsel %vm1952_vm14, %v4786_v41, 0.0  ;;  %vm1793_vm5 = vcmp.gt.f32.partialorder %v4796_v36, 0.0  ;;  %2096 = vadd.xlane.f32.xlu0 %v2095_v49  ;;  %vm1794_vm6 = vcmp.gt.f32.partialorder %v4800_v53, 0.0  ;;  %v1270_v1 = vpop.xlane.xlu0 %1269  ;;  %v6530_v49 = vld [vmem:[#allocation50_spill] sm:$0xff]  ;;  %v6585_v25 = vld [vmem:[#allocation13_spill] sm:$0xff] }
 0x24c   : > { %v1570_v26 = vadd.f32 %v1516_v61, %v6485_v54  ;;  %v1571_v42 = vadd.f32 %v1516_v61, %v6486_v2  ;;  %v2098_v33 = vadd.f32 %v2016_v18, %v2015_v17  ;;  %v1517_v12 = vsub.f32 1.0, %v1413_v55  ;;  %vm4955_vm8 = vmand %vm4922_vm13, %vm1793_vm5  ;;  %v6497_v17 = vld [vmem:[#allocation22_spill] sm:$0xff]  ;;  %v6510_v55 = vld [vmem:[#allocation164_spill] sm:$0xff]  ;;  %v1315_v54 = vpop.xlane.xlu1 %1314 }
 0x24d   : > { %v1383_v22 = vmul.f32 %v6490_v40, %v1264_v47  ;;  %v6492_v41 = vsub.f32 1.0, %v6491_v38  ;;  %v6494_v30 = vsub.f32 1.0, %v6493_v60  ;;  %vm1922_vm14 = vmand %vm4922_vm13, %vm1794_vm6  ;;  %v1985_v48 = vsel %vm4955_vm8, %v4796_v36, 0.0  ;;  %v6501_v36 = vld [vmem:[#allocation81_spill] sm:$0xff]  ;;  %v6511_v2 = vld [vmem:[#allocation48_spill] sm:$0xff] }
 0x24e   : > { %vm1795_vm10 = vcmp.gt.f32.partialorder %v4862_v44, 0.0  ;;  %v6496_v61 = vsub.f32 1.0, %v6495_v51  ;;  %2099 = vadd.xlane.f32.xlu1 %v2098_v33  ;;  %vm6502_vm5 = vcmp.gt.f32.partialorder %v6501_v36, 0.0  ;;  %v1385_v45 = vmul.f32 %v6510_v55, %v1267_v34  ;;  %v6526_v36 = vld [vmem:[#allocation133_spill] sm:$0xff] }
 0x24f   : > { %v4962_v3 = vmul.f32 %v1538_v52, %v6492_v41  ;;  %v4966_v13 = vmul.f32 %v1539_v20, %v6494_v30  ;;  %v6498_v52 = vsub.f32 1.0, %v6497_v17  ;;  %v1986_v20 = vsel %vm1922_vm14, %v4800_v53, 0.0  ;;  %vm4985_vm13 = vmand %vm4942_vm12, %vm1795_vm10  ;;  %v6506_v53 = vld [vmem:[#allocation128_spill] sm:$0xff]  ;;  %v6516_v41 = vld [vmem:[#allocation127_spill] sm:$0xff] }
 0x250   : > { %v4976_v47 = vmul.f32 %v1540_v15, %v6496_v61  ;;  %v1502_v9 = vsub.f32 1.0, %v1383_v22  ;;  %vm4993_vm6 = vmand %vm6502_vm5, %vm1727_vm0  ;;  %vm6507_vm14 = vcmp.gt.f32.partialorder %v6506_v53, 0.0  ;;  %v2053_v23 = vadd.f32 %v1986_v20, %v1985_v48  ;;  %v6515_v22 = vld [vmem:[#allocation125_spill] sm:$0xff]  ;;  %v6524_v17 = vld [vmem:[#allocation42_spill] sm:$0xff] }
 0x251   : > { %v4980_v11 = vmul.f32 %v1541_v56, %v6498_v52  ;;  %v6505_v56 = vld [vmem:[#allocation159_spill] sm:$0xff]  ;;  %vm5002_vm3 = vmand %vm6507_vm14, %vm1741_vm4  ;;  %vm1796_vm10 = vcmp.gt.f32.partialorder %v4866_v39, 0.0  ;;  %v1987_v43 = vsel %vm4985_vm13, %v4862_v44, 0.0  ;;  %v6512_v18 = vsub.f32 1.0, %v6511_v2  ;;  %v6517_v44 = vld [vmem:[#allocation69_spill] sm:$0xff] }
 0x252   : > { %v6514_v0 = vsub.f32 1.0, %v6513_v21  ;;  %v1572_v38 = vadd.f32 %v1517_v12, %v6515_v22  ;;  %v1573_v60 = vadd.f32 %v1517_v12, %v6516_v41  ;;  %vm1924_vm0 = vmand %vm4942_vm12, %vm1796_vm10  ;;  %vm6518_vm4 = vcmp.gt.f32.partialorder %v6517_v44, 0.0  ;;  %2054 = vadd.xlane.f32.xlu0 %v2053_v23  ;;  %v6522_v12 = vld [vmem:[#allocation71_spill] sm:$0xff]  ;;  %v1273_v22 = vpop.xlane.xlu1 %1272  ;;  %v6538_v41 = vld [vmem:[#allocation160_spill] sm:$0xff] }
 0x253   : > { %v5013_v33 = vmul.f32 %v1570_v26, %v6512_v18  ;;  %vm5027_vm13 = vmand %vm6518_vm4, %vm1742_vm1  ;;  %v6521_v26 = vld [vmem:[#allocation176_spill] sm:$0xff]  ;;  %v1503_v30 = vsub.f32 1.0, %v1385_v45  ;;  %vm1825_vm14 = vcmp.gt.f32.partialorder %v4876_v58, 0.0  ;;  %vm1826_vm8 = vcmp.gt.f32.partialorder %v4880_v46, 0.0  ;;  %v6525_v20 = vld [vmem:[#allocation131_spill] sm:$0xff] }
 0x254   : > { %v5017_v40 = vmul.f32 %v1571_v42, %v6514_v0  ;;  %v1988_v42 = vsel %vm1924_vm0, %v4866_v39, 0.0  ;;  %v1542_v48 = vadd.f32 %v1502_v9, %v6522_v12  ;;  %v1543_v51 = vadd.f32 %v1502_v9, %v6523_v62  ;;  %vm1953_vm1 = vmand %vm5002_vm3, %vm1825_vm14  ;;  %v6546_v62 = vld [vmem:[#allocation177_spill] sm:$0xff] }
 0x255   : > { %v2056_v61 = vadd.f32 %v1988_v42, %v1987_v43  ;;  %v1415_v52 = vmul.f32 %v6524_v17, %v1312_v5  ;;  %v1544_v31 = vadd.f32 %v1503_v30, %v6525_v20  ;;  %v1545_v39 = vadd.f32 %v1503_v30, %v6526_v36  ;;  %vm1954_vm12 = vmand %vm5002_vm3, %vm1826_vm8  ;;  %v6529_v43 = vld [vmem:[#allocation11_spill] sm:$0xff]  ;;  %v6540_v42 = vld [vmem:[#allocation130_spill] sm:$0xff] }
 0x256   : > { %v2017_v53 = vsel %vm1953_vm1, %v4876_v58, 0.0  ;;  %vm1827_vm10 = vcmp.gt.f32.partialorder %v4904_v10, 0.0  ;;  %v2018_v9 = vsel %vm1954_vm12, %v4880_v46, 0.0  ;;  %vm1828_vm0 = vcmp.gt.f32.partialorder %v4908_v27, 0.0  ;;  %v6532_v58 = vld [vmem:[#allocation51_spill] sm:$0xff]  ;;  %v6547_v17 = vld [vmem:[#allocation165_spill] sm:$0xff] }
 0x257   : > { %2057 = vadd.xlane.f32.xlu1 %v2056_v61  ;;  %v1518_v23 = vsub.f32 1.0, %v1415_v52  ;;  %vm5050_vm4 = vmand %vm5027_vm13, %vm1827_vm10  ;;  %v1417_v55 = vmul.f32 %v6529_v43, %v1315_v54  ;;  %v6531_v45 = vsub.f32 1.0, %v6530_v49  ;;  %v6533_v18 = vsub.f32 1.0, %v6532_v58  ;;  %v6534_v54 = vld [vmem:[#allocation83_spill] sm:$0xff]  ;;  %v6552_v5 = vld [vmem:[#allocation25_spill] sm:$0xff] }
 0x258   : > { %v2101_v46 = vadd.f32 %v2018_v9, %v2017_v53  ;;  %vm1956_vm3 = vmand %vm5027_vm13, %vm1828_vm0  ;;  %v2019_v0 = vsel %vm5050_vm4, %v4904_v10, 0.0  ;;  %vm6535_vm8 = vcmp.gt.f32.partialorder %v6534_v54, 0.0  ;;  %vm6541_vm13 = vcmp.lt.s32.totalorder %v6487_v32, 320  ;;  %v6542_v10 = vld [vmem:[#allocation135_spill] sm:$0xff]  ;;  %v6550_v53 = vld [vmem:[#allocation24_spill] sm:$0xff] }
 0x259   : > { %v5057_v2 = vmul.f32 %v1572_v38, %v6531_v45  ;;  %v5061_v21 = vmul.f32 %v1573_v60, %v6533_v18  ;;  %vm5072_vm14 = vmand %vm6535_vm8, %vm1728_vm11  ;;  %v6539_v60 = vld [vmem:[#allocation72_spill] sm:$0xff]  ;;  %v1575_v34 = vadd.f32 %v1518_v23, %v6540_v42  ;;  %v2020_v30 = vsel %vm1956_vm3, %v4908_v27, 0.0  ;;  %v1318_v27 = vpop.xlane.xlu0 %1317  ;;  %v6548_v20 = vld [vmem:[#allocation23_spill] sm:$0xff] }
 0x25a   : > { %v1574_v44 = vadd.f32 %v1518_v23, %v6539_v60  ;;  %v1519_v12 = vsub.f32 1.0, %v1417_v55  ;;  %vm6543_vm12 = vcmp.gt.f32.partialorder %v6542_v10, 0.0  ;;  %2102 = vadd.xlane.f32.xlu0 %v2101_v46  ;;  %v2104_v61 = vadd.f32 %v2020_v30, %v2019_v0  ;;  %v6554_v49 = vld [vmem:[#allocation26_spill] sm:$0xff]  ;;  %v6563_v15 = vld [vmem:[#allocation53_spill] sm:$0xff]  ;;  %v6567_v60 = vld [vmem:[#allocation167_spill] sm:$0xff] }
 0x25b   : > { %vm5084_vm10 = vmand %vm6543_vm12, %vm6541_vm13  ;;  %vm1797_vm0 = vcmp.gt.f32.partialorder %v4962_v3, 0.0  ;;  %vm1798_vm4 = vcmp.gt.f32.partialorder %v4966_v13, 0.0  ;;  %v1387_v52 = vmul.f32 %v6547_v17, %v1270_v1  ;;  %v6549_v36 = vsub.f32 1.0, %v6548_v20  ;;  %v6568_v30 = vld [vmem:[#allocation132_spill] sm:$0xff] }
 0x25c   : > { %v6551_v9 = vsub.f32 1.0, %v6550_v53  ;;  %v6553_v43 = vsub.f32 1.0, %v6552_v5  ;;  %v6555_v45 = vsub.f32 1.0, %v6554_v49  ;;  %vm1925_vm3 = vmand %vm4993_vm6, %vm1797_vm0  ;;  %2105 = vadd.xlane.f32.xlu1 %v2104_v61  ;;  %vm1799_vm13 = vcmp.gt.f32.partialorder %v4976_v47, 0.0  ;;  %v6569_v61 = vld [vmem:[#allocation134_spill] sm:$0xff]  ;;  %v6577_v53 = vld [vmem:[#allocation136_spill] sm:$0xff] }
 0x25d   : > { %v5094_v32 = vmul.f32 %v1542_v48, %v6549_v36  ;;  %vm1926_vm8 = vmand %vm4993_vm6, %vm1798_vm4  ;;  %v1989_v1 = vsel %vm1925_vm3, %v4962_v3, 0.0  ;;  %v1504_v48 = vsub.f32 1.0, %v1387_v52  ;;  %vm1800_vm12 = vcmp.gt.f32.partialorder %v4980_v11, 0.0  ;;  %v6571_v52 = vld [vmem:[#allocation142_spill] sm:$0xff] }
 0x25e   : > { %v5098_v23 = vmul.f32 %v1543_v51, %v6551_v9  ;;  %v5102_v55 = vmul.f32 %v1544_v31, %v6553_v43  ;;  %v5106_v58 = vmul.f32 %v1545_v39, %v6555_v45  ;;  %vm6556_vm11 = vcmp.lt.s32.totalorder %v6505_v56, 320  ;;  %v6557_v51 = vld [vmem:[#allocation84_spill] sm:$0xff]  ;;  %vm5134_vm6 = vmand %vm5072_vm14, %vm1799_vm13  ;;  %v6581_v45 = vld [vmem:[#allocation138_spill] sm:$0xff] }
 0x25f   : > { %vm6558_vm1 = vcmp.gt.f32.partialorder %v6557_v51, 0.0  ;;  %v6561_v39 = vld [vmem:[#allocation52_spill] sm:$0xff]  ;;  %v6564_v0 = vsub.f32 1.0, %v6563_v15  ;;  %v1990_v54 = vsel %vm1926_vm8, %v4966_v13, 0.0  ;;  %v1389_v42 = vmul.f32 %v6567_v60, %v1273_v22  ;;  %v6575_v22 = vld [vmem:[#allocation178_spill] sm:$0xff] }
 0x260   : > { %vm5119_vm5 = vmand %vm6558_vm1, %vm6556_vm11  ;;  %v6562_v18 = vsub.f32 1.0, %v6561_v39  ;;  %v1576_v10 = vadd.f32 %v1519_v12, %v6568_v30  ;;  %v1577_v17 = vadd.f32 %v1519_v12, %v6569_v61  ;;  %v1991_v13 = vsel %vm5134_vm6, %v4976_v47, 0.0  ;;  %v6576_v47 = vld [vmem:[#allocation73_spill] sm:$0xff]  ;;  %v6580_v43 = vld [vmem:[#allocation12_spill] sm:$0xff] }
 0x261   : > { %v5129_v3 = vmul.f32 %v1575_v34, %v6564_v0  ;;  %vm1928_vm1 = vmand %vm5072_vm14, %vm1800_vm12  ;;  %v1321_v34 = vpop.xlane.xlu1 %1320  ;;  %vm6570_vm11 = vcmp.lt.s32.totalorder %v6521_v26, 320  ;;  %vm6572_vm0 = vcmp.gt.f32.partialorder %v6571_v52, 0.0  ;;  %vm1746_vm3 = vcmp.lt.s32.totalorder %v6575_v22, 320  ;;  %v6582_v51 = vld [vmem:[#allocation140_spill] sm:$0xff]  ;;  %v6597_v52 = vld [vmem:[#allocation137_spill] sm:$0xff] }
 0x262   : > { %v5125_v46 = vmul.f32 %v1574_v44, %v6562_v18  ;;  %v2059_v44 = vadd.f32 %v1990_v54, %v1989_v1  ;;  %vm5150_vm4 = vmand %vm6572_vm0, %vm6570_vm11  ;;  %v1992_v12 = vsel %vm1928_vm1, %v4980_v11, 0.0  ;;  %v1505_v36 = vsub.f32 1.0, %v1389_v42  ;;  %v1276_v11 = vpop.xlane.xlu0 %1275  ;;  %v6586_v54 = vld [vmem:[#allocation54_spill] sm:$0xff] }
 0x263   : > { %vm1829_vm14 = vcmp.gt.f32.partialorder %v5013_v33, 0.0  ;;  %vm1830_vm8 = vcmp.gt.f32.partialorder %v5017_v40, 0.0  ;;  %v1546_v38 = vadd.f32 %v1504_v48, %v6576_v47  ;;  %v1547_v26 = vadd.f32 %v1504_v48, %v6577_v53  ;;  %v6598_v53 = vld [vmem:[#allocation162_spill] sm:$0xff] }
 0x264   : > { %2060 = vadd.xlane.f32.xlu0 %v2059_v44  ;;  %v2062_v9 = vadd.f32 %v1992_v12, %v1991_v13  ;;  %vm5162_vm13 = vmand %vm5084_vm10, %vm1829_vm14  ;;  %v1419_v49 = vmul.f32 %v6580_v43, %v1318_v27  ;;  %v1548_v1 = vadd.f32 %v1505_v36, %v6581_v45  ;;  %v1549_v39 = vadd.f32 %v1505_v36, %v6582_v51  ;;  %v6591_v44 = vld [vmem:[#allocation86_spill] sm:$0xff]  ;;  %v6605_v43 = vld [vmem:[#allocation27_spill] sm:$0xff] }
 0x265   : > { %vm1958_vm12 = vmand %vm5084_vm10, %vm1830_vm8  ;;  %v2021_v48 = vsel %vm5162_vm13, %v5013_v33, 0.0  ;;  %vm1831_vm6 = vcmp.gt.f32.partialorder %v5057_v2, 0.0  ;;  %vm1832_vm1 = vcmp.gt.f32.partialorder %v5061_v21, 0.0  ;;  %v1421_v0 = vmul.f32 %v6585_v25, %v1321_v34  ;;  %v6588_v33 = vld [vmem:[#allocation55_spill] sm:$0xff]  ;;  %v1279_v47 = vpop.xlane.xlu1 %1278  ;;  %v6604_v5 = vld [vmem:[#allocation170_spill] sm:$0xff] }
 0x266   : > { %2063 = vadd.xlane.f32.xlu1 %v2062_v9  ;;  %v2022_v18 = vsel %vm1958_vm12, %v5017_v40, 0.0  ;;  %v1520_v15 = vsub.f32 1.0, %v1419_v49  ;;  %vm5179_vm11 = vmand %vm5150_vm4, %vm1831_vm6  ;;  %v6587_v56 = vsub.f32 1.0, %v6586_v54  ;;  %v6589_v42 = vsub.f32 1.0, %v6588_v33  ;;  %v6607_v51 = vld [vmem:[#allocation28_spill] sm:$0xff]  ;;  %v6611_v25 = vld [vmem:[#allocation30_spill] sm:$0xff] }
 0x267   : > { %v2107_v40 = vadd.f32 %v2022_v18, %v2021_v48  ;;  %vm1960_vm10 = vmand %vm5150_vm4, %vm1832_vm1  ;;  %v2023_v61 = vsel %vm5179_vm11, %v5057_v2, 0.0  ;;  %vm6590_vm0 = vcmp.lt.s32.totalorder %v6538_v41, 320  ;;  %vm6592_vm14 = vcmp.gt.f32.partialorder %v6591_v44, 0.0  ;;  %v6600_v2 = vld [vmem:[#allocation143_spill] sm:$0xff]  ;;  %v6609_v18 = vld [vmem:[#allocation29_spill] sm:$0xff] }
 0x268   : > { %v5186_v60 = vmul.f32 %v1576_v10, %v6587_v56  ;;  %v5190_v30 = vmul.f32 %v1577_v17, %v6589_v42  ;;  %vm5201_vm8 = vmand %vm6592_vm14, %vm6590_vm0  ;;  %v6595_v10 = vld [vmem:[#allocation161_spill] sm:$0xff]  ;;  %v6596_v17 = vld [vmem:[#allocation74_spill] sm:$0xff]  ;;  %v1579_v12 = vadd.f32 %v1520_v15, %v6597_v52  ;;  %v2024_v20 = vsel %vm1960_vm10, %v5061_v21, 0.0 }
 0x269   : > { %vm1731_vm13 = vcmp.lt.s32.totalorder %v6595_v10, 320  ;;  %v1578_v34 = vadd.f32 %v1520_v15, %v6596_v17  ;;  %v1521_v36 = vsub.f32 1.0, %v1421_v0  ;;  %vm1732_vm4 = vcmp.lt.s32.totalorder %v6598_v53, 320  ;;  %2108 = vadd.xlane.f32.xlu0 %v2107_v40  ;;  %v6620_v17 = vld [vmem:[#allocation139_spill] sm:$0xff]  ;;  %v1327_v13 = vpop.xlane.xlu1 %1326  ;;  %v6635_v41 = vld [vmem:[#allocation58_spill] sm:$0xff] }
 0x26a   : > { %vm6599_vm12 = vcmp.lt.s32.totalorder %v6546_v62, 320  ;;  %vm6601_vm6 = vcmp.gt.f32.partialorder %v6600_v2, 0.0  ;;  %v2110_v9 = vadd.f32 %v2024_v20, %v2023_v61  ;;  %vm1801_vm11 = vcmp.gt.f32.partialorder %v5094_v32, 0.0  ;;  %v6621_v20 = vld [vmem:[#allocation141_spill] sm:$0xff] }
 0x26b   : > { %vm5214_vm1 = vmand %vm6601_vm6, %vm6599_vm12  ;;  %vm1802_vm0 = vcmp.gt.f32.partialorder %v5098_v23, 0.0  ;;  %v1391_v21 = vmul.f32 %v6604_v5, %v1276_v11  ;;  %v6606_v49 = vsub.f32 1.0, %v6605_v43  ;;  %v6608_v62 = vsub.f32 1.0, %v6607_v51  ;;  %v1324_v11 = vpop.xlane.xlu0 %1323  ;;  %v6630_v51 = vld [vmem:[#allocation14_spill] sm:$0xff] }
 0x26c   : > { %v6610_v15 = vsub.f32 1.0, %v6609_v18  ;;  %v6612_v0 = vsub.f32 1.0, %v6611_v25  ;;  %vm1929_vm10 = vmand %vm5119_vm5, %vm1801_vm11  ;;  %2111 = vadd.xlane.f32.xlu1 %v2110_v9  ;;  %vm1803_vm12 = vcmp.gt.f32.partialorder %v5102_v55, 0.0  ;;  %vm1804_vm6 = vcmp.gt.f32.partialorder %v5106_v58, 0.0  ;;  %v6632_v18 = vld [vmem:[#allocation146_spill] sm:$0xff]  ;;  %v6633_v25 = vld [vmem:[#allocation148_spill] sm:$0xff] }
 0x26d   : > { %v5223_v45 = vmul.f32 %v1546_v38, %v6606_v49  ;;  %v5227_v48 = vmul.f32 %v1547_v26, %v6608_v62  ;;  %vm1930_vm14 = vmand %vm5119_vm5, %vm1802_vm0  ;;  %v1993_v38 = vsel %vm1929_vm10, %v5094_v32, 0.0  ;;  %v1506_v26 = vsub.f32 1.0, %v1391_v21  ;;  %v6619_v32 = vld [vmem:[#allocation172_spill] sm:$0xff]  ;;  %v6631_v62 = vld [vmem:[#allocation179_spill] sm:$0xff] }
 0x26e   : > { %v5231_v27 = vmul.f32 %v1548_v1, %v6610_v15  ;;  %v5235_v54 = vmul.f32 %v1549_v39, %v6612_v0  ;;  %v6613_v1 = vld [vmem:[#allocation56_spill] sm:$0xff]  ;;  %v6615_v39 = vld [vmem:[#allocation57_spill] sm:$0xff]  ;;  %v1994_v61 = vsel %vm1930_vm14, %v5098_v23, 0.0  ;;  %vm5255_vm5 = vmand %vm5201_vm8, %vm1803_vm12  ;;  %v1393_v44 = vmul.f32 %v6619_v32, %v1279_v47 }
 0x26f   : > { %v6614_v56 = vsub.f32 1.0, %v6613_v1  ;;  %v6616_v42 = vsub.f32 1.0, %v6615_v39  ;;  %v1580_v52 = vadd.f32 %v1521_v36, %v6620_v17  ;;  %v1581_v2 = vadd.f32 %v1521_v36, %v6621_v20  ;;  %vm1932_vm11 = vmand %vm5201_vm8, %vm1804_vm6  ;;  %v6626_v36 = vld [vmem:[#allocation70_spill] sm:$0xff]  ;;  %v6654_v49 = vld [vmem:[#allocation145_spill] sm:$0xff] }
 0x270   : > { %v1995_v23 = vsel %vm5255_vm5, %v5102_v55, 0.0  ;;  %v1996_v47 = vsel %vm1932_vm11, %v5106_v58, 0.0  ;;  %v1507_v5 = vsub.f32 1.0, %v1393_v44  ;;  %vm1833_vm14 = vcmp.gt.f32.partialorder %v5125_v46, 0.0  ;;  %v6627_v55 = vld [vmem:[#allocation144_spill] sm:$0xff]  ;;  %v6638_v44 = vld [vmem:[#allocation87_spill] sm:$0xff] }
 0x271   : > { %v5246_v33 = vmul.f32 %v1578_v34, %v6614_v56  ;;  %v5250_v40 = vmul.f32 %v1579_v12, %v6616_v42  ;;  %v2065_v34 = vadd.f32 %v1994_v61, %v1993_v38  ;;  %v6622_v12 = vld [vmem:[#allocation150_spill] sm:$0xff]  ;;  %vm1834_vm12 = vcmp.gt.f32.partialorder %v5129_v3, 0.0  ;;  %v6696_v17 = vld [vmem:[#allocation156_spill] sm:$0xff] }
 0x272   : > { %vm6623_vm0 = vcmp.gt.f32.partialorder %v6622_v12, 0.0  ;;  %v1550_v21 = vadd.f32 %v1506_v26, %v6626_v36  ;;  %v1551_v43 = vadd.f32 %v1506_v26, %v6627_v55  ;;  %v2068_v22 = vadd.f32 %v1996_v47, %v1995_v23  ;;  %vm1962_vm6 = vmand %vm5214_vm1, %vm1834_vm12  ;;  %v1282_v26 = vpop.xlane.xlu0 %1281  ;;  %v6634_v56 = vld [vmem:[#allocation182_spill] sm:$0xff]  ;;  %v6649_v47 = vld [vmem:[#allocation173_spill] sm:$0xff] }
 0x273   : > { %vm5271_vm10 = vmand %vm6623_vm0, %vm1746_vm3  ;;  %2066 = vadd.xlane.f32.xlu0 %v2065_v34  ;;  %v1423_v58 = vmul.f32 %v6630_v51, %v1324_v11  ;;  %vm1748_vm8 = vcmp.lt.s32.totalorder %v6631_v62, 320  ;;  %v1552_v15 = vadd.f32 %v1507_v5, %v6632_v18  ;;  %v1553_v0 = vadd.f32 %v1507_v5, %v6633_v25  ;;  %v1285_v18 = vpop.xlane.xlu1 %1284  ;;  %v6658_v25 = vld [vmem:[#allocation60_spill] sm:$0xff] }
 0x274   : > { %vm5282_vm3 = vmand %vm5214_vm1, %vm1833_vm14  ;;  %vm1835_vm5 = vcmp.gt.f32.partialorder %v5186_v60, 0.0  ;;  %2069 = vadd.xlane.f32.xlu1 %v2068_v22  ;;  %v2026_v1 = vsel %vm1962_vm6, %v5129_v3, 0.0  ;;  %vm1836_vm11 = vcmp.gt.f32.partialorder %v5190_v30, 0.0  ;;  %v1425_v39 = vmul.f32 %v6634_v56, %v1327_v13  ;;  %v6650_v13 = vld [vmem:[#allocation32_spill] sm:$0xff]  ;;  %v6663_v56 = vld [vmem:[#allocation149_spill] sm:$0xff] }
 0x275   : > { %v2025_v38 = vsel %vm5282_vm3, %v5125_v46, 0.0  ;;  %v1522_v11 = vsub.f32 1.0, %v1423_v58  ;;  %vm1963_vm0 = vmand %vm5271_vm10, %vm1835_vm5  ;;  %v6636_v42 = vsub.f32 1.0, %v6635_v41  ;;  %v6637_v46 = vsub.f32 1.0, %v6339_v35  ;;  %v6644_v35 = vld [vmem:[#allocation82_spill] sm:$0xff] }
 0x276   : > { %v2113_v32 = vadd.f32 %v2026_v1, %v2025_v38  ;;  %vm1964_vm1 = vmand %vm5271_vm10, %vm1836_vm11  ;;  %v2027_v3 = vsel %vm1963_vm0, %v5186_v60, 0.0  ;;  %vm6639_vm14 = vcmp.gt.f32.partialorder %v6638_v44, 0.0  ;;  %v1523_v12 = vsub.f32 1.0, %v1425_v39  ;;  %v6645_v60 = vld [vmem:[#allocation89_spill] sm:$0xff] }
 0x277   : > { %v5303_v61 = vmul.f32 %v1580_v52, %v6636_v42  ;;  %v5307_v31 = vmul.f32 %v1581_v2, %v6637_v46  ;;  %vm5316_vm12 = vmand %vm6639_vm14, %vm1731_vm13  ;;  %v6642_v52 = vld [vmem:[#allocation31_spill] sm:$0xff]  ;;  %v1582_v2 = vadd.f32 %v1522_v11, %v6644_v35  ;;  %v2028_v23 = vsel %vm1964_vm1, %v5190_v30, 0.0  ;;  %v6664_v42 = vld [vmem:[#allocation85_spill] sm:$0xff] }
 0x278   : > { %v6643_v20 = vsub.f32 1.0, %v6642_v52  ;;  %vm6646_vm10 = vcmp.gt.f32.partialorder %v6645_v60, 0.0  ;;  %2114 = vadd.xlane.f32.xlu0 %v2113_v32  ;;  %v2116_v9 = vadd.f32 %v2028_v23, %v2027_v3  ;;  %vm1805_vm13 = vcmp.gt.f32.partialorder %v5223_v45, 0.0  ;;  %v6665_v32 = vld [vmem:[#allocation181_spill] sm:$0xff]  ;;  %v6669_v52 = vld [vmem:[#allocation174_spill] sm:$0xff]  ;;  %v6670_v35 = vld [vmem:[#allocation183_spill] sm:$0xff] }
 0x279   : > { %vm5330_vm3 = vmand %vm6646_vm10, %vm1732_vm4  ;;  %vm1806_vm6 = vcmp.gt.f32.partialorder %v5227_v48, 0.0  ;;  %v1395_v5 = vmul.f32 %v6649_v47, %v1282_v26  ;;  %v6651_v36 = vsub.f32 1.0, %v6650_v13  ;;  %v6652_v53 = vsub.f32 1.0, %v6342_v7  ;;  %v6660_v26 = vld [vmem:[#allocation147_spill] sm:$0xff]  ;;  %v6671_v23 = vld [vmem:[#allocation61_spill] sm:$0xff] }
 0x27a   : > { %v5322_v34 = vmul.f32 %v1550_v21, %v6643_v20  ;;  %v6653_v55 = vsub.f32 1.0, %v6343_v4  ;;  %v1583_v51 = vadd.f32 %v1522_v11, %v6654_v49  ;;  %vm5352_vm4 = vmand %vm5316_vm12, %vm1805_vm13  ;;  %2117 = vadd.xlane.f32.xlu1 %v2116_v9  ;;  %vm1807_vm11 = vcmp.gt.f32.partialorder %v5231_v27, 0.0  ;;  %v6674_v47 = vld [vmem:[#allocation154_spill] sm:$0xff] }
 0x27b   : > { %v5339_v30 = vmul.f32 %v1551_v43, %v6651_v36  ;;  %v5343_v21 = vmul.f32 %v1552_v15, %v6652_v53  ;;  %vm1934_vm5 = vmand %vm5316_vm12, %vm1806_vm6  ;;  %v1997_v7 = vsel %vm5352_vm4, %v5223_v45, 0.0  ;;  %v1508_v4 = vsub.f32 1.0, %v1395_v5  ;;  %v1330_v43 = vpop.xlane.xlu0 %1329  ;;  %v6657_v15 = vld [vmem:[#allocation180_spill] sm:$0xff] }
 0x27c   : > { %v5347_v22 = vmul.f32 %v1553_v0, %v6653_v55  ;;  %vm1808_vm0 = vcmp.gt.f32.partialorder %v5235_v54, 0.0  ;;  %vm1751_vm1 = vcmp.lt.s32.totalorder %v6657_v15, 320  ;;  %v6659_v0 = vsub.f32 1.0, %v6658_v25  ;;  %vm5372_vm14 = vmand %vm5330_vm3, %vm1807_vm11  ;;  %v1333_v55 = vpop.xlane.xlu1 %1332 }
 0x27d   : > { %v1584_v1 = vadd.f32 %v1523_v12, %v6660_v26  ;;  %v1998_v11 = vsel %vm1934_vm5, %v5227_v48, 0.0  ;;  %vm1837_vm12 = vcmp.gt.f32.partialorder %v5246_v33, 0.0  ;;  %v1585_v39 = vadd.f32 %v1523_v12, %v6663_v56  ;;  %vm1936_vm10 = vmand %vm5330_vm3, %vm1808_vm0  ;;  %v6686_v26 = vld [vmem:[#allocation35_spill] sm:$0xff]  ;;  %v6688_v56 = vld [vmem:[#allocation153_spill] sm:$0xff] }
 0x27e   : > { %v5366_v38 = vmul.f32 %v1582_v2, %v6659_v0  ;;  %v2071_v41 = vadd.f32 %v1998_v11, %v1997_v7  ;;  %v1554_v46 = vadd.f32 %v1508_v4, %v6664_v42  ;;  %v1999_v48 = vsel %vm5372_vm14, %v5231_v27, 0.0  ;;  %vm5389_vm4 = vmand %vm4241_vm15, %vm1837_vm12  ;;  %v6673_v27 = vld [vmem:[#allocation152_spill] sm:$0xff]  ;;  %v6682_v7 = vld [vmem:[#allocation155_spill] sm:$0xff] }
 0x27f   : > { %vm1752_vm13 = vcmp.lt.s32.totalorder %v6665_v32, 320  ;;  %v2000_v3 = vsel %vm1936_vm10, %v5235_v54, 0.0  ;;  %vm1838_vm6 = vcmp.gt.f32.partialorder %v5250_v40, 0.0  ;;  %v1397_v20 = vmul.f32 %v6669_v52, %v1285_v18  ;;  %v6687_v11 = vld [vmem:[#allocation151_spill] sm:$0xff] }
 0x280   : > { %v1427_v2 = vmul.f32 %v6670_v35, %v1330_v43  ;;  %v6672_v12 = vsub.f32 1.0, %v6671_v23  ;;  %2072 = vadd.xlane.f32.xlu0 %v2071_v41  ;;  %v1555_v10 = vadd.f32 %v1508_v4, %v6673_v27  ;;  %v2074_v54 = vadd.f32 %v2000_v3, %v1999_v48  ;;  %vm1966_vm3 = vmand %vm4241_vm15, %vm1838_vm6 }
 0x281   : > { %v2029_v9 = vsel %vm5389_vm4, %v5246_v33, 0.0  ;;  %vm6675_vm5 = vcmp.gt.f32.partialorder %v6674_v47, 0.0  ;;  %v2030_v13 = vsel %vm1966_vm3, %v5250_v40, 0.0  ;;  %v1509_v36 = vsub.f32 1.0, %v1397_v20  ;;  %v6698_v20 = vld [vmem:[#allocation64_spill] sm:$0xff] }
 0x282   : > { %v5397_v60 = vmul.f32 %v1583_v51, %v6672_v12  ;;  %vm5409_vm11 = vmand %vm6675_vm5, %vm1748_vm8  ;;  %v1524_v53 = vsub.f32 1.0, %v1427_v2  ;;  %vm1839_vm0 = vcmp.gt.f32.partialorder %v5303_v61, 0.0  ;;  %2075 = vadd.xlane.f32.xlu1 %v2074_v54  ;;  %v2119_v49 = vadd.f32 %v2030_v13, %v2029_v9  ;;  %v6706_v9 = vld [vmem:[#allocation37_spill] sm:$0xff] }
 0x283   : > { %vm1840_vm15 = vcmp.gt.f32.partialorder %v5307_v31, 0.0  ;;  %vm5418_vm14 = vmand %vm5409_vm11, %vm1839_vm0  ;;  %vm1809_vm8 = vcmp.gt.f32.partialorder %v5322_v34, 0.0  ;;  %vm1810_vm12 = vcmp.gt.f32.partialorder %v5339_v30, 0.0  ;;  %v1648_v40 = vmul.f32 %v1584_v1, %v1488_v16 }
 0x284   : > { %v6680_v62 = vsub.f32 1.0, %v6349_v8  ;;  %v6681_v58 = vsub.f32 1.0, %v6232_v28  ;;  %v1556_v4 = vadd.f32 %v1509_v36, %v6682_v7  ;;  %vm1968_vm10 = vmand %vm5409_vm11, %vm1840_vm15  ;;  %2120 = vadd.xlane.f32.xlu0 %v2119_v49  ;;  %v2031_v43 = vsel %vm5418_vm14, %v5303_v61, 0.0  ;;  %v6684_v8 = vld [vmem:[#allocation184_spill] sm:$0xff] }
 0x285   : > { %v2032_v29 = vsel %vm1968_vm10, %v5307_v31, 0.0  ;;  %vm1937_vm6 = vmand %vm3774_vm2, %vm1809_vm8  ;;  %v1429_v25 = vmul.f32 %v6684_v8, %v1333_v55  ;;  %vm1811_vm4 = vcmp.gt.f32.partialorder %v5343_v21, 0.0  ;;  %v6685_v28 = vsub.f32 1.0, %v6236_v37  ;;  %v6711_v55 = vld [vmem:[#allocation110_spill] sm:$0xff] }
 0x286   : > { %v1649_v51 = vmul.f32 %v1585_v39, %v6680_v62  ;;  %v5430_v18 = vmul.f32 %v1554_v46, %v6681_v58  ;;  %v1557_v1 = vadd.f32 %v1509_v36, %v6686_v26  ;;  %v1586_v45 = vadd.f32 %v1524_v53, %v6687_v11  ;;  %vm1938_vm3 = vmand %vm3774_vm2, %vm1810_vm12 }
 0x287   : > { %v1619_v0 = vmul.f32 %v1555_v10, %v6685_v28  ;;  %v1587_v39 = vadd.f32 %v1524_v53, %v6688_v56  ;;  %v2122_v61 = vadd.f32 %v2032_v29, %v2031_v43  ;;  %v2001_v31 = vsel %vm1937_vm6, %v5322_v34, 0.0  ;;  %vm5456_vm5 = vmand %vm3845_vm7, %vm1811_vm4  ;;  %v6692_v34 = vld [vmem:[#allocation169_spill] sm:$0xff] }
 0x288   : > { %v2002_v41 = vsel %vm1938_vm3, %v5339_v30, 0.0  ;;  %v1525_v42 = vsub.f32 1.0, %v1429_v25  ;;  %vm1812_vm11 = vcmp.gt.f32.partialorder %v5347_v22, 0.0  ;;  %v2003_v3 = vsel %vm5456_vm5, %v5343_v21, 0.0 }
 0x289   : > { %v2077_v48 = vadd.f32 %v2002_v41, %v2001_v31  ;;  %vm1841_vm2 = vcmp.gt.f32.partialorder %v5366_v38, 0.0  ;;  %vm6693_vm0 = vcmp.gt.f32.partialorder %v6692_v34, 0.0  ;;  %v1620_v44 = vmul.f32 %v1556_v4, %v1460_v63  ;;  %2123 = vadd.xlane.f32.xlu1 %v2122_v61  ;;  %vm1940_vm14 = vmand %vm3845_vm7, %vm1812_vm11  ;;  %v6700_v63 = vld [vmem:[#allocation171_spill] sm:$0xff] }
 0x28a   : > { %vm5469_vm15 = vmand %vm6693_vm0, %vm1751_vm1  ;;  %v1588_v52 = vadd.f32 %v1525_v42, %v6696_v17  ;;  %vm1842_vm8 = vcmp.gt.f32.partialorder %v5397_v60, 0.0  ;;  %vm1843_vm12 = vcmp.gt.f32.partialorder %v1648_v40, 0.0  ;;  %v6697_v21 = vsub.f32 1.0, %v6239_v14 }
 0x28b   : > { %2078 = vadd.xlane.f32.xlu0 %v2077_v48  ;;  %v1589_v35 = vadd.f32 %v1525_v42, %v6698_v20  ;;  %v2004_v2 = vsel %vm1940_vm14, %v5347_v22, 0.0  ;;  %vm1969_vm1 = vmand %vm4249_vm9, %vm1841_vm2  ;;  %vm1844_vm10 = vcmp.gt.f32.partialorder %v1649_v51, 0.0  ;;  %vm6701_vm6 = vcmp.gt.f32.partialorder %v6700_v63, 0.0 }
 0x28c   : > { %v1621_v15 = vmul.f32 %v1557_v1, %v6697_v21  ;;  %vm5489_vm7 = vmand %vm6701_vm6, %vm1752_vm13  ;;  %v6704_v14 = vsub.f32 1.0, %v6233_v19  ;;  %v2080_v27 = vadd.f32 %v2004_v2, %v2003_v3  ;;  %v2033_v22 = vsel %vm1969_vm1, %v5366_v38, 0.0 }
 0x28d   : > { %vm1970_vm4 = vmand %vm4249_vm9, %vm1842_vm8  ;;  %vm1813_vm3 = vcmp.gt.f32.partialorder %v5430_v18, 0.0  ;;  %v6705_v10 = vsub.f32 1.0, %v6237_v24  ;;  %vm6707_vm13 = vnez %v6706_v9  ;;  %vm1814_vm11 = vcmp.gt.f32.partialorder %v1619_v0, 0.0 }
 0x28e   : > { %v1650_v12 = vmul.f32 %v1586_v45, %v6704_v14  ;;  %v2034_v54 = vsel %vm1970_vm4, %v5397_v60, 0.0  ;;  %vm1971_vm5 = vmand %vm6707_vm13, %vm1843_vm12  ;;  %v6708_v19 = vsub.f32 1.0, %v6372_v6  ;;  %2081 = vadd.xlane.f32.xlu1 %v2080_v27  ;;  %vm1815_vm2 = vcmp.gt.f32.partialorder %v1620_v44, 0.0  ;;  %v6709_v60 = vld [vmem:[#allocation101_spill] sm:$0xff] }
 0x28f   : > { %v1651_v32 = vmul.f32 %v1587_v39, %v6705_v10  ;;  %v2125_v5 = vadd.f32 %v2034_v54, %v2033_v22  ;;  %vm1972_vm9 = vmand %vm6707_vm13, %vm1844_vm10  ;;  %v2035_v38 = vsel %vm1971_vm5, %v1648_v40, 0.0  ;;  %v1653_v24 = vmul.f32 %v1589_v35, %v1493_v50 }
 0x290   : > { %v1652_v47 = vmul.f32 %v1588_v52, %v6708_v19  ;;  %v2036_v13 = vsel %vm1972_vm9, %v1649_v51, 0.0  ;;  %vm6710_vm0 = vnez %v6709_v60  ;;  %vm1816_vm8 = vcmp.gt.f32.partialorder %v1621_v15, 0.0 }
 0x291   : > { %vm1941_vm14 = vmand %vm6710_vm0, %vm1813_vm3  ;;  %2126 = vadd.xlane.f32.xlu0 %v2125_v5  ;;  %v2128_v36 = vadd.f32 %v2036_v13, %v2035_v38  ;;  %vm1845_vm1 = vcmp.gt.f32.partialorder %v1650_v12, 0.0  ;;  %vm6712_vm10 = vnez %v6711_v55  ;;  %vm1846_vm4 = vcmp.gt.f32.partialorder %v1651_v32, 0.0 }
 0x292   : > { %vm1942_vm12 = vmand %vm6710_vm0, %vm1814_vm11  ;;  %v2005_v6 = vsel %vm1941_vm14, %v5430_v18, 0.0  ;;  %vm1847_vm3 = vcmp.gt.f32.partialorder %v1652_v47, 0.0  ;;  %vm1848_vm11 = vcmp.gt.f32.partialorder %v1653_v24, 0.0  ;;  %vm2137_vm14 = vcmask 7168  }
 0x293   : > { %v2006_v53 = vsel %vm1942_vm12, %v1619_v0, 0.0  ;;  %vm1943_vm6 = vmand %vm6712_vm10, %vm1815_vm2  ;;  %2129 = vadd.xlane.f32.xlu1 %v2128_v36 }
 0x294   : > { %v2083_v59 = vadd.f32 %v2006_v53, %v2005_v6  ;;  %vm1944_vm13 = vmand %vm6712_vm10, %vm1816_vm8  ;;  %v2007_v50 = vsel %vm1943_vm6, %v1620_v44, 0.0 }
 0x295   : > { %v2008_v49 = vsel %vm1944_vm13, %v1621_v15, 0.0  ;;  %vm1973_vm5 = vmand %vm5469_vm15, %vm1845_vm1 }
 0x296   : > { %2084 = vadd.xlane.f32.xlu0 %v2083_v59  ;;  %v2086_v33 = vadd.f32 %v2008_v49, %v2007_v50  ;;  %vm1974_vm9 = vmand %vm5469_vm15, %vm1846_vm4  ;;  %v2037_v40 = vsel %vm1973_vm5, %v1650_v12, 0.0 }
 0x297   : > { %v2038_v62 = vsel %vm1974_vm9, %v1651_v32, 0.0  ;;  %vm1975_vm2 = vmand %vm5489_vm7, %vm1847_vm3 }
 0x298   : > { %2087 = vadd.xlane.f32.xlu1 %v2086_v33  ;;  %v2131_v51 = vadd.f32 %v2038_v62, %v2037_v40  ;;  %vm1976_vm0 = vmand %vm5489_vm7, %vm1848_vm11  ;;  %v2039_v58 = vsel %vm1975_vm2, %v1652_v47, 0.0 }
 0x299   : > { %v2040_v18 = vsel %vm1976_vm0, %v1653_v24, 0.0 }
 0x29a   : > { %2132 = vadd.xlane.f32.xlu0 %v2131_v51  ;;  %v2134_v7 = vadd.f32 %v2040_v18, %v2039_v58 }
 0x29c   : > { %2135 = vadd.xlane.f32.xlu1 %v2134_v7 }
 0x2bb   : > { %v2043_v4 = vpop.xlane.xlu0 %2042 }
 0x2bc   : > { %2138 = vst.msk [vmem:[%s5530_s18] sm:$0xff] %vm2137_vm14, %v2043_v4 }
 0x2c2   : > { %v2046_v43 = vpop.xlane.xlu1 %2045 }
 0x2c3   : > { %2139 = vst.msk [vmem:[%s5530_s18 + $0x8] sm:$0xff] %vm2137_vm14, %v2046_v43 }
 0x2c6   : > { %v2091_v29 = vpop.xlane.xlu0 %2090 }
 0x2c7   : > { %2154 = vst.msk [vmem:[%s5530_s18 + $0x80] sm:$0xff] %vm2137_vm14, %v2091_v29 }
 0x2cc   : > { %v2094_v16 = vpop.xlane.xlu1 %2093 }
 0x2cd   : > { %2155 = vst.msk [vmem:[%s5530_s18 + $0x88] sm:$0xff] %vm2137_vm14, %v2094_v16 }
 0x2d1   : > { %v2049_v8 = vpop.xlane.xlu0 %2048 }
 0x2d2   : > { %2140 = vst.msk [vmem:[%s5530_s18 + $0x10] sm:$0xff] %vm2137_vm14, %v2049_v8 }
 0x2d4   : > { %v2052_v25 = vpop.xlane.xlu1 %2051 }
 0x2d5   : > { %2141 = vst.msk [vmem:[%s5530_s18 + $0x18] sm:$0xff] %vm2137_vm14, %v2052_v25 }
 0x2d8   : > { %v2097_v28 = vpop.xlane.xlu0 %2096 }
 0x2d9   : > { %2156 = vst.msk [vmem:[%s5530_s18 + $0x90] sm:$0xff] %vm2137_vm14, %v2097_v28 }
 0x2db   : > { %v2100_v0 = vpop.xlane.xlu1 %2099 }
 0x2dc   : > { %2157 = vst.msk [vmem:[%s5530_s18 + $0x98] sm:$0xff] %vm2137_vm14, %v2100_v0 }
 0x2df   : > { %v2055_v26 = vpop.xlane.xlu0 %2054 }
 0x2e0   : > { %2142 = vst.msk [vmem:[%s5530_s18 + $0x20] sm:$0xff] %vm2137_vm14, %v2055_v26 }
 0x2e4   : > { %v2058_v1 = vpop.xlane.xlu1 %2057 }
 0x2e5   : > { %2143 = vst.msk [vmem:[%s5530_s18 + $0x28] sm:$0xff] %vm2137_vm14, %v2058_v1 }
 0x2e7   : > { %v2103_v11 = vpop.xlane.xlu0 %2102 }
 0x2e8   : > { %2158 = vst.msk [vmem:[%s5530_s18 + $0xa0] sm:$0xff] %vm2137_vm14, %v2103_v11 }
 0x2e9   : > { %v2106_v45 = vpop.xlane.xlu1 %2105 }
 0x2ea   : > { %2159 = vst.msk [vmem:[%s5530_s18 + $0xa8] sm:$0xff] %vm2137_vm14, %v2106_v45 }
 0x2f1   : > { %v2061_v56 = vpop.xlane.xlu0 %2060 }
 0x2f2   : > { %2144 = vst.msk [vmem:[%s5530_s18 + $0x30] sm:$0xff] %vm2137_vm14, %v2061_v56 }
 0x2f3   : > { %v2064_v39 = vpop.xlane.xlu1 %2063 }
 0x2f4   : > { %2145 = vst.msk [vmem:[%s5530_s18 + $0x38] sm:$0xff] %vm2137_vm14, %v2064_v39 }
 0x2f6   : > { %v2109_v61 = vpop.xlane.xlu0 %2108 }
 0x2f7   : > { %2160 = vst.msk [vmem:[%s5530_s18 + $0xb0] sm:$0xff] %vm2137_vm14, %v2109_v61 }
 0x2f9   : > { %v2112_v31 = vpop.xlane.xlu1 %2111 }
 0x2fa   : > { %2161 = vst.msk [vmem:[%s5530_s18 + $0xb8] sm:$0xff] %vm2137_vm14, %v2112_v31 }
 0x300   : > { %v2067_v41 = vpop.xlane.xlu0 %2066 }
 0x301   : > { %2146 = vst.msk [vmem:[%s5530_s18 + $0x40] sm:$0xff] %vm2137_vm14, %v2067_v41  ;;  %v2070_v42 = vpop.xlane.xlu1 %2069 }
 0x302   : > { %2147 = vst.msk [vmem:[%s5530_s18 + $0x48] sm:$0xff] %vm2137_vm14, %v2070_v42 }
 0x305   : > { %v2115_v46 = vpop.xlane.xlu0 %2114 }
 0x306   : > { %2162 = vst.msk [vmem:[%s5530_s18 + $0xc0] sm:$0xff] %vm2137_vm14, %v2115_v46 }
 0x307   : > { %v2118_v37 = vpop.xlane.xlu1 %2117 }
 0x308   : > { %2163 = vst.msk [vmem:[%s5530_s18 + $0xc8] sm:$0xff] %vm2137_vm14, %v2118_v37 }
 0x30d   : > { %v2073_v48 = vpop.xlane.xlu0 %2072 }
 0x30e   : > { %2148 = vst.msk [vmem:[%s5530_s18 + $0x50] sm:$0xff] %vm2137_vm14, %v2073_v48 }
 0x30f   : > { %v2076_v3 = vpop.xlane.xlu1 %2075 }
 0x310   : > { %2149 = vst.msk [vmem:[%s5530_s18 + $0x58] sm:$0xff] %vm2137_vm14, %v2076_v3 }
 0x311   : > { %v2121_v34 = vpop.xlane.xlu0 %2120 }
 0x312   : > { %2164 = vst.msk [vmem:[%s5530_s18 + $0xd0] sm:$0xff] %vm2137_vm14, %v2121_v34 }
 0x316   : > { %v2124_v30 = vpop.xlane.xlu1 %2123 }
 0x317   : > { %2165 = vst.msk [vmem:[%s5530_s18 + $0xd8] sm:$0xff] %vm2137_vm14, %v2124_v30 }
 0x318   : > { %v2079_v44 = vpop.xlane.xlu0 %2078 }
 0x319   : > { %2150 = vst.msk [vmem:[%s5530_s18 + $0x60] sm:$0xff] %vm2137_vm14, %v2079_v44 }
 0x31b   : > { %v2082_v17 = vpop.xlane.xlu1 %2081 }
 0x31c   : > { %2151 = vst.msk [vmem:[%s5530_s18 + $0x68] sm:$0xff] %vm2137_vm14, %v2082_v17 }
 0x31e   : > { %v2127_v52 = vpop.xlane.xlu0 %2126 }
 0x31f   : > { %2166 = vst.msk [vmem:[%s5530_s18 + $0xe0] sm:$0xff] %vm2137_vm14, %v2127_v52 }
 0x320   : > { %v2130_v21 = vpop.xlane.xlu1 %2129 }
 0x321   : > { %2167 = vst.msk [vmem:[%s5530_s18 + $0xe8] sm:$0xff] %vm2137_vm14, %v2130_v21 }
 0x323   : > { %v2085_v15 = vpop.xlane.xlu0 %2084 }
 0x324   : > { %2152 = vst.msk [vmem:[%s5530_s18 + $0x70] sm:$0xff] %vm2137_vm14, %v2085_v15  ;;  %2176 = sbr.rel (!%p6713_p2) target bundleno = 867 (0x363), region = 52 }
 0x325   : > { %v2088_v20 = vpop.xlane.xlu1 %2087 }
 0x326   : > { %2153 = vst.msk [vmem:[%s5530_s18 + $0x78] sm:$0xff] %vm2137_vm14, %v2088_v20 }
 0x327   : > { %v2133_v35 = vpop.xlane.xlu0 %2132 }
 0x328   : > { %2168 = vst.msk [vmem:[%s5530_s18 + $0xf0] sm:$0xff] %vm2137_vm14, %v2133_v35 }
 0x329   : > { %v2136_v2 = vpop.xlane.xlu1 %2135 }
 0x32a   : > { %2169 = vst.msk [vmem:[%s5530_s18 + $0xf8] sm:$0xff] %vm2137_vm14, %v2136_v2 }
 0x32b   : > { %s6728_s28 = smov (!%p2179_p4, %s2178_s28), 32 }
 0x32c   : > { %s2596_s6 = sshll.u32 %s6728_s28, 7 }
 0x32d   : > { %p2599_p8 = scmp.eq.s32.totalorder %s2596_s6, 0 }
 0x32e   : > { %s5610_s26 = sshrl.u32 (!%p2599_p8), %s6728_s28, 5 }
 0x32f   : > { %2187 = sbr.rel (%p2599_p8) target bundleno = 867 (0x363), region = 56  ;;  %p2600_p10 = scmp.le.s32.totalorder (!%p2599_p8), %s5610_s26, 0 }
 0x336   : > { %2487 = sbr.rel (%p2600_p10) target bundleno = 846 (0x34e), region = 147  ;;  %s6714_s19 = smov (!%p2600_p10), %s5604_s22 }
 0x337   : > { %s6715_s7 = smov (!%p2600_p10), %s5530_s18  ;;  %s5619_s24 = smov (!%p2600_p10), 0  }
 0x338   : > { %s5621_s8 = smov (!%p2600_p10), 0  }
 0x33d LB: >> { %v2311_v23 = vld [vmem:[%s3068_s7] sm:$0xff]  ;;  %v2313_v63 = vld [vmem:[%s3068_s7 + $0x8] sm:$0xff]  ;;  %v2315_v57 = vld [vmem:[%s3068_s7 + $0x10] sm:$0xff]  ;;  %s2375_s12 = sadd.s32 1, %s3072_s24  ;;  %s2305_s8 = sadd.s32 1, %s3076_s8   ;;  %s3076_s8 = sphi %s5621_s8, %s2305_s8   ;;  %s3072_s24 = sphi %s5619_s24, %s6718_s24   ;;  %s3068_s7 = sphi %s6715_s7, %s6717_s7   ;;  %s3064_s19 = sphi %s6714_s19, %s6716_s19  }
 0x33e   : >> { %2312 = vst [vmem:[%s3064_s19] sm:$0xff] %v2311_v23  ;;  %2314 = vst [vmem:[%s3064_s19 + $0x8] sm:$0xff] %v2313_v63  ;;  %v2317_v14 = vld [vmem:[%s3068_s7 + $0x18] sm:$0xff]  ;;  %v2319_v12 = vld [vmem:[%s3068_s7 + $0x20] sm:$0xff]  ;;  %p2376_p13 = scmp.ge.s32.totalorder %s2375_s12, %s5610_s26  ;;  %p2304_p11 = scmp.ge.s32.totalorder %s2305_s8, %s5610_s26 }
 0x33f   : >> { %2316 = vst [vmem:[%s3064_s19 + $0x10] sm:$0xff] %v2315_v57  ;;  %v2321_v27 = vld [vmem:[%s3068_s7 + $0x28] sm:$0xff]  ;;  %2318 = vst [vmem:[%s3064_s19 + $0x18] sm:$0xff] %v2317_v14  ;;  %v2323_v22 = vld [vmem:[%s3068_s7 + $0x30] sm:$0xff] }
 0x340   : >> { %2320 = vst [vmem:[%s3064_s19 + $0x20] sm:$0xff] %v2319_v12  ;;  %2322 = vst [vmem:[%s3064_s19 + $0x28] sm:$0xff] %v2321_v27  ;;  %v2325_v10 = vld [vmem:[%s3068_s7 + $0x38] sm:$0xff]  ;;  %v2327_v32 = vld [vmem:[%s3068_s7 + $0x40] sm:$0xff]  ;;  %s6730_s12 = smov (%p2376_p13, %s2375_s12), 0 }
 0x341   : >> { %2324 = vst [vmem:[%s3064_s19 + $0x30] sm:$0xff] %v2323_v22  ;;  %2326 = vst [vmem:[%s3064_s19 + $0x38] sm:$0xff] %v2325_v10  ;;  %v2329_v54 = vld [vmem:[%s3068_s7 + $0x48] sm:$0xff]  ;;  %v2331_v9 = vld [vmem:[%s3068_s7 + $0x50] sm:$0xff]  ;;  %s2601_s9 = sshll.u32 %s6730_s12, 8  ;;  %s6718_s24 = smov %s6730_s12 }
 0x342   : >> { %2328 = vst [vmem:[%s3064_s19 + $0x40] sm:$0xff] %v2327_v32  ;;  %v2333_v19 = vld [vmem:[%s3068_s7 + $0x58] sm:$0xff]  ;;  %2330 = vst [vmem:[%s3064_s19 + $0x48] sm:$0xff] %v2329_v54  ;;  %v2335_v47 = vld [vmem:[%s3068_s7 + $0x60] sm:$0xff]  ;;  %s5677_s10 = scalar_lea.vmem %s5530_s18, %s2601_s9 [#allocation7]   ;;  %s2381_s27 = scalar_lea.vmem %s5604_s22, %s2601_s9  }
 0x343   : >> { %2332 = vst [vmem:[%s3064_s19 + $0x50] sm:$0xff] %v2331_v9  ;;  %2334 = vst [vmem:[%s3064_s19 + $0x58] sm:$0xff] %v2333_v19  ;;  %v2337_v5 = vld [vmem:[%s3068_s7 + $0x68] sm:$0xff]  ;;  %v2339_v38 = vld [vmem:[%s3068_s7 + $0x70] sm:$0xff] }
 0x344   : >> { %2336 = vst [vmem:[%s3064_s19 + $0x60] sm:$0xff] %v2335_v47  ;;  %2338 = vst [vmem:[%s3064_s19 + $0x68] sm:$0xff] %v2337_v5  ;;  %v2341_v24 = vld [vmem:[%s3068_s7 + $0x78] sm:$0xff]  ;;  %v2343_v13 = vld [vmem:[%s3068_s7 + $0x80] sm:$0xff] }
 0x345   : >> { %2340 = vst [vmem:[%s3064_s19 + $0x70] sm:$0xff] %v2339_v38  ;;  %v2345_v60 = vld [vmem:[%s3068_s7 + $0x88] sm:$0xff]  ;;  %2342 = vst [vmem:[%s3064_s19 + $0x78] sm:$0xff] %v2341_v24  ;;  %v2347_v36 = vld [vmem:[%s3068_s7 + $0x90] sm:$0xff] }
 0x346   : >> { %2344 = vst [vmem:[%s3064_s19 + $0x80] sm:$0xff] %v2343_v13  ;;  %2346 = vst [vmem:[%s3064_s19 + $0x88] sm:$0xff] %v2345_v60  ;;  %v2349_v6 = vld [vmem:[%s3068_s7 + $0x98] sm:$0xff]  ;;  %v2351_v53 = vld [vmem:[%s3068_s7 + $0xa0] sm:$0xff] }
 0x347   : >> { %2348 = vst [vmem:[%s3064_s19 + $0x90] sm:$0xff] %v2347_v36  ;;  %2350 = vst [vmem:[%s3064_s19 + $0x98] sm:$0xff] %v2349_v6  ;;  %v2353_v55 = vld [vmem:[%s3068_s7 + $0xa8] sm:$0xff]  ;;  %v2355_v59 = vld [vmem:[%s3068_s7 + $0xb0] sm:$0xff]  ;;  %2307 = sbr.rel (!%p2304_p11) target bundleno = 829 (0x33d), region = 153 }
 0x348   : >> { %2352 = vst [vmem:[%s3064_s19 + $0xa0] sm:$0xff] %v2351_v53  ;;  %v2357_v50 = vld [vmem:[%s3068_s7 + $0xb8] sm:$0xff]  ;;  %2354 = vst [vmem:[%s3064_s19 + $0xa8] sm:$0xff] %v2353_v55  ;;  %v2359_v49 = vld [vmem:[%s3068_s7 + $0xc0] sm:$0xff] }
 0x349   : >> { %2356 = vst [vmem:[%s3064_s19 + $0xb0] sm:$0xff] %v2355_v59  ;;  %2358 = vst [vmem:[%s3064_s19 + $0xb8] sm:$0xff] %v2357_v50  ;;  %v2361_v33 = vld [vmem:[%s3068_s7 + $0xc8] sm:$0xff]  ;;  %v2363_v40 = vld [vmem:[%s3068_s7 + $0xd0] sm:$0xff] }
 0x34a   : >> { %2360 = vst [vmem:[%s3064_s19 + $0xc0] sm:$0xff] %v2359_v49  ;;  %2362 = vst [vmem:[%s3064_s19 + $0xc8] sm:$0xff] %v2361_v33  ;;  %v2365_v62 = vld [vmem:[%s3068_s7 + $0xd8] sm:$0xff]  ;;  %v2367_v51 = vld [vmem:[%s3068_s7 + $0xe0] sm:$0xff] }
 0x34b   : >> { %2364 = vst [vmem:[%s3064_s19 + $0xd0] sm:$0xff] %v2363_v40  ;;  %v2369_v58 = vld [vmem:[%s3068_s7 + $0xe8] sm:$0xff]  ;;  %2366 = vst [vmem:[%s3064_s19 + $0xd8] sm:$0xff] %v2365_v62  ;;  %v2371_v18 = vld [vmem:[%s3068_s7 + $0xf0] sm:$0xff] }
 0x34c   : >> { %2368 = vst [vmem:[%s3064_s19 + $0xe0] sm:$0xff] %v2367_v51  ;;  %2370 = vst [vmem:[%s3064_s19 + $0xe8] sm:$0xff] %v2369_v58  ;;  %v2373_v7 = vld [vmem:[%s3068_s7 + $0xf8] sm:$0xff]  ;;  %s6717_s7 = smov %s5677_s10 }
 0x34d   : >> { %2372 = vst [vmem:[%s3064_s19 + $0xf0] sm:$0xff] %v2371_v18  ;;  %2374 = vst [vmem:[%s3064_s19 + $0xf8] sm:$0xff] %v2373_v7  ;;  %s6716_s19 = smov %s2381_s27 }
 0x34e PF: > { %s5718_s5 = sand.u32 31, %s6728_s28   ;;  %s2616_s30 = sshll.u32 %s5610_s26, 8 }
 0x34f   : > { %s2386_s13 = scalar_lea.vmem %s5530_s18, %s2616_s30 [#allocation7]   ;;  %s2388_s25 = scalar_lea.vmem %s5604_s22, %s2616_s30  }
 0x350   : > { %p2606_p1 = scmp.le.s32.totalorder %s5718_s5, 0 }
 0x351   : > { %s3078_s29 = smov (!%p2606_p1), %s2388_s25   ;;  %s3082_s11 = smov (!%p2606_p1), %s2386_s13  }
 0x352   : > { %2501 = sbr.rel (%p2606_p1) target bundleno = 867 (0x363), region = 158  ;;  %s3086_s14 = smov (!%p2606_p1), 0  }
 0x353   : > { %s3090_s15 = smov (!%p2606_p1), 0  }
 0x359 LB: >> { %v2398_v4 = vld [vmem:[%s3084_s11] sm:$0xff]  ;;  %s2400_s21 = sadd.s32 1, %s3088_s14  ;;  %s2392_s15 = sadd.s32 1, %s3092_s15   ;;  %s3092_s15 = sphi %s3090_s15, %s2392_s15   ;;  %s3088_s14 = sphi %s3086_s14, %s3087_s14   ;;  %s3084_s11 = sphi %s3082_s11, %s2405_s11   ;;  %s3080_s29 = sphi %s3078_s29, %s2406_s29  }
 0x35a   : >> { %2399 = vst [vmem:[%s3080_s29] sm:$0xff] %v2398_v4  ;;  %p2401_p3 = scmp.ge.s32.totalorder %s2400_s21, %s5718_s5  ;;  %p2391_p6 = scmp.ge.s32.totalorder %s2392_s15, %s5718_s5 }
 0x35c   : >> { %s6732_s21 = smov (%p2401_p3, %s2400_s21), 0  ;;  %2394 = sbr.rel (!%p2391_p6) target bundleno = 857 (0x359), region = 164 }
 0x35d   : >> { %s2607_s18 = sshll.u32 %s6732_s21, 3  ;;  %s3087_s14 = smov %s6732_s21  }
 0x35e   : >> { %s2405_s11 = scalar_lea.vmem %s2386_s13, %s2607_s18 [#allocation7]   ;;  %s2406_s29 = scalar_lea.vmem %s2388_s25, %s2607_s18  }
 0x363 PF: > { %p17_p9 = scmp.ge.s32.totalorder %s3151_s20, 4   ;;  %s6719_s15 = smov %s3052_s16 }
 0x364   : > { %s6720_s16 = smov %s3056_s17  ;;  %s6721_s17 = smov %s3161_s23 }
 0x365   : > { %s6722_s18 = smov %s3151_s20  ;;  %19 = sbr.rel (!%p17_p9) target bundleno = 5 (0x5), region = 175 }
 0x36c   :  { %2422 = vsyncpa [#allocation3], 1 }
 0x36d   :  { %2424 = vsyncpa [#allocation3 + $0x1], 1 }
 0x36e   :  { %2425 = vsyncpa [#allocation5], 1 }
 0x36f   :  { %2427 = vsyncpa [#allocation5 + $0x1], 1 }

</bundles_post_ra>
